<compile_context>
chip_gen: v6e
topology: v6e:2x2x1
jax: 0.10.0
libtpu: 0.0.40
codegen_flags: <defaults>
</compile_context>

<pallas_src>
import functools

import jax
import jax.numpy as jnp
from jax import lax
from jax.experimental import pallas as pl
from jax.experimental.pallas import tpu as pltpu


def _ckg_loss_kernel(h1i_ref, h2i_ref, h1jT_ref, h2jT_ref, out_ref,
                     m_a_ref, l_a_ref, m_b_ref, l_b_ref,
                     *, tau, alpha, batch, tile, n_tiles, padded):
    i = pl.program_id(0)            # query (row) block — parallel axis
    j = pl.program_id(1)            # key block         — reduction axis
    T = tile
    nt = n_tiles

    inv_tau = jnp.float32(1.0 / tau)
    NEG = jnp.float32(-1e30)
    LARGE = jnp.float32(1e9)

    h1i = h1i_ref[...]              # (T, D)  bf16/f32, resident across j
    h2i = h2i_ref[...]              # (T, D)
    h1jT = h1jT_ref[...]            # (D, T)  pre-transposed key block j
    h2jT = h2jT_ref[...]            # (D, T)

    # 4 MXU matmuls, NN contraction (no in-kernel transpose), f32 accumulation.
    s_aa = jnp.dot(h1i, h1jT, preferred_element_type=jnp.float32) * inv_tau
    s_bb = jnp.dot(h2i, h2jT, preferred_element_type=jnp.float32) * inv_tau
    s_ab = jnp.dot(h1i, h2jT, preferred_element_type=jnp.float32) * inv_tau
    s_ba = jnp.dot(h2i, h1jT, preferred_element_type=jnp.float32) * inv_tau

    # Eye penalty: only diagonal tiles (i == j) get a real -LARGE; gate with a
    # scalar so off-diagonal tiles pay a single broadcast select.
    lr = lax.broadcasted_iota(jnp.int32, (T, T), 0)
    lc = lax.broadcasted_iota(jnp.int32, (T, T), 1)
    diag_pen = jnp.where(i == j, -LARGE, jnp.float32(0.0))            # scalar
    eye_pen = jnp.where(lr == lc, diag_pen, jnp.float32(0.0))         # (T, T)

    # Key-padding penalty: only exists when B % T != 0 (static, trace-time gate),
    # and is only a (1, T) broadcast row.
    if padded:
        col_g = j * T + lax.broadcasted_iota(jnp.int32, (1, T), 1)
        pad_pen = jnp.where(col_g >= batch, -LARGE, jnp.float32(0.0))  # (1, T)
        s_aa = s_aa + pad_pen
        s_bb = s_bb + pad_pen
        s_ab = s_ab + pad_pen
        s_ba = s_ba + pad_pen
    s_aa = s_aa + eye_pen
    s_bb = s_bb + eye_pen

    @pl.when(j == 0)
    def _reset():
        m_a_ref[...] = jnp.full((T, 1), NEG, jnp.float32)
        m_b_ref[...] = jnp.full((T, 1), NEG, jnp.float32)
        l_a_ref[...] = jnp.zeros((T, 1), jnp.float32)
        l_b_ref[...] = jnp.zeros((T, 1), jnp.float32)

    # ---- loss_a: online LSE over [logits_ab | logits_aa] (rows of block i) ----
    t_max_a = jnp.max(jnp.maximum(s_ab, s_aa), axis=1, keepdims=True)   # fused max
    ma_old = m_a_ref[...]
    ma_new = jnp.maximum(ma_old, t_max_a)
    p_a = jnp.exp(s_ab - ma_new) + jnp.exp(s_aa - ma_new)               # fused exp-sum
    l_a_ref[...] = (l_a_ref[...] * jnp.exp(ma_old - ma_new)
                    + jnp.sum(p_a, axis=1, keepdims=True))
    m_a_ref[...] = ma_new

    # ---- loss_b: online LSE over [logits_ba | logits_bb] (rows of block i) ----
    t_max_b = jnp.max(jnp.maximum(s_ba, s_bb), axis=1, keepdims=True)
    mb_old = m_b_ref[...]
    mb_new = jnp.maximum(mb_old, t_max_b)
    p_b = jnp.exp(s_ba - mb_new) + jnp.exp(s_bb - mb_new)
    l_b_ref[...] = (l_b_ref[...] * jnp.exp(mb_old - mb_new)
                    + jnp.sum(p_b, axis=1, keepdims=True))
    m_b_ref[...] = mb_new

    # ---- finalize block i: per-row partial written once at the last key block ----
    @pl.when(j == nt - 1)
    def _finalize():
        lse_a = m_a_ref[...] + jnp.log(l_a_ref[...])                    # (T, 1)
        lse_b = m_b_ref[...] + jnp.log(l_b_ref[...])                    # (T, 1)
        # Target logit logits_ab[r,r] == logits_ba[r,r] via a single row-dot.
        diag = jnp.sum(h1i.astype(jnp.float32) * h2i.astype(jnp.float32),
                       axis=1, keepdims=True) * inv_tau
        per_row = (jnp.float32(alpha) * lse_a
                   + jnp.float32(1.0 - alpha) * lse_b
                   - diag)
        if padded:
            row_g = i * T + lax.broadcasted_iota(jnp.int32, (T, 1), 0)
            per_row = jnp.where(row_g < batch, per_row, jnp.float32(0.0))
        out_ref[...] = per_row


def _round_up(x, m):
    return ((x + m - 1) // m) * m


def ckg_loss(emb, train_links, tau=0.05, ab_weight=0.5, block_rows=256,
             use_bf16=True):
    """JAX/Pallas equivalent of CKG_Loss.forward (mask=None path)."""
    emb = emb.astype(jnp.float32)

    # Gather first, then L2-normalize only the B gathered rows (not all N).
    zis = emb[train_links[:, 0]]
    zjs = emb[train_links[:, 1]]

    def _l2norm(x):
        n = jnp.sqrt(jnp.sum(x * x, axis=1, keepdims=True))
        return x / jnp.maximum(n, 1e-12)          # == F.normalize(x, dim=1)

    h1 = _l2norm(zis)
    h2 = _l2norm(zjs)

    B, D = h1.shape
    # Lane-dense tiles: T a multiple of 128 (256 fills the v6e/v7x MXU).
    T = min(int(block_rows), _round_up(B, 128))
    T = _round_up(T, 128)
    B_pad = _round_up(B, T)
    nt = B_pad // T
    D_pad = _round_up(D, 128)

    pad_rows = B_pad - B
    pad_cols = D_pad - D
    if pad_rows or pad_cols:
        pad = ((0, pad_rows), (0, pad_cols))
        h1 = jnp.pad(h1, pad)
        h2 = jnp.pad(h2, pad)

    # bf16 MXU inputs (normalize stayed f32); accumulation stays f32 in-kernel.
    in_dtype = jnp.bfloat16 if use_bf16 else jnp.float32
    h1 = h1.astype(in_dtype)
    h2 = h2.astype(in_dtype)
    h1T = h1.T                                    # (D_pad, B_pad) pre-transposed keys
    h2T = h2.T

    kernel = functools.partial(
        _ckg_loss_kernel, tau=float(tau), alpha=float(ab_weight),
        batch=int(B), tile=int(T), n_tiles=int(nt), padded=bool(pad_rows))

    grid_spec = pltpu.PrefetchScalarGridSpec(
        num_scalar_prefetch=0,
        grid=(nt, nt),
        in_specs=[
            pl.BlockSpec((T, D_pad), lambda i, j: (i, 0)),   # h1 block i (resident over j)
            pl.BlockSpec((T, D_pad), lambda i, j: (i, 0)),   # h2 block i (resident over j)
            pl.BlockSpec((D_pad, T), lambda i, j: (0, j)),   # h1^T key block j (streamed)
            pl.BlockSpec((D_pad, T), lambda i, j: (0, j)),   # h2^T key block j (streamed)
        ],
        out_specs=pl.BlockSpec((T, 1), lambda i, j: (i, 0)),  # per-row partials
        scratch_shapes=[
            pltpu.VMEM((T, 1), jnp.float32),   # m_a (loss_a running max)
            pltpu.VMEM((T, 1), jnp.float32),   # l_a (loss_a running denom)
            pltpu.VMEM((T, 1), jnp.float32),   # m_b (loss_b running max)
            pltpu.VMEM((T, 1), jnp.float32),   # l_b (loss_b running denom)
        ],
    )

    partials = pl.pallas_call(
        kernel,
        out_shape=jax.ShapeDtypeStruct((B_pad, 1), jnp.float32),
        grid_spec=grid_spec,
        compiler_params=pltpu.CompilerParams(
            # i carries no cross-step state -> parallel (megacore); j is the
            # online-LSE reduction -> arbitrary.
            dimension_semantics=("parallel", "arbitrary"),
            vmem_limit_bytes=32 * 1024 * 1024),
    )(h1, h2, h1T, h2T)

    # TODO(synk): optional `mask` argument (stop-gradient row mask) not implemented.
    return jnp.sum(partials) / jnp.float32(B)


def _reference(emb, train_links, tau=0.05, ab_weight=0.5):
    """Pure-JAX reference mirroring the PyTorch forward (for sanity check)."""
    emb = emb / jnp.maximum(
        jnp.sqrt(jnp.sum(emb * emb, axis=1, keepdims=True)), 1e-12)
    h1 = emb[train_links[:, 0]]
    h2 = emb[train_links[:, 1]]
    B = h1.shape[0]
    masks = jnp.eye(B, dtype=jnp.float32)
    LARGE = 1e9
    l_aa = h1 @ h1.T / tau - masks * LARGE
    l_bb = h2 @ h2.T / tau - masks * LARGE
    l_ab = h1 @ h2.T / tau
    l_ba = h2 @ h1.T / tau
    labels = jnp.concatenate([jnp.eye(B), jnp.zeros((B, B))], axis=1)

    def sx(logits):
        lp = jax.nn.log_softmax(logits, axis=1)
        return -(labels * lp).sum() / B

    la = sx(jnp.concatenate([l_ab, l_aa], axis=1))
    lb = sx(jnp.concatenate([l_ba, l_bb], axis=1))
    return ab_weight * la + (1 - ab_weight) * lb


if __name__ == "__main__":
    key = jax.random.PRNGKey(0)
    k_emb, k_links = jax.random.split(key)

    N, D, B = 512, 96, 200        # entities, hidden dim, number of train links
    emb = jax.random.normal(k_emb, (N, D), dtype=jnp.float32)
    train_links = jax.random.randint(k_links, (B, 2), 0, N, dtype=jnp.int32)

    ref = jax.block_until_ready(_reference(emb, train_links, tau=0.05, ab_weight=0.5))

    # Multi-tile path with padding: B=200 -> B_pad=256, T=128, 2x2 grid; D 96 -> 128.
    out_f32 = jax.block_until_ready(
        ckg_loss(emb, train_links, tau=0.05, ab_weight=0.5,
                 block_rows=128, use_bf16=False))
    assert jnp.allclose(out_f32, ref, rtol=1e-4, atol=1e-4), (out_f32, ref)

    # Same path with bf16 MXU inputs (f32 accumulation) -> looser tolerance.
    out_bf16 = jax.block_until_ready(
        ckg_loss(emb, train_links, tau=0.05, ab_weight=0.5,
                 block_rows=128, use_bf16=True))
    assert jnp.allclose(out_bf16, ref, rtol=3e-2, atol=3e-2), (out_bf16, ref)

    # Single-tile path: whole (padded) batch in one 256-row block (nt == 1).
    out_single = jax.block_until_ready(
        ckg_loss(emb, train_links, tau=0.05, ab_weight=0.5,
                 block_rows=256, use_bf16=True))
    assert jnp.allclose(out_single, ref, rtol=3e-2, atol=3e-2), (out_single, ref)

    print("KERNEL_OK")
</pallas_src>

<mosaic_0001>
module attributes {stable_mosaic.version = 11 : i64} {
  func.func @_ckg_loss_kernel(%arg0: i32, %arg1: i32, %arg2: memref<128x128xf32, #tpu.memory_space<vmem>>, %arg3: memref<128x128xf32, #tpu.memory_space<vmem>>, %arg4: memref<128x128xf32, #tpu.memory_space<vmem>>, %arg5: memref<128x128xf32, #tpu.memory_space<vmem>>, %arg6: memref<128x1xf32, #tpu.memory_space<vmem>>, %arg7: memref<128x1xf32, #tpu.memory_space<vmem>>, %arg8: memref<128x1xf32, #tpu.memory_space<vmem>>, %arg9: memref<128x1xf32, #tpu.memory_space<vmem>>, %arg10: memref<128x1xf32, #tpu.memory_space<vmem>>) attributes {dimension_semantics = [#tpu.dimension_semantics<parallel>, #tpu.dimension_semantics<arbitrary>], iteration_bounds = array<i64: 2, 2>, scalar_prefetch = 0 : i64, scratch_operands = 4 : i64, tpu.core_type = #tpu.core_type<tc>, window_params = [{transform_indices = @transform_0, window_bounds = array<i64: 128, 128>}, {transform_indices = @transform_1, window_bounds = array<i64: 128, 128>}, {transform_indices = @transform_2, window_bounds = array<i64: 128, 128>}, {transform_indices = @transform_3, window_bounds = array<i64: 128, 128>}, {transform_indices = @transform_4, window_bounds = array<i64: 128, 1>}]} {
    %c0 = arith.constant 0 : index
    %c0_0 = arith.constant 0 : index
    %0 = vector.load %arg2[%c0, %c0_0] : memref<128x128xf32, #tpu.memory_space<vmem>>, vector<128x128xf32>
    %c0_1 = arith.constant 0 : index
    %c0_2 = arith.constant 0 : index
    %1 = vector.load %arg3[%c0_1, %c0_2] : memref<128x128xf32, #tpu.memory_space<vmem>>, vector<128x128xf32>
    %c0_3 = arith.constant 0 : index
    %c0_4 = arith.constant 0 : index
    %2 = vector.load %arg4[%c0_3, %c0_4] : memref<128x128xf32, #tpu.memory_space<vmem>>, vector<128x128xf32>
    %c0_5 = arith.constant 0 : index
    %c0_6 = arith.constant 0 : index
    %3 = vector.load %arg5[%c0_5, %c0_6] : memref<128x128xf32, #tpu.memory_space<vmem>>, vector<128x128xf32>
    %cst = arith.constant dense<0.000000e+00> : vector<128x128xf32>
    %4 = tpu.matmul %0, %2, %cst {dimension_numbers = #tpu.dot_dimension_numbers<[1], [0], [0], [1], [0, 0, 1, 1], [], []>} : vector<128x128xf32>, vector<128x128xf32>, vector<128x128xf32> -> vector<128x128xf32>
    %cst_7 = arith.constant 2.000000e+01 : f32
    %5 = vector.broadcast %cst_7 : f32 to vector<128x128xf32>
    %6 = arith.mulf %4, %5 : vector<128x128xf32>
    %cst_8 = arith.constant dense<0.000000e+00> : vector<128x128xf32>
    %7 = tpu.matmul %1, %3, %cst_8 {dimension_numbers = #tpu.dot_dimension_numbers<[1], [0], [0], [1], [0, 0, 1, 1], [], []>} : vector<128x128xf32>, vector<128x128xf32>, vector<128x128xf32> -> vector<128x128xf32>
    %cst_9 = arith.constant 2.000000e+01 : f32
    %8 = vector.broadcast %cst_9 : f32 to vector<128x128xf32>
    %9 = arith.mulf %7, %8 : vector<128x128xf32>
    %cst_10 = arith.constant dense<0.000000e+00> : vector<128x128xf32>
    %10 = tpu.matmul %0, %3, %cst_10 {dimension_numbers = #tpu.dot_dimension_numbers<[1], [0], [0], [1], [0, 0, 1, 1], [], []>} : vector<128x128xf32>, vector<128x128xf32>, vector<128x128xf32> -> vector<128x128xf32>
    %cst_11 = arith.constant 2.000000e+01 : f32
    %11 = vector.broadcast %cst_11 : f32 to vector<128x128xf32>
    %12 = arith.mulf %10, %11 : vector<128x128xf32>
    %cst_12 = arith.constant dense<0.000000e+00> : vector<128x128xf32>
    %13 = tpu.matmul %1, %2, %cst_12 {dimension_numbers = #tpu.dot_dimension_numbers<[1], [0], [0], [1], [0, 0, 1, 1], [], []>} : vector<128x128xf32>, vector<128x128xf32>, vector<128x128xf32> -> vector<128x128xf32>
    %cst_13 = arith.constant 2.000000e+01 : f32
    %14 = vector.broadcast %cst_13 : f32 to vector<128x128xf32>
    %15 = arith.mulf %13, %14 : vector<128x128xf32>
    %16 = tpu.iota {dimensions = array<i32: 0>} : vector<128x128xi32>
    %17 = tpu.iota {dimensions = array<i32: 1>} : vector<128x128xi32>
    %18 = arith.cmpi eq, %arg0, %arg1 : i32
    %cst_14 = arith.constant 0.000000e+00 : f32
    %cst_15 = arith.constant 1.000000e+09 : f32
    %19 = arith.subf %cst_14, %cst_15 : f32
    %cst_16 = arith.constant 0.000000e+00 : f32
    %20 = arith.select %18, %19, %cst_16 : f32
    %21 = arith.cmpi eq, %16, %17 : vector<128x128xi32>
    %cst_17 = arith.constant 0.000000e+00 : f32
    %22 = vector.broadcast %20 : f32 to vector<128x128xf32>
    %23 = vector.broadcast %cst_17 : f32 to vector<128x128xf32>
    %24 = arith.select %21, %22, %23 : vector<128x128xi1>, vector<128x128xf32>
    %c128_i32 = arith.constant 128 : i32
    %25 = arith.muli %arg1, %c128_i32 : i32
    %26 = tpu.iota {dimensions = array<i32: 1>} : vector<1x128xi32>
    %27 = vector.broadcast %25 : i32 to vector<1x128xi32>
    %28 = arith.addi %27, %26 : vector<1x128xi32>
    %c200_i32 = arith.constant 200 : i32
    %29 = vector.broadcast %c200_i32 : i32 to vector<1x128xi32>
    %30 = arith.cmpi sge, %28, %29 : vector<1x128xi32>
    %cst_18 = arith.constant 0.000000e+00 : f32
    %cst_19 = arith.constant 1.000000e+09 : f32
    %31 = arith.subf %cst_18, %cst_19 : f32
    %cst_20 = arith.constant 0.000000e+00 : f32
    %32 = vector.broadcast %31 : f32 to vector<1x128xf32>
    %33 = vector.broadcast %cst_20 : f32 to vector<1x128xf32>
    %34 = arith.select %30, %32, %33 : vector<1x128xi1>, vector<1x128xf32>
    %35 = vector.broadcast %34 : vector<1x128xf32> to vector<128x128xf32>
    %36 = arith.addf %6, %35 : vector<128x128xf32>
    %37 = vector.broadcast %34 : vector<1x128xf32> to vector<128x128xf32>
    %38 = arith.addf %9, %37 : vector<128x128xf32>
    %39 = vector.broadcast %34 : vector<1x128xf32> to vector<128x128xf32>
    %40 = arith.addf %12, %39 : vector<128x128xf32>
    %41 = vector.broadcast %34 : vector<1x128xf32> to vector<128x128xf32>
    %42 = arith.addf %15, %41 : vector<128x128xf32>
    %43 = arith.addf %36, %24 : vector<128x128xf32>
    %44 = arith.addf %38, %24 : vector<128x128xf32>
    %c0_i32 = arith.constant 0 : i32
    %45 = arith.cmpi eq, %arg1, %c0_i32 : i32
    %46 = arith.extui %45 : i1 to i32
    %cst_21 = arith.constant -1.000000e+30 : f32
    %c0_i32_22 = arith.constant 0 : i32
    %47 = arith.cmpi ne, %46, %c0_i32_22 : i32
    scf.if %47 {
      %93 = vector.broadcast %cst_21 : f32 to vector<128x1xf32>
      %c0_45 = arith.constant 0 : index
      %c0_46 = arith.constant 0 : index
      %94 = vector.load %arg7[%c0_45, %c0_46] : memref<128x1xf32, #tpu.memory_space<vmem>>, vector<128x1xf32>
      tpu.vector_store %arg7[%c0_45, %c0_46], %93 {strides = array<i32>} : memref<128x1xf32, #tpu.memory_space<vmem>>, vector<128x1xf32>,
      %95 = vector.broadcast %cst_21 : f32 to vector<128x1xf32>
      %c0_47 = arith.constant 0 : index
      %c0_48 = arith.constant 0 : index
      %96 = vector.load %arg9[%c0_47, %c0_48] : memref<128x1xf32, #tpu.memory_space<vmem>>, vector<128x1xf32>
      tpu.vector_store %arg9[%c0_47, %c0_48], %95 {strides = array<i32>} : memref<128x1xf32, #tpu.memory_space<vmem>>, vector<128x1xf32>,
      %cst_49 = arith.constant 0.000000e+00 : f32
      %97 = vector.broadcast %cst_49 : f32 to vector<128x1xf32>
      %c0_50 = arith.constant 0 : index
      %c0_51 = arith.constant 0 : index
      %98 = vector.load %arg8[%c0_50, %c0_51] : memref<128x1xf32, #tpu.memory_space<vmem>>, vector<128x1xf32>
      tpu.vector_store %arg8[%c0_50, %c0_51], %97 {strides = array<i32>} : memref<128x1xf32, #tpu.memory_space<vmem>>, vector<128x1xf32>,
      %cst_52 = arith.constant 0.000000e+00 : f32
      %99 = vector.broadcast %cst_52 : f32 to vector<128x1xf32>
      %c0_53 = arith.constant 0 : index
      %c0_54 = arith.constant 0 : index
      %100 = vector.load %arg10[%c0_53, %c0_54] : memref<128x1xf32, #tpu.memory_space<vmem>>, vector<128x1xf32>
      tpu.vector_store %arg10[%c0_53, %c0_54], %99 {strides = array<i32>} : memref<128x1xf32, #tpu.memory_space<vmem>>, vector<128x1xf32>,
    } else {
    }
    %48 = arith.maximumf %40, %43 : vector<128x128xf32>
    %cst_23 = arith.constant dense<0xFF800000> : vector<128xf32>
    %49 = vector.multi_reduction <maximumf>, %48, %cst_23 [1] : vector<128x128xf32> to vector<128xf32>
    %50 = vector.shape_cast %49 : vector<128xf32> to vector<128x1xf32>
    %c0_24 = arith.constant 0 : index
    %c0_25 = arith.constant 0 : index
    %51 = vector.load %arg7[%c0_24, %c0_25] : memref<128x1xf32, #tpu.memory_space<vmem>>, vector<128x1xf32>
    %52 = arith.maximumf %51, %50 : vector<128x1xf32>
    %53 = vector.broadcast %52 : vector<128x1xf32> to vector<128x128xf32>
    %54 = arith.subf %40, %53 : vector<128x128xf32>
    %55 = math.exp %54 : vector<128x128xf32>
    %56 = vector.broadcast %52 : vector<128x1xf32> to vector<128x128xf32>
    %57 = arith.subf %43, %56 : vector<128x128xf32>
    %58 = math.exp %57 : vector<128x128xf32>
    %59 = arith.addf %55, %58 : vector<128x128xf32>
    %c0_26 = arith.constant 0 : index
    %c0_27 = arith.constant 0 : index
    %60 = vector.load %arg8[%c0_26, %c0_27] : memref<128x1xf32, #tpu.memory_space<vmem>>, vector<128x1xf32>
    %61 = arith.subf %51, %52 : vector<128x1xf32>
    %62 = math.exp %61 : vector<128x1xf32>
    %63 = arith.mulf %60, %62 : vector<128x1xf32>
    %cst_28 = arith.constant dense<0.000000e+00> : vector<128xf32>
    %64 = vector.multi_reduction <add>, %59, %cst_28 [1] : vector<128x128xf32> to vector<128xf32>
    %65 = vector.shape_cast %64 : vector<128xf32> to vector<128x1xf32>
    %66 = arith.addf %63, %65 : vector<128x1xf32>
    %c0_29 = arith.constant 0 : index
    %c0_30 = arith.constant 0 : index
    %67 = vector.load %arg8[%c0_29, %c0_30] : memref<128x1xf32, #tpu.memory_space<vmem>>, vector<128x1xf32>
    tpu.vector_store %arg8[%c0_29, %c0_30], %66 {strides = array<i32>} : memref<128x1xf32, #tpu.memory_space<vmem>>, vector<128x1xf32>,
    %c0_31 = arith.constant 0 : index
    %c0_32 = arith.constant 0 : index
    %68 = vector.load %arg7[%c0_31, %c0_32] : memref<128x1xf32, #tpu.memory_space<vmem>>, vector<128x1xf32>
    tpu.vector_store %arg7[%c0_31, %c0_32], %52 {strides = array<i32>} : memref<128x1xf32, #tpu.memory_space<vmem>>, vector<128x1xf32>,
    %69 = arith.maximumf %42, %44 : vector<128x128xf32>
    %cst_33 = arith.constant dense<0xFF800000> : vector<128xf32>
    %70 = vector.multi_reduction <maximumf>, %69, %cst_33 [1] : vector<128x128xf32> to vector<128xf32>
    %71 = vector.shape_cast %70 : vector<128xf32> to vector<128x1xf32>
    %c0_34 = arith.constant 0 : index
    %c0_35 = arith.constant 0 : index
    %72 = vector.load %arg9[%c0_34, %c0_35] : memref<128x1xf32, #tpu.memory_space<vmem>>, vector<128x1xf32>
    %73 = arith.maximumf %72, %71 : vector<128x1xf32>
    %74 = vector.broadcast %73 : vector<128x1xf32> to vector<128x128xf32>
    %75 = arith.subf %42, %74 : vector<128x128xf32>
    %76 = math.exp %75 : vector<128x128xf32>
    %77 = vector.broadcast %73 : vector<128x1xf32> to vector<128x128xf32>
    %78 = arith.subf %44, %77 : vector<128x128xf32>
    %79 = math.exp %78 : vector<128x128xf32>
    %80 = arith.addf %76, %79 : vector<128x128xf32>
    %c0_36 = arith.constant 0 : index
    %c0_37 = arith.constant 0 : index
    %81 = vector.load %arg10[%c0_36, %c0_37] : memref<128x1xf32, #tpu.memory_space<vmem>>, vector<128x1xf32>
    %82 = arith.subf %72, %73 : vector<128x1xf32>
    %83 = math.exp %82 : vector<128x1xf32>
    %84 = arith.mulf %81, %83 : vector<128x1xf32>
    %cst_38 = arith.constant dense<0.000000e+00> : vector<128xf32>
    %85 = vector.multi_reduction <add>, %80, %cst_38 [1] : vector<128x128xf32> to vector<128xf32>
    %86 = vector.shape_cast %85 : vector<128xf32> to vector<128x1xf32>
    %87 = arith.addf %84, %86 : vector<128x1xf32>
    %c0_39 = arith.constant 0 : index
    %c0_40 = arith.constant 0 : index
    %88 = vector.load %arg10[%c0_39, %c0_40] : memref<128x1xf32, #tpu.memory_space<vmem>>, vector<128x1xf32>
    tpu.vector_store %arg10[%c0_39, %c0_40], %87 {strides = array<i32>} : memref<128x1xf32, #tpu.memory_space<vmem>>, vector<128x1xf32>,
    %c0_41 = arith.constant 0 : index
    %c0_42 = arith.constant 0 : index
    %89 = vector.load %arg9[%c0_41, %c0_42] : memref<128x1xf32, #tpu.memory_space<vmem>>, vector<128x1xf32>
    tpu.vector_store %arg9[%c0_41, %c0_42], %73 {strides = array<i32>} : memref<128x1xf32, #tpu.memory_space<vmem>>, vector<128x1xf32>,
    %c1_i32 = arith.constant 1 : i32
    %90 = arith.cmpi eq, %arg1, %c1_i32 : i32
    %91 = arith.extui %90 : i1 to i32
    %cst_43 = arith.constant 2.000000e+01 : f32
    %c0_i32_44 = arith.constant 0 : i32
    %92 = arith.cmpi ne, %91, %c0_i32_44 : i32
    scf.if %92 {
      %c0_45 = arith.constant 0 : index
      %c0_46 = arith.constant 0 : index
      %93 = vector.load %arg7[%c0_45, %c0_46] : memref<128x1xf32, #tpu.memory_space<vmem>>, vector<128x1xf32>
      %c0_47 = arith.constant 0 : index
      %c0_48 = arith.constant 0 : index
      %94 = vector.load %arg8[%c0_47, %c0_48] : memref<128x1xf32, #tpu.memory_space<vmem>>, vector<128x1xf32>
      %95 = math.log %94 : vector<128x1xf32>
      %96 = arith.addf %93, %95 : vector<128x1xf32>
      %c0_49 = arith.constant 0 : index
      %c0_50 = arith.constant 0 : index
      %97 = vector.load %arg9[%c0_49, %c0_50] : memref<128x1xf32, #tpu.memory_space<vmem>>, vector<128x1xf32>
      %c0_51 = arith.constant 0 : index
      %c0_52 = arith.constant 0 : index
      %98 = vector.load %arg10[%c0_51, %c0_52] : memref<128x1xf32, #tpu.memory_space<vmem>>, vector<128x1xf32>
      %99 = math.log %98 : vector<128x1xf32>
      %100 = arith.addf %97, %99 : vector<128x1xf32>
      %101 = arith.mulf %0, %1 : vector<128x128xf32>
      %cst_53 = arith.constant dense<0.000000e+00> : vector<128xf32>
      %102 = vector.multi_reduction <add>, %101, %cst_53 [1] : vector<128x128xf32> to vector<128xf32>
      %103 = vector.shape_cast %102 : vector<128xf32> to vector<128x1xf32>
      %104 = vector.broadcast %cst_43 : f32 to vector<128x1xf32>
      %105 = arith.mulf %103, %104 : vector<128x1xf32>
      %cst_54 = arith.constant 5.000000e-01 : f32
      %106 = vector.broadcast %cst_54 : f32 to vector<128x1xf32>
      %107 = arith.mulf %106, %96 : vector<128x1xf32>
      %cst_55 = arith.constant 5.000000e-01 : f32
      %108 = vector.broadcast %cst_55 : f32 to vector<128x1xf32>
      %109 = arith.mulf %108, %100 : vector<128x1xf32>
      %110 = arith.addf %107, %109 : vector<128x1xf32>
      %111 = arith.subf %110, %105 : vector<128x1xf32>
      %c128_i32_56 = arith.constant 128 : i32
      %112 = arith.muli %arg0, %c128_i32_56 : i32
      %113 = tpu.iota {dimensions = array<i32: 0>} : vector<128x1xi32>
      %114 = vector.broadcast %112 : i32 to vector<128x1xi32>
      %115 = arith.addi %114, %113 : vector<128x1xi32>
      %c200_i32_57 = arith.constant 200 : i32
      %116 = vector.broadcast %c200_i32_57 : i32 to vector<128x1xi32>
      %117 = arith.cmpi slt, %115, %116 : vector<128x1xi32>
      %cst_58 = arith.constant 0.000000e+00 : f32
      %118 = vector.broadcast %cst_58 : f32 to vector<128x1xf32>
      %119 = arith.select %117, %111, %118 : vector<128x1xi1>, vector<128x1xf32>
      %c0_59 = arith.constant 0 : index
      %c0_60 = arith.constant 0 : index
      %120 = vector.load %arg6[%c0_59, %c0_60] : memref<128x1xf32, #tpu.memory_space<vmem>>, vector<128x1xf32>
      tpu.vector_store %arg6[%c0_59, %c0_60], %119 {strides = array<i32>} : memref<128x1xf32, #tpu.memory_space<vmem>>, vector<128x1xf32>,
    } else {
    }
    return
  }
  func.func @transform_0(%arg0: i32, %arg1: i32) -> (i32, i32) {
    %c0_i32 = arith.constant 0 : i32
    %c0_i32_0 = arith.constant 0 : i32
    return %arg0, %c0_i32 : i32, i32
  }
  func.func @transform_1(%arg0: i32, %arg1: i32) -> (i32, i32) {
    %c0_i32 = arith.constant 0 : i32
    %c0_i32_0 = arith.constant 0 : i32
    return %arg0, %c0_i32 : i32, i32
  }
  func.func @transform_2(%arg0: i32, %arg1: i32) -> (i32, i32) {
    %c0_i32 = arith.constant 0 : i32
    %c0_i32_0 = arith.constant 0 : i32
    return %c0_i32, %arg1 : i32, i32
  }
  func.func @transform_3(%arg0: i32, %arg1: i32) -> (i32, i32) {
    %c0_i32 = arith.constant 0 : i32
    %c0_i32_0 = arith.constant 0 : i32
    return %c0_i32, %arg1 : i32, i32
  }
  func.func @transform_4(%arg0: i32, %arg1: i32) -> (i32, i32) {
    %c0_i32 = arith.constant 0 : i32
    %c0_i32_0 = arith.constant 0 : i32
    return %arg0, %c0_i32 : i32, i32
  }
}

</mosaic_0001>

<bundles_post_ra>
// kernel: tpu_custom_call.1
= control target key start
LH: loop header
LB: loop body
LE: loop exit
PB: predicated region body
PF: predicated region fallthrough
CT: control target
= control target key end

     0   :  { %s5439_s0 = inlined_call_operand.hbm [shape: f32[256,128], index: 0, kind: input, shape index: {}]   ;;  %s5440_s1 = inlined_call_operand.hbm [shape: f32[256,128], index: 1, kind: input, shape index: {}]   ;;  %s5441_s2 = inlined_call_operand.hbm [shape: f32[128,256], index: 2, kind: input, shape index: {}]   ;;  %s5442_s3 = inlined_call_operand.hbm [shape: f32[128,256], index: 3, kind: input, shape index: {}]   ;;  %s5443_s4 = inlined_call_operand.vmem [shape: f32[256,1], index: 4, kind: output, shape index: {}]  }
   0x1   :  { %5582 = sst [smem:[#allocation148_spill]] %s5439_s0 }
   0x2   :  { %5583 = sst [smem:[#allocation149_spill]] %s5440_s1 }
   0x3   :  { %5584 = sst [smem:[#allocation150_spill]] %s5441_s2 }
   0x4   :  { %5585 = sst [smem:[#allocation151_spill]] %s5443_s4 }
   0x5   :  { %9 = vsyncpa [#allocation7], 0 }
   0x6   :  { %11 = vsyncpa [#allocation7 + $0x1], 0 }
   0x7   :  { %12 = vsyncpa [#allocation9], 0 }
   0x8   :  { %14 = vsyncpa [#allocation9 + $0x1], 0 }
   0x9   :  { %15 = vsyncpa [#allocation12], 0 }
   0xa   :  { %17 = vsyncpa [#allocation12 + $0x1], 0  ;;  %s3656_s15 = smov 0   ;;  %s3658_s16 = smov 0  }
   0xb   :  { %s3660_s17 = smov 0   ;;  %s3662_s18 = smov 0  }
   0xc   :  { %s3664_s19 = smov 0   ;;  %s3666_s20 = smov 0  }
   0xd   :  { %s3668_s21 = smov 0   ;;  %s3670_s22 = smov 0  }
   0xe   :  { %s3672_s23 = smov 0   ;;  %s3674_s24 = smov 0  }
   0xf   :  { %s3676_s25 = smov 0  }
  0x10 LB: > { %5586 = sst [smem:[#allocation17_spill]] %s3602_s21  ;;  %s5444_s26 = sadd.s32 4294967295, %s3618_s25   ;;  %s3618_s25 = sphi %s3676_s25, %s23_s25   ;;  %s3614_s24 = sphi %s3674_s24, %s5908_s24   ;;  %s3610_s23 = sphi %s3672_s23, %s5917_s23   ;;  %s3606_s22 = sphi %s3670_s22, %s5916_s22   ;;  %s3602_s21 = sphi %s3668_s21, %s5915_s21   ;;  %s3598_s20 = sphi %s3666_s20, %s5914_s20   ;;  %s3594_s19 = sphi %s3664_s19, %s5913_s19   ;;  %s3590_s18 = sphi %s3662_s18, %s5912_s18   ;;  %s3586_s17 = sphi %s3660_s17, %s5911_s17   ;;  %s3582_s16 = sphi %s3658_s16, %s5910_s16   ;;  %s3578_s15 = sphi %s3656_s15, %s5909_s15  }
  0x11   : > { %5587 = sst [smem:[#allocation18_spill]] %s3614_s24  ;;  %s32_s27 = sadd.s32 1, %s3610_s23 }
  0x12   : > { %p33_p0 = scmp.ge.s32.totalorder %s32_s27, 2  ;;  %s35_s28 = sadd.s32 1, %s3614_s24 }
  0x13   : > { %s42_s29 = sadd.s32 1, %s3598_s20  ;;  %p49_p1 = scmp.ne.s32.totalorder %s3598_s20, %s3594_s19 }
  0x14   : > { %s5919_s27 = smov (%p33_p0, %s32_s27), 0  ;;  %s5921_s28 = smov (!%p33_p0, %s35_s28), %s3614_s24 }
  0x15   : > { %5588 = sst [smem:[#allocation19_spill]] %s5919_s27  ;;  %p50_p2 = scmp.eq.s32.totalorder %s3618_s25, 0 }
  0x16   : > { %p55_p3 = scmp.ne.s32.totalorder %s3594_s19, %s3590_s18  ;;  %p37_p4 = scmp.ge.s32.totalorder %s5921_s28, 2 }
  0x17   : > { %p3722_p5 = scmp.eq.s32.totalorder %s5444_s26, 0  ;;  %p3728_p6 = por %p50_p2, %p49_p1 }
  0x18   : > { %s91_s6 = ssub.s32 %s3610_s23, %s5919_s27  ;;  %s5923_s28 = smov (%p37_p4, %s5921_s28), 0 }
  0x19   : > { %5591 = sst [smem:[#allocation20_spill]] %s5923_s28  ;;  %p3738_p7 = por %p3722_p5, %p55_p3 }
  0x1a   : > { %p92_p8 = scmp.eq.s32.totalorder %s91_s6, 0  ;;  %s39_s8 = ssub.s32 %s3614_s24, %s5923_s28 }
  0x1b   : > { %s94_s9 = sadd.s32 1, %s3586_s17  ;;  %p40_p9 = scmp.eq.s32.totalorder %s39_s8, 0 }
  0x1c   : > { %p101_p10 = scmp.ne.s32.totalorder %s3586_s17, %s3582_s16  ;;  %p107_p12 = scmp.ne.s32.totalorder %s3582_s16, %s3578_s15 }
  0x1d   : > { %s3748_s10 = scalar_select %p92_p8, %s3586_s17, %s94_s9  }
  0x1e   : > { %s3751_s11 = scalar_select %p40_p9, %s3598_s20, %s42_s29  }
  0x1f   : > { %5593 = sst [smem:[#allocation21_spill]] %s3748_s10  ;;  %p103_p11 = por %p101_p10, %p50_p2 }
  0x20   : > { %5594 = sst [smem:[#allocation22_spill]] %s3751_s11  ;;  %p3050_p13 = scmp.lt.s32.totalorder %s3618_s25, 4 }
  0x21   : > { %p3760_p0 = por %p107_p12, %p3722_p5  ;;  %s5445_s13 = sand.u32 1, %s3598_s20  }
  0x22   : > { %s3767_s14 = sshll.u32 %s5445_s13, 7  ;;  %s5447_s18 = sshll.u32 %s3614_s24, 11 }
  0x23   : > { %p3772_p1 = pnand %p3050_p13, %p3728_p6  ;;  %s204_s15 = sand.u32 1, %s3618_s25  }
  0x24   : > { %s5597_s1 = sld [smem:[#allocation149_spill]]  ;;  %s208_s9 = scalar_lea.vmem [#allocation8], %s3767_s14 }
  0x25   : > { %s215_s26 = sshll.u32 %s208_s9, 4  ;;  %p3783_p2 = pnand %p3050_p13, %p103_p11  ;;  %s216_s26 = int_to_ptr.vmem [resolvable:$true] %s215_s26 }
  0x26   : > { %p2662_p3 = scmp.ge.s32.totalorder %s3618_s25, 1  ;;  %s3788_s5 = scalar_lea.sflag [#allocation9], %s204_s15 }
  0x27   : > { %p3406_p4 = pneg %p3772_p1  ;;  %s3417_s28 = scalar_lea.vmem %s216_s26, 2048 }
  0x28   : > { %p3418_p5 = scmp.ne.s32.totalorder %s216_s26, %s3417_s28  ;;  %s3620_s29 = smov [#allocation8]  }
  0x29   : > { %s3422_s30 = sshll.u32 %s3620_s29, 4  ;;  %s3423_s30 = int_to_ptr.vmem [resolvable:$false] %s3422_s30 }
  0x2a   : > { %s214_s8 = scalar_lea.hbm %s5597_s1, %s5447_s18  ;;  %p3420_p6 = pnand %p3418_p5, %p3406_p4 }
  0x2b   : > { %s3424_s9 = scalar_lea.vmem %s3423_s30, 4096  ;;  %p3425_p9 = scmp.lt.s32.totalorder %s216_s26, %s3423_s30 }
  0x2c   : > { %p3421_p8 = pneg %p3420_p6  ;;  %p3426_p10 = scmp.lt.s32.totalorder %s3424_s9, %s3417_s28 }
  0x2e   : > { %p3427_p11 = por %p3426_p10, %p3425_p9 }
  0x30   : > { %p3428_p12 = pnand %p3427_p11, %p3421_p8 }
  0x32   : > { %3431 = shalt.err (!%p3428_p12)
}
  0x33   : > { %s5450_s18 = smov 128   ;;  %s5452_s15 = smov 8  }
  0x34   : > { %3043 = dma.hbm_to_vmem [thread:$0]  (!%p3772_p1), %s214_s8, 2048, %s216_s26, %s3788_s5, %s5450_s18, %s5450_s18, %s5452_s15  }
  0x35   : > { %p263_p13 = scmp.lt.s32.totalorder %s3618_s25, 5  ;;  %s5600_s29 = sshll.u32 %s3614_s24, 11 }
  0x36   : > { %s5601_s0 = sld [smem:[#allocation148_spill]]  ;;  %s187_s27 = scalar_lea.vmem [#allocation6], %s3767_s14 }
  0x37   : > { %p3804_p5 = pnand %p2662_p3, %p263_p13  ;;  %s194_s11 = sshll.u32 %s187_s27, 4  ;;  %s195_s11 = int_to_ptr.vmem [resolvable:$true] %s194_s11 }
  0x38   : > { %s5454_s10 = sand.u32 1, %s3586_s17   ;;  %s5602_s4 = sand.u32 1, %s3598_s20  }
  0x39   : > { %s3817_s21 = sshll.u32 %s5454_s10, 7  ;;  %s184_s26 = scalar_lea.sflag [#allocation7], %s5602_s4 }
  0x3a   : > { %s3445_s8 = scalar_lea.vmem %s195_s11, 2048  ;;  %s3623_s18 = smov [#allocation6]  }
  0x3b   : > { %p3446_p6 = scmp.ne.s32.totalorder %s195_s11, %s3445_s8  ;;  %s3450_s15 = sshll.u32 %s3623_s18, 4  ;;  %s3451_s15 = int_to_ptr.vmem [resolvable:$false] %s3450_s15 }
  0x3c   : > { %s193_s1 = scalar_lea.hbm %s5601_s0, %s5600_s29  ;;  %s3452_s30 = scalar_lea.vmem %s3451_s15, 4096 }
  0x3d   : > { %p3448_p3 = pnand %p3446_p6, %p3406_p4  ;;  %p3453_p9 = scmp.lt.s32.totalorder %s195_s11, %s3451_s15 }
  0x3e   : > { %p3454_p10 = scmp.lt.s32.totalorder %s3452_s30, %s3445_s8 }
  0x3f   : > { %p3449_p8 = pneg %p3448_p3 }
  0x40   : > { %p3455_p11 = por %p3454_p10, %p3453_p9 }
  0x42   : > { %p3456_p12 = pnand %p3455_p11, %p3449_p8 }
  0x44   : > { %3459 = shalt.err (!%p3456_p12)
}
  0x45   : > { %s5603_s27 = smov 8   ;;  %s5604_s14 = smov 128  }
  0x46   : > { %3040 = dma.hbm_to_vmem [thread:$0]  (!%p3772_p1), %s193_s1, 2048, %s195_s11, %s184_s26, %s5604_s14, %s5604_s14, %s5603_s27  }
  0x47   : > { %s2659_s4 = sshll.u32 %s3610_s23, 7  ;;  %s5605_s2 = sld [smem:[#allocation150_spill]] }
  0x48   : > { %s229_s15 = scalar_lea.vmem [#allocation10], %s3817_s21  ;;  %p3462_p4 = pneg %p3783_p2 }
  0x49   : > { %s235_s8 = sshll.u32 %s229_s15, 4  ;;  %s3624_s6 = smov [#allocation10]   ;;  %s236_s8 = int_to_ptr.vmem [resolvable:$true] %s235_s8 }
  0x4a   : > { %s3473_s30 = scalar_lea.vmem %s236_s8, 2048  ;;  %s3478_s10 = sshll.u32 %s3624_s6, 4  ;;  %s3479_s10 = int_to_ptr.vmem [resolvable:$false] %s3478_s10 }
  0x4b   : > { %p3474_p13 = scmp.ne.s32.totalorder %s236_s8, %s3473_s30  ;;  %s3480_s1 = scalar_lea.vmem %s3479_s10, 4096 }
  0x4c   : > { %p3481_p1 = scmp.lt.s32.totalorder %s236_s8, %s3479_s10  ;;  %p3482_p8 = scmp.lt.s32.totalorder %s3480_s1, %s3473_s30 }
  0x4d   : > { %s234_s9 = scalar_lea.hbm %s5605_s2, %s2659_s4  ;;  %p3476_p6 = pnand %p3474_p13, %p3462_p4 }
  0x4e   : > { %p3483_p9 = por %p3482_p8, %p3481_p1 }
  0x4f   : > { %p3477_p3 = pneg %p3476_p6 }
  0x51   : > { %p3484_p10 = pnand %p3483_p9, %p3477_p3 }
  0x53   : > { %3487 = shalt.err (!%p3484_p10)
}
  0x54   : > { %s3625_s11 = smov 256   ;;  %s254_s18 = scalar_lea.hbm %s5442_s3, %s2659_s4 }
  0x55   : > { %3046 = dma.hbm_to_vmem [thread:$0]  (!%p3783_p2), %s234_s9, 2048, %s236_s8, %s3788_s5, %s3625_s11, %s5604_s14, %s5603_s27  }
  0x56   : > { %s249_s15 = scalar_lea.vmem [#allocation11], %s3817_s21  ;;  %s5606_s30 = sand.u32 1, %s3586_s17  }
  0x57   : > { %s255_s10 = sshll.u32 %s249_s15, 4  ;;  %s246_s6 = scalar_lea.sflag [#allocation12], %s5606_s30  ;;  %s256_s10 = int_to_ptr.vmem [resolvable:$true] %s255_s10 }
  0x58   : > { %s3501_s1 = scalar_lea.vmem %s256_s10, 2048  ;;  %s3626_s0 = smov [#allocation11]  }
  0x59   : > { %p3502_p11 = scmp.ne.s32.totalorder %s256_s10, %s3501_s1  ;;  %s3506_s2 = sshll.u32 %s3626_s0, 4  ;;  %s3507_s2 = int_to_ptr.vmem [resolvable:$false] %s3506_s2 }
  0x5a   : > { %s3508_s24 = scalar_lea.vmem %s3507_s2, 4096  ;;  %p3509_p6 = scmp.lt.s32.totalorder %s256_s10, %s3507_s2 }
  0x5b   : > { %p3504_p12 = pnand %p3502_p11, %p3462_p4  ;;  %p3510_p3 = scmp.lt.s32.totalorder %s3508_s24, %s3501_s1 }
  0x5d   : > { %p3505_p13 = pneg %p3504_p12  ;;  %p3511_p1 = por %p3510_p3, %p3509_p6 }
  0x5f   : > { %p3512_p8 = pnand %p3511_p1, %p3505_p13 }
  0x61   : > { %3515 = shalt.err (!%p3512_p8)
}
  0x62   : > { %3049 = dma.hbm_to_vmem [thread:$0]  (!%p3783_p2), %s254_s18, 2048, %s256_s10, %s246_s6, %s3625_s11, %s5604_s14, %s5603_s27  }
  0x63   : > { %267 = sbr.rel (%p3804_p5) target bundleno = 1146 (0x47a), region = 36 }
  0x68   : > { %s269_s21 = sand.u32 1, %s3594_s19  }
  0x69   : > { %s2663_s5 = sshll.u32 %s269_s21, 7  ;;  %s270_s0 = scalar_lea.sflag [#allocation7], %s269_s21 }
  0x6a   : > { %s3860_s4 = scalar_lea.vmem [#allocation6], %s2663_s5 }
  0x6b   : > { %3561 = dma.done.wait (%p3738_p7), %s270_s0, 2048  }
  0x6c   : > { %3563 = vsyncadd (%p3738_p7), %s270_s0, 4294965248  ;;  %s5607_s2 = sadd.s32 4294967295, %s3618_s25   ;;  %s3868_s27 = scalar_lea.vmem [#allocation8], %s2663_s5 }
  0x6d   : > { %s278_s24 = sand.u32 1, %s5607_s2  }
  0x6e   : > { %s279_s13 = scalar_lea.sflag [#allocation9], %s278_s24 }
  0x6f   : > { %3565 = dma.done.wait (%p3738_p7), %s279_s13, 2048  }
  0x70   : > { %3567 = vsyncadd (%p3738_p7), %s279_s13, 4294965248  ;;  %s289_s28 = sand.u32 1, %s3582_s16  }
  0x71   : > { %s2665_s14 = sshll.u32 %s289_s28, 7 }
  0x72   : > { %s3875_s9 = scalar_lea.vmem [#allocation10], %s2665_s14 }
  0x73   : > { %3569 = dma.done.wait (%p3760_p0), %s279_s13, 2048  }
  0x74   : > { %3571 = vsyncadd (%p3760_p0), %s279_s13, 4294965248  ;;  %s297_s8 = scalar_lea.sflag [#allocation12], %s289_s28  ;;  %s3881_s11 = scalar_lea.vmem [#allocation11], %s2665_s14 }
  0x75   : > { %3573 = dma.done.wait (%p3760_p0), %s297_s8, 2048  }
  0x76   : > { %3575 = vsyncadd (%p3760_p0), %s297_s8, 4294965248  ;;  %s2667_s7 = sshll.u32 %s3606_s22, 4  ;;  %s5608_s15 = sld [smem:[#allocation151_spill]]  ;;  %v3894_v0 = vld [vmem:[%s3875_s9 + $0x78] sm:$0xff]  ;;  %v3900_v2 = vld [vmem:[%s3875_s9 + $0x70] sm:$0xff] }
  0x77   : > { %p343_p7 = scmp.lt.s32.totalorder %s2667_s7, 31  ;;  %v3897_v1 = vld [vmem:[%s3881_s11 + $0x78] sm:$0xff]  ;;  %2805 = vmatprep.subr.mxu0 %v3894_v0  ;;  %v3905_v3 = vld [vmem:[%s3881_s11 + $0x70] sm:$0xff]  ;;  %v3910_v4 = vld [vmem:[%s3875_s9 + $0x68] sm:$0xff]  ;;  %s5641_s12 = sld [smem:[#allocation17_spill]] }
  0x78   : > { %2861 = vmatprep.subr.mxu1 %v3897_v1  ;;  %2806 = vmatpush3.msra.mxu0 %v3894_v0  ;;  %v3913_v5 = vld [vmem:[%s3881_s11 + $0x68] sm:$0xff]  ;;  %v3920_v6 = vld [vmem:[%s3875_s9 + $0x60] sm:$0xff]  ;;  %v3930_v8 = vld [vmem:[%s3875_s9 + $0x58] sm:$0xff] }
  0x79   : > { %s5925_s7 = smov (!%p343_p7, %s2667_s7), 31  ;;  %2862 = vmatpush3.msra.mxu1 %v3897_v1  ;;  %2807 = vmatprep.subr.mxu0 %v3900_v2  ;;  %v3923_v7 = vld [vmem:[%s3881_s11 + $0x60] sm:$0xff]  ;;  %v3933_v9 = vld [vmem:[%s3881_s11 + $0x58] sm:$0xff]  ;;  %v3940_v10 = vld [vmem:[%s3875_s9 + $0x50] sm:$0xff] }
  0x7a   : > { %s2668_s26 = sshll.u32 %s5925_s7, 3  ;;  %2863 = vmatprep.subr.mxu1 %v3905_v3  ;;  %2808 = vmatpush3.msra.mxu0 %v3900_v2  ;;  %v3943_v11 = vld [vmem:[%s3881_s11 + $0x50] sm:$0xff]  ;;  %v3950_v12 = vld [vmem:[%s3875_s9 + $0x48] sm:$0xff]  ;;  %v3960_v14 = vld [vmem:[%s3875_s9 + $0x40] sm:$0xff] }
  0x7b   : > { %2864 = vmatpush3.msra.mxu1 %v3905_v3  ;;  %2809 = vmatprep.subr.mxu0 %v3910_v4  ;;  %v3953_v13 = vld [vmem:[%s3881_s11 + $0x48] sm:$0xff]  ;;  %v3963_v15 = vld [vmem:[%s3881_s11 + $0x40] sm:$0xff]  ;;  %v3970_v16 = vld [vmem:[%s3875_s9 + $0x38] sm:$0xff] }
  0x7c   : > { %s3891_s10 = scalar_lea.vmem %s5608_s15, %s2668_s26  ;;  %2865 = vmatprep.subr.mxu1 %v3913_v5  ;;  %2810 = vmatpush3.msra.mxu0 %v3910_v4  ;;  %v3973_v17 = vld [vmem:[%s3881_s11 + $0x38] sm:$0xff]  ;;  %v3980_v18 = vld [vmem:[%s3875_s9 + $0x30] sm:$0xff]  ;;  %v3990_v20 = vld [vmem:[%s3875_s9 + $0x28] sm:$0xff] }
  0x7d   : > { %2866 = vmatpush3.msra.mxu1 %v3913_v5  ;;  %2811 = vmatprep.subr.mxu0 %v3920_v6  ;;  %v3983_v19 = vld [vmem:[%s3881_s11 + $0x30] sm:$0xff]  ;;  %v3993_v21 = vld [vmem:[%s3881_s11 + $0x28] sm:$0xff]  ;;  %v4000_v22 = vld [vmem:[%s3875_s9 + $0x20] sm:$0xff]  ;;  %s2669_s30 = sshll.u32 %s5641_s12, 7  ;;  %p1075_p0 = scmp.eq.s32.totalorder %s3606_s22, %s5641_s12 }
  0x7e   : > { %2867 = vmatprep.subr.mxu1 %v3923_v7  ;;  %2812 = vmatpush3.msra.mxu0 %v3920_v6  ;;  %v4003_v23 = vld [vmem:[%s3881_s11 + $0x20] sm:$0xff]  ;;  %v4010_v24 = vld [vmem:[%s3875_s9 + $0x18] sm:$0xff]  ;;  %v4020_v26 = vld [vmem:[%s3875_s9 + $0x10] sm:$0xff]  ;;  %p2670_p2 = scmp.ne.s32.totalorder %s5641_s12, 0 }
  0x7f   : > { %2868 = vmatpush3.msra.mxu1 %v3923_v7  ;;  %2813 = vmatprep.subr.mxu0 %v3930_v8  ;;  %v4013_v25 = vld [vmem:[%s3881_s11 + $0x18] sm:$0xff]  ;;  %v4023_v27 = vld [vmem:[%s3881_s11 + $0x10] sm:$0xff]  ;;  %v4030_v28 = vld [vmem:[%s3875_s9 + $0x8] sm:$0xff]  ;;  %s1076_s6 = scalar_select %p1075_p0, -1e+09, 0.0 }
  0x80   : > { %2869 = vmatprep.subr.mxu1 %v3933_v9  ;;  %2814 = vmatpush3.msra.mxu0 %v3930_v8  ;;  %v4033_v29 = vld [vmem:[%s3881_s11 + $0x8] sm:$0xff]  ;;  %v4040_v30 = vld [vmem:[%s3875_s9] sm:$0xff]  ;;  %v4072_v36 = vld [vmem:[%s3860_s4 + $0x10] sm:$0xff] }
  0x81   : > { %2870 = vmatpush3.msra.mxu1 %v3933_v9  ;;  %2815 = vmatprep.subr.mxu0 %v3940_v10  ;;  %v4043_v31 = vld [vmem:[%s3881_s11] sm:$0xff]  ;;  %v4058_v34 = vld [vmem:[%s3860_s4 + $0x8] sm:$0xff]  ;;  %5613 = vst [vmem:[#allocation27_spill] sm:$0xff] %v4072_v36  ;;  %v4075_v37 = vld [vmem:[%s3868_s27 + $0x10] sm:$0xff] }
  0x82   : > { %2871 = vmatprep.subr.mxu1 %v3943_v11  ;;  %2816 = vmatpush3.msra.mxu0 %v3940_v10  ;;  %v4048_v32 = vld [vmem:[%s3860_s4] sm:$0xff]  ;;  %5611 = vst [vmem:[#allocation25_spill] sm:$0xff] %v4058_v34  ;;  %v4061_v35 = vld [vmem:[%s3868_s27 + $0x8] sm:$0xff]  ;;  %5614 = vst [vmem:[#allocation28_spill] sm:$0xff] %v4075_v37 }
  0x83   : > { %2872 = vmatpush3.msra.mxu1 %v3943_v11  ;;  %2817 = vmatprep.subr.mxu0 %v3950_v12  ;;  %5609 = vst [vmem:[#allocation23_spill] sm:$0xff] %v4048_v32  ;;  %v4053_v33 = vld [vmem:[%s3868_s27] sm:$0xff]  ;;  %5612 = vst [vmem:[#allocation26_spill] sm:$0xff] %v4061_v35  ;;  %v4082_v38 = vld [vmem:[%s3860_s4 + $0x18] sm:$0xff] }
  0x84   : > { %2873 = vmatprep.subr.mxu1 %v3953_v13  ;;  %2818 = vmatpush3.msra.mxu0 %v3950_v12  ;;  %5610 = vst [vmem:[#allocation24_spill] sm:$0xff] %v4053_v33  ;;  %5615 = vst [vmem:[#allocation29_spill] sm:$0xff] %v4082_v38  ;;  %v4085_v39 = vld [vmem:[%s3868_s27 + $0x18] sm:$0xff]  ;;  %v4096_v40 = vld [vmem:[%s3860_s4 + $0x20] sm:$0xff] }
  0x85   : > { %2874 = vmatpush3.msra.mxu1 %v3953_v13  ;;  %2819 = vmatprep.subr.mxu0 %v3960_v14  ;;  %5616 = vst [vmem:[#allocation30_spill] sm:$0xff] %v4085_v39  ;;  %5617 = vst [vmem:[#allocation31_spill] sm:$0xff] %v4096_v40  ;;  %v4099_v41 = vld [vmem:[%s3868_s27 + $0x20] sm:$0xff]  ;;  %v4106_v42 = vld [vmem:[%s3860_s4 + $0x28] sm:$0xff] }
  0x86   : > { %2875 = vmatprep.subr.mxu1 %v3963_v15  ;;  %2820 = vmatpush3.msra.mxu0 %v3960_v14  ;;  %5618 = vst [vmem:[#allocation32_spill] sm:$0xff] %v4099_v41  ;;  %5619 = vst [vmem:[#allocation33_spill] sm:$0xff] %v4106_v42  ;;  %v4109_v43 = vld [vmem:[%s3868_s27 + $0x28] sm:$0xff]  ;;  %v4120_v44 = vld [vmem:[%s3860_s4 + $0x30] sm:$0xff] }
  0x87   : > { %2876 = vmatpush3.msra.mxu1 %v3963_v15  ;;  %2821 = vmatprep.subr.mxu0 %v3970_v16  ;;  %5620 = vst [vmem:[#allocation34_spill] sm:$0xff] %v4109_v43  ;;  %5621 = vst [vmem:[#allocation35_spill] sm:$0xff] %v4120_v44  ;;  %v4123_v45 = vld [vmem:[%s3868_s27 + $0x30] sm:$0xff]  ;;  %v4130_v46 = vld [vmem:[%s3860_s4 + $0x38] sm:$0xff] }
  0x88   : > { %2877 = vmatprep.subr.mxu1 %v3973_v17  ;;  %2822 = vmatpush3.msra.mxu0 %v3970_v16  ;;  %5622 = vst [vmem:[#allocation36_spill] sm:$0xff] %v4123_v45  ;;  %5623 = vst [vmem:[#allocation37_spill] sm:$0xff] %v4130_v46  ;;  %v4133_v47 = vld [vmem:[%s3868_s27 + $0x38] sm:$0xff]  ;;  %v4144_v48 = vld [vmem:[%s3860_s4 + $0x40] sm:$0xff] }
  0x89   : > { %2878 = vmatpush3.msra.mxu1 %v3973_v17  ;;  %2823 = vmatprep.subr.mxu0 %v3980_v18  ;;  %5624 = vst [vmem:[#allocation38_spill] sm:$0xff] %v4133_v47  ;;  %5625 = vst [vmem:[#allocation39_spill] sm:$0xff] %v4144_v48  ;;  %v4147_v49 = vld [vmem:[%s3868_s27 + $0x40] sm:$0xff]  ;;  %v4154_v50 = vld [vmem:[%s3860_s4 + $0x48] sm:$0xff] }
  0x8a   : > { %2879 = vmatprep.subr.mxu1 %v3983_v19  ;;  %2824 = vmatpush3.msra.mxu0 %v3980_v18  ;;  %5626 = vst [vmem:[#allocation40_spill] sm:$0xff] %v4147_v49  ;;  %5627 = vst [vmem:[#allocation41_spill] sm:$0xff] %v4154_v50  ;;  %v4157_v51 = vld [vmem:[%s3868_s27 + $0x48] sm:$0xff]  ;;  %v4168_v52 = vld [vmem:[%s3860_s4 + $0x50] sm:$0xff] }
  0x8b   : > { %2880 = vmatpush3.msra.mxu1 %v3983_v19  ;;  %2825 = vmatprep.subr.mxu0 %v3990_v20  ;;  %5628 = vst [vmem:[#allocation42_spill] sm:$0xff] %v4157_v51  ;;  %5629 = vst [vmem:[#allocation43_spill] sm:$0xff] %v4168_v52  ;;  %v4171_v53 = vld [vmem:[%s3868_s27 + $0x50] sm:$0xff]  ;;  %v4178_v54 = vld [vmem:[%s3860_s4 + $0x58] sm:$0xff] }
  0x8c   : > { %2881 = vmatprep.subr.mxu1 %v3993_v21  ;;  %2826 = vmatpush3.msra.mxu0 %v3990_v20  ;;  %5630 = vst [vmem:[#allocation44_spill] sm:$0xff] %v4171_v53  ;;  %5631 = vst [vmem:[#allocation45_spill] sm:$0xff] %v4178_v54  ;;  %v4181_v55 = vld [vmem:[%s3868_s27 + $0x58] sm:$0xff]  ;;  %v4192_v56 = vld [vmem:[%s3860_s4 + $0x60] sm:$0xff] }
  0x8d   : > { %2882 = vmatpush3.msra.mxu1 %v3993_v21  ;;  %2827 = vmatprep.subr.mxu0 %v4000_v22  ;;  %5632 = vst [vmem:[#allocation46_spill] sm:$0xff] %v4181_v55  ;;  %5633 = vst [vmem:[#allocation47_spill] sm:$0xff] %v4192_v56  ;;  %v4195_v57 = vld [vmem:[%s3868_s27 + $0x60] sm:$0xff]  ;;  %v4202_v58 = vld [vmem:[%s3860_s4 + $0x68] sm:$0xff] }
  0x8e   : > { %2883 = vmatprep.subr.mxu1 %v4003_v23  ;;  %2828 = vmatpush3.msra.mxu0 %v4000_v22  ;;  %5634 = vst [vmem:[#allocation48_spill] sm:$0xff] %v4195_v57  ;;  %5635 = vst [vmem:[#allocation49_spill] sm:$0xff] %v4202_v58  ;;  %v4205_v59 = vld [vmem:[%s3868_s27 + $0x68] sm:$0xff]  ;;  %v4216_v60 = vld [vmem:[%s3860_s4 + $0x70] sm:$0xff] }
  0x8f   : > { %2884 = vmatpush3.msra.mxu1 %v4003_v23  ;;  %2829 = vmatprep.subr.mxu0 %v4010_v24  ;;  %5636 = vst [vmem:[#allocation50_spill] sm:$0xff] %v4205_v59  ;;  %5637 = vst [vmem:[#allocation51_spill] sm:$0xff] %v4216_v60  ;;  %v4219_v61 = vld [vmem:[%s3868_s27 + $0x70] sm:$0xff]  ;;  %v4226_v62 = vld [vmem:[%s3860_s4 + $0x78] sm:$0xff] }
  0x90   : > { %2885 = vmatprep.subr.mxu1 %v4013_v25  ;;  %2830 = vmatpush3.msra.mxu0 %v4010_v24  ;;  %5638 = vst [vmem:[#allocation52_spill] sm:$0xff] %v4219_v61  ;;  %5639 = vst [vmem:[#allocation53_spill] sm:$0xff] %v4226_v62  ;;  %v4229_v63 = vld [vmem:[%s3868_s27 + $0x78] sm:$0xff] }
  0x91   : > { %2886 = vmatpush3.msra.mxu1 %v4013_v25  ;;  %2831 = vmatprep.subr.mxu0 %v4020_v26  ;;  %5640 = vst [vmem:[#allocation54_spill] sm:$0xff] %v4229_v63 }
  0x92   : > { %2887 = vmatprep.subr.mxu1 %v4023_v27  ;;  %2832 = vmatpush3.msra.mxu0 %v4020_v26 }
  0x93   : > { %2888 = vmatpush3.msra.mxu1 %v4023_v27  ;;  %2833 = vmatprep.subr.mxu0 %v4030_v28 }
  0x94   : > { %2889 = vmatprep.subr.mxu1 %v4033_v29  ;;  %2834 = vmatpush3.msra.mxu0 %v4030_v28 }
  0x95   : > { %2890 = vmatpush3.msra.mxu1 %v4033_v29  ;;  %2835 = vmatprep.subr.mxu0 %v4040_v30 }
  0x96   : > { %2891 = vmatprep.subr.mxu1 %v4043_v31  ;;  %2836 = vmatpush3.msra.mxu0 %v4040_v30 }
  0x97   : > { %2837 = vmatprep.mubr.f32.mxu0 %v4048_v32  ;;  %2892 = vmatpush3.msra.mxu1 %v4043_v31 }
  0x98   : > { %2893 = vmatprep.mubr.f32.mxu1 %v4053_v33  ;;  %2838 = vmatmul.mubr.f32.vlgmr.msra.gmra.mxu0 %v4058_v34 }
  0x99   : > { %2894 = vmatmul.mubr.f32.vlgmr.msra.gmra.mxu1 %v4061_v35  ;;  %2917 = vmatprep.subr.mxu0 %v3897_v1 }
  0x9a   : > { %2973 = vmatprep.subr.mxu1 %v3894_v0  ;;  %2918 = vmatpush3.msra.mxu0 %v3897_v1 }
  0x9b   : > { %2974 = vmatpush3.msra.mxu1 %v3894_v0  ;;  %2919 = vmatprep.subr.mxu0 %v3905_v3  ;;  %v1056_v0 = vlaneseq }
  0x9c   : > { %2975 = vmatprep.subr.mxu1 %v3900_v2  ;;  %2840 = vmatprep.mubr.f32.mxu0 %v4072_v36 }
  0x9d   : > { %2896 = vmatprep.mubr.f32.mxu1 %v4075_v37  ;;  %2920 = vmatpush3.msra.mxu0 %v3905_v3  ;;  %v4278_v1 = vand.u32 127, %v1056_v0  ;;  %v4280_v3 = vshrl.u32 %v1056_v0, 7 }
  0x9e   : > { %2976 = vmatpush3.msra.mxu1 %v3900_v2  ;;  %2841 = vmatmul.mubr.f32.gmra.mxu0 %v4082_v38  ;;  %v1111_v2 = vstv %s2669_s30 }
  0x9f   : > { %2897 = vmatmul.mubr.f32.gmra.mxu1 %v4085_v39  ;;  %2921 = vmatprep.subr.mxu0 %v3913_v5  ;;  %5642 = vst [vmem:[#allocation55_spill] sm:$0xff] %v4280_v3  ;;  %vm1077_vm2 = vcmp.eq.s32.totalorder %v4280_v3, %v4278_v1 }
  0xa0   : > { %2977 = vmatprep.subr.mxu1 %v3910_v4  ;;  %2922 = vmatpush3.msra.mxu0 %v3913_v5  ;;  %v4286_v5 = vadd.s32 8, %v4280_v3 }
  0xa1   : > { %2978 = vmatpush3.msra.mxu1 %v3910_v4  ;;  %2923 = vmatprep.subr.mxu0 %v3923_v7  ;;  %v1112_v4 = vadd.s32 %v1111_v2, %v4278_v1 }
  0xa2   : > { %2979 = vmatprep.subr.mxu1 %v3920_v6  ;;  %2843 = vmatprep.mubr.f32.mxu0 %v4096_v40  ;;  %5643 = vst [vmem:[#allocation56_spill] sm:$0xff] %v4286_v5  ;;  %vm1078_vm1 = vcmp.eq.s32.totalorder %v4286_v5, %v4278_v1 }
  0xa3   : > { %2899 = vmatprep.mubr.f32.mxu1 %v4099_v41  ;;  %2924 = vmatpush3.msra.mxu0 %v3923_v7  ;;  %vm1113_vm0 = vcmp.ge.s32.totalorder %v1112_v4, 200 }
  0xa4   : > { %2980 = vmatpush3.msra.mxu1 %v3920_v6  ;;  %2844 = vmatmul.mubr.f32.gmra.mxu0 %v4106_v42  ;;  %v4290_v6 = vstv %s1076_s6 }
  0xa5   : > { %2900 = vmatmul.mubr.f32.gmra.mxu1 %v4109_v43  ;;  %2925 = vmatprep.subr.mxu0 %v3933_v9 }
  0xa6   : > { %2981 = vmatprep.subr.mxu1 %v3930_v8  ;;  %2926 = vmatpush3.msra.mxu0 %v3933_v9 }
  0xa7   : > { %2982 = vmatpush3.msra.mxu1 %v3930_v8  ;;  %2927 = vmatprep.subr.mxu0 %v3943_v11  ;;  %v3627_v8 = vmov 0.0  }
  0xa8   : > { %2983 = vmatprep.subr.mxu1 %v3940_v10  ;;  %2846 = vmatprep.mubr.f32.mxu0 %v4120_v44  ;;  %v4292_v9 = vsel %vm1113_vm0, -1e+09, %v3627_v8 }
  0xa9   : > { %2902 = vmatprep.mubr.f32.mxu1 %v4123_v45  ;;  %2928 = vmatpush3.msra.mxu0 %v3943_v11  ;;  %v4295_v11 = vadd.s32 24, %v4280_v3 }
  0xaa   : > { %2984 = vmatpush3.msra.mxu1 %v3940_v10  ;;  %2847 = vmatmul.mubr.f32.gmra.mxu0 %v4130_v46 }
  0xab   : > { %2903 = vmatmul.mubr.f32.gmra.mxu1 %v4133_v47  ;;  %2929 = vmatprep.subr.mxu0 %v3953_v13  ;;  %5644 = vst [vmem:[#allocation57_spill] sm:$0xff] %v4295_v11  ;;  %vm1080_vm3 = vcmp.eq.s32.totalorder %v4295_v11, %v4278_v1 }
  0xac   : > { %2985 = vmatprep.subr.mxu1 %v3950_v12  ;;  %2930 = vmatpush3.msra.mxu0 %v3953_v13  ;;  %v1097_v4 = vsel %vm1080_vm3, %v4290_v6, 0.0 }
  0xad   : > { %2986 = vmatpush3.msra.mxu1 %v3950_v12  ;;  %2931 = vmatprep.subr.mxu0 %v3963_v15 }
  0xae   : > { %2987 = vmatprep.subr.mxu1 %v3960_v14  ;;  %2849 = vmatprep.mubr.f32.mxu0 %v4144_v48 }
  0xaf   : > { %2905 = vmatprep.mubr.f32.mxu1 %v4147_v49  ;;  %2932 = vmatpush3.msra.mxu0 %v3963_v15 }
  0xb0   : > { %2988 = vmatpush3.msra.mxu1 %v3960_v14  ;;  %2850 = vmatmul.mubr.f32.gmra.mxu0 %v4154_v50  ;;  %v1095_v14 = vsel %vm1078_vm1, %v4290_v6, 0.0 }
  0xb1   : > { %2906 = vmatmul.mubr.f32.gmra.mxu1 %v4157_v51  ;;  %2933 = vmatprep.subr.mxu0 %v3973_v17 }
  0xb2   : > { %2989 = vmatprep.subr.mxu1 %v3970_v16  ;;  %2934 = vmatpush3.msra.mxu0 %v3973_v17  ;;  %v4301_v17 = vadd.s32 16, %v4280_v3 }
  0xb3   : > { %2990 = vmatpush3.msra.mxu1 %v3970_v16  ;;  %2935 = vmatprep.subr.mxu0 %v3983_v19 }
  0xb4   : > { %2991 = vmatprep.subr.mxu1 %v3980_v18  ;;  %2852 = vmatprep.mubr.f32.mxu0 %v4168_v52  ;;  %5645 = vst [vmem:[#allocation58_spill] sm:$0xff] %v4301_v17  ;;  %vm1079_vm4 = vcmp.eq.s32.totalorder %v4301_v17, %v4278_v1 }
  0xb5   : > { %2908 = vmatprep.mubr.f32.mxu1 %v4171_v53  ;;  %2936 = vmatpush3.msra.mxu0 %v3983_v19 }
  0xb6   : > { %2992 = vmatpush3.msra.mxu1 %v3980_v18  ;;  %2853 = vmatmul.mubr.f32.gmra.mxu0 %v4178_v54 }
  0xb7   : > { %2909 = vmatmul.mubr.f32.gmra.mxu1 %v4181_v55  ;;  %2937 = vmatprep.subr.mxu0 %v3993_v21 }
  0xb8   : > { %2993 = vmatprep.subr.mxu1 %v3990_v20  ;;  %2938 = vmatpush3.msra.mxu0 %v3993_v21 }
  0xb9   : > { %2994 = vmatpush3.msra.mxu1 %v3990_v20  ;;  %2939 = vmatprep.subr.mxu0 %v4003_v23 }
  0xba   : > { %2995 = vmatprep.subr.mxu1 %v4000_v22  ;;  %2855 = vmatprep.mubr.f32.mxu0 %v4192_v56 }
  0xbb   : > { %2911 = vmatprep.mubr.f32.mxu1 %v4195_v57  ;;  %2940 = vmatpush3.msra.mxu0 %v4003_v23 }
  0xbc   : > { %2996 = vmatpush3.msra.mxu1 %v4000_v22  ;;  %2856 = vmatmul.mubr.f32.gmra.mxu0 %v4202_v58  ;;  %v1094_v22 = vsel %vm1077_vm2, %v4290_v6, 0.0 }
  0xbd   : > { %2912 = vmatmul.mubr.f32.gmra.mxu1 %v4205_v59  ;;  %2941 = vmatprep.subr.mxu0 %v4013_v25 }
  0xbe   : > { %2997 = vmatprep.subr.mxu1 %v4010_v24  ;;  %2942 = vmatpush3.msra.mxu0 %v4013_v25 }
  0xbf   : > { %2998 = vmatpush3.msra.mxu1 %v4010_v24  ;;  %2943 = vmatprep.subr.mxu0 %v4023_v27 }
  0xc0   : > { %2999 = vmatprep.subr.mxu1 %v4020_v26  ;;  %2858 = vmatprep.mubr.f32.mxu0 %v4216_v60 }
  0xc1   : > { %2914 = vmatprep.mubr.f32.mxu1 %v4219_v61  ;;  %2944 = vmatpush3.msra.mxu0 %v4023_v27 }
  0xc2   : > { %3000 = vmatpush3.msra.mxu1 %v4020_v26  ;;  %2859 = vmatmul.mubr.f32.gmra.mxu0 %v4226_v62 }
  0xc3   : > { %2915 = vmatmul.mubr.f32.gmra.mxu1 %v4229_v63  ;;  %2945 = vmatprep.subr.mxu0 %v4033_v29 }
  0xc4   : > { %3001 = vmatprep.subr.mxu1 %v4030_v28  ;;  %2946 = vmatpush3.msra.mxu0 %v4033_v29  ;;  %v4317_v29 = vadd.s32 40, %v4280_v3 }
  0xc5   : > { %3002 = vmatpush3.msra.mxu1 %v4030_v28  ;;  %2947 = vmatprep.subr.mxu0 %v4043_v31 }
  0xc6   : > { %3003 = vmatprep.subr.mxu1 %v4040_v30  ;;  %2948 = vmatpush3.msra.mxu0 %v4043_v31  ;;  %5646 = vst [vmem:[#allocation59_spill] sm:$0xff] %v4317_v29  ;;  %vm1082_vm5 = vcmp.eq.s32.totalorder %v4317_v29, %v4278_v1 }
  0xc7   : > { %2949 = vmatprep.mubr.f32.mxu0 %v4048_v32  ;;  %3004 = vmatpush3.msra.mxu1 %v4040_v30 }
  0xc8   : > { %3005 = vmatprep.mubr.f32.mxu1 %v4053_v33  ;;  %2950 = vmatmul.mubr.f32.vlgmr.msra.gmra.mxu0 %v4058_v34 }
  0xc9   : > { %3006 = vmatmul.mubr.f32.vlgmr.msra.gmra.mxu1 %v4061_v35  ;;  %2952 = vmatprep.mubr.f32.mxu0 %v4072_v36 }
  0xca   : > { %3008 = vmatprep.mubr.f32.mxu1 %v4075_v37 }
  0xcc   : > { %2953 = vmatmul.mubr.f32.gmra.mxu0 %v4082_v38 }
  0xcd   : > { %3009 = vmatmul.mubr.f32.gmra.mxu1 %v4085_v39  ;;  %2955 = vmatprep.mubr.f32.mxu0 %v4096_v40 }
  0xce   : > { %3011 = vmatprep.mubr.f32.mxu1 %v4099_v41 }
  0xd0   : > { %2956 = vmatmul.mubr.f32.gmra.mxu0 %v4106_v42 }
  0xd1   : > { %3012 = vmatmul.mubr.f32.gmra.mxu1 %v4109_v43  ;;  %2958 = vmatprep.mubr.f32.mxu0 %v4120_v44 }
  0xd2   : > { %3014 = vmatprep.mubr.f32.mxu1 %v4123_v45 }
  0xd4   : > { %2959 = vmatmul.mubr.f32.gmra.mxu0 %v4130_v46 }
  0xd5   : > { %3015 = vmatmul.mubr.f32.gmra.mxu1 %v4133_v47  ;;  %2961 = vmatprep.mubr.f32.mxu0 %v4144_v48 }
  0xd6   : > { %3017 = vmatprep.mubr.f32.mxu1 %v4147_v49 }
  0xd8   : > { %2962 = vmatmul.mubr.f32.gmra.mxu0 %v4154_v50 }
  0xd9   : > { %3018 = vmatmul.mubr.f32.gmra.mxu1 %v4157_v51  ;;  %2964 = vmatprep.mubr.f32.mxu0 %v4168_v52 }
  0xda   : > { %3020 = vmatprep.mubr.f32.mxu1 %v4171_v53 }
  0xdc   : > { %2965 = vmatmul.mubr.f32.gmra.mxu0 %v4178_v54 }
  0xdd   : > { %3021 = vmatmul.mubr.f32.gmra.mxu1 %v4181_v55  ;;  %2967 = vmatprep.mubr.f32.mxu0 %v4192_v56 }
  0xde   : > { %3023 = vmatprep.mubr.f32.mxu1 %v4195_v57 }
  0xe0   : > { %2968 = vmatmul.mubr.f32.gmra.mxu0 %v4202_v58 }
  0xe1   : > { %3024 = vmatmul.mubr.f32.gmra.mxu1 %v4205_v59  ;;  %2970 = vmatprep.mubr.f32.mxu0 %v4216_v60 }
  0xe2   : > { %3026 = vmatprep.mubr.f32.mxu1 %v4219_v61 }
  0xe4   : > { %2971 = vmatmul.mubr.f32.gmra.mxu0 %v4226_v62 }
  0xe5   : > { %3027 = vmatmul.mubr.f32.gmra.mxu1 %v4229_v63 }
 0x158   : > { %v2839_v7 = vpop.f32.mrf.mxu0 }
 0x159   : > { %v2895_v10 = vpop.f32.mrf.mxu1  ;;  %v558_v12 = vmul.f32 20.0, %v2839_v7 }
 0x15a   : > { %v719_v13 = vmul.f32 20.0, %v2895_v10  ;;  %v478_v15 = vpop.f32.mrf.mxu0  ;;  %v4325_v10 = vadd.s32 32, %v4280_v3 }
 0x15b   : > { %v639_v16 = vpop.f32.mrf.mxu1  ;;  %v1116_v18 = vadd.f32 %v4292_v9, %v558_v12  ;;  %v557_v20 = vmul.f32 20.0, %v478_v15 }
 0x15c   : > { %v1132_v19 = vadd.f32 %v4292_v9, %v719_v13  ;;  %v718_v21 = vmul.f32 20.0, %v639_v16  ;;  %5647 = vst [vmem:[#allocation60_spill] sm:$0xff] %v4325_v10  ;;  %v1096_v16 = vsel %vm1079_vm4, %v4290_v6, 0.0  ;;  %vm1081_vm6 = vcmp.eq.s32.totalorder %v4325_v10, %v4278_v1 }
 0x15d   : > { %v4308_v23 = vadd.f32 %v1116_v18, %v1095_v14  ;;  %v1115_v25 = vadd.f32 %v4292_v9, %v557_v20 }
 0x15e   : > { %v4310_v24 = vadd.f32 %v1132_v19, %v1095_v14  ;;  %v1131_v26 = vadd.f32 %v4292_v9, %v718_v21  ;;  %v2842_v27 = vpop.f32.mrf.mxu0 }
 0x15f   : > { %v2898_v28 = vpop.f32.mrf.mxu1  ;;  %v4319_v30 = vadd.f32 %v1115_v25, %v1094_v22  ;;  %v560_v0 = vmul.f32 20.0, %v2842_v27 }
 0x160   : > { %v4321_v31 = vadd.f32 %v1131_v26, %v1094_v22  ;;  %v721_v2 = vmul.f32 20.0, %v2898_v28  ;;  %v488_v7 = vpop.f32.mrf.mxu0  ;;  %v4341_v26 = vadd.s32 56, %v4280_v3 }
 0x161   : > { %v649_v8 = vpop.f32.mrf.mxu1  ;;  %v1118_v12 = vadd.f32 %v4292_v9, %v560_v0  ;;  %v559_v14 = vmul.f32 20.0, %v488_v7 }
 0x162   : > { %v1134_v13 = vadd.f32 %v4292_v9, %v721_v2  ;;  %v720_v15 = vmul.f32 20.0, %v649_v8  ;;  %5648 = vst [vmem:[#allocation61_spill] sm:$0xff] %v4341_v26  ;;  %vm1084_vm7 = vcmp.eq.s32.totalorder %v4341_v26, %v4278_v1 }
 0x163   : > { %v4332_v18 = vadd.f32 %v1118_v12, %v1097_v4  ;;  %v1117_v20 = vadd.f32 %v4292_v9, %v559_v14  ;;  %v4349_v12 = vadd.s32 48, %v4280_v3 }
 0x164   : > { %v4334_v19 = vadd.f32 %v1134_v13, %v1097_v4  ;;  %v1133_v21 = vadd.f32 %v4292_v9, %v720_v15  ;;  %v2845_v22 = vpop.f32.mrf.mxu0  ;;  %v1099_v4 = vsel %vm1082_vm5, %v4290_v6, 0.0 }
 0x165   : > { %v2901_v25 = vpop.f32.mrf.mxu1  ;;  %v4343_v27 = vadd.f32 %v1117_v20, %v1096_v16  ;;  %v562_v0 = vmul.f32 20.0, %v2845_v22  ;;  %5649 = vst [vmem:[#allocation62_spill] sm:$0xff] %v4349_v12  ;;  %v1098_v20 = vsel %vm1081_vm6, %v4290_v6, 0.0  ;;  %vm1083_vm8 = vcmp.eq.s32.totalorder %v4349_v12, %v4278_v1 }
 0x166   : > { %v4345_v28 = vadd.f32 %v1133_v21, %v1096_v16  ;;  %v723_v2 = vmul.f32 20.0, %v2901_v25  ;;  %v498_v7 = vpop.f32.mrf.mxu0 }
 0x167   : > { %v659_v8 = vpop.f32.mrf.mxu1  ;;  %v1120_v13 = vadd.f32 %v4292_v9, %v562_v0  ;;  %v561_v15 = vmul.f32 20.0, %v498_v7  ;;  %v4365_v0 = vadd.s32 72, %v4280_v3 }
 0x168   : > { %v1136_v14 = vadd.f32 %v4292_v9, %v723_v2  ;;  %v722_v10 = vmul.f32 20.0, %v659_v8 }
 0x169   : > { %v4356_v16 = vadd.f32 %v1120_v13, %v1099_v4  ;;  %v1119_v22 = vadd.f32 %v4292_v9, %v561_v15  ;;  %5650 = vst [vmem:[#allocation63_spill] sm:$0xff] %v4365_v0  ;;  %vm1086_vm9 = vcmp.eq.s32.totalorder %v4365_v0, %v4278_v1 }
 0x16a   : > { %v4358_v21 = vadd.f32 %v1136_v14, %v1099_v4  ;;  %v1135_v25 = vadd.f32 %v4292_v9, %v722_v10  ;;  %v2848_v29 = vpop.f32.mrf.mxu0  ;;  %v1101_v4 = vsel %vm1084_vm7, %v4290_v6, 0.0  ;;  %v4373_v10 = vadd.s32 64, %v4280_v3 }
 0x16b   : > { %v2904_v5 = vpop.f32.mrf.mxu1  ;;  %v4367_v2 = vadd.f32 %v1119_v22, %v1098_v20  ;;  %v564_v8 = vmul.f32 20.0, %v2848_v29  ;;  %v1100_v22 = vsel %vm1083_vm8, %v4290_v6, 0.0 }
 0x16c   : > { %v4369_v7 = vadd.f32 %v1135_v25, %v1098_v20  ;;  %v725_v13 = vmul.f32 20.0, %v2904_v5  ;;  %v508_v14 = vpop.f32.mrf.mxu0  ;;  %5652 = vst [vmem:[#allocation65_spill] sm:$0xff] %v4373_v10  ;;  %vm1085_vm10 = vcmp.eq.s32.totalorder %v4373_v10, %v4278_v1 }
 0x16d   : > { %v669_v15 = vpop.f32.mrf.mxu1  ;;  %v1122_v26 = vadd.f32 %v4292_v9, %v564_v8  ;;  %v563_v11 = vmul.f32 20.0, %v508_v14  ;;  %v4389_v8 = vadd.s32 88, %v4280_v3 }
 0x16e   : > { %5651 = vst [vmem:[#allocation64_spill] sm:$0xff] %v4369_v7  ;;  %v1138_v12 = vadd.f32 %v4292_v9, %v725_v13  ;;  %v724_v17 = vmul.f32 20.0, %v669_v15 }
 0x16f   : > { %v4380_v29 = vadd.f32 %v1122_v26, %v1101_v4  ;;  %v1121_v20 = vadd.f32 %v4292_v9, %v563_v11  ;;  %5653 = vst [vmem:[#allocation66_spill] sm:$0xff] %v4389_v8  ;;  %vm1088_vm11 = vcmp.eq.s32.totalorder %v4389_v8, %v4278_v1 }
 0x170   : > { %v4382_v5 = vadd.f32 %v1138_v12, %v1101_v4  ;;  %v1137_v25 = vadd.f32 %v4292_v9, %v724_v17  ;;  %v2851_v61 = vpop.f32.mrf.mxu0  ;;  %v1103_v12 = vsel %vm1086_vm9, %v4290_v6, 0.0  ;;  %v4397_v17 = vadd.s32 80, %v4280_v3 }
 0x171   : > { %v2907_v60 = vpop.f32.mrf.mxu1  ;;  %v4391_v13 = vadd.f32 %v1121_v20, %v1100_v22  ;;  %v566_v26 = vmul.f32 20.0, %v2851_v61  ;;  %v1102_v20 = vsel %vm1085_vm10, %v4290_v6, 0.0 }
 0x172   : > { %v4393_v14 = vadd.f32 %v1137_v25, %v1100_v22  ;;  %v727_v15 = vmul.f32 20.0, %v2907_v60  ;;  %v518_v4 = vpop.f32.mrf.mxu0  ;;  %5655 = vst [vmem:[#allocation68_spill] sm:$0xff] %v4397_v17  ;;  %vm1087_vm12 = vcmp.eq.s32.totalorder %v4397_v17, %v4278_v1 }
 0x173   : > { %v679_v11 = vpop.f32.mrf.mxu1  ;;  %v1124_v0 = vadd.f32 %v4292_v9, %v566_v26  ;;  %v565_v63 = vmul.f32 20.0, %v518_v4  ;;  %v4413_v26 = vadd.s32 104, %v4280_v3 }
 0x174   : > { %5654 = vst [vmem:[#allocation67_spill] sm:$0xff] %v4393_v14  ;;  %v1140_v10 = vadd.f32 %v4292_v9, %v727_v15  ;;  %v726_v62 = vmul.f32 20.0, %v679_v11 }
 0x175   : > { %v4404_v61 = vadd.f32 %v1124_v0, %v1103_v12  ;;  %v1123_v22 = vadd.f32 %v4292_v9, %v565_v63  ;;  %5657 = vst [vmem:[#allocation70_spill] sm:$0xff] %v4413_v26  ;;  %vm1090_vm13 = vcmp.eq.s32.totalorder %v4413_v26, %v4278_v1 }
 0x176   : > { %v4406_v60 = vadd.f32 %v1140_v10, %v1103_v12  ;;  %v1139_v25 = vadd.f32 %v4292_v9, %v726_v62  ;;  %v2854_v57 = vpop.f32.mrf.mxu0  ;;  %v1105_v10 = vsel %vm1088_vm11, %v4290_v6, 0.0  ;;  %v4421_v62 = vadd.s32 96, %v4280_v3 }
 0x177   : > { %v2910_v56 = vpop.f32.mrf.mxu1  ;;  %v4415_v15 = vadd.f32 %v1123_v22, %v1102_v20  ;;  %v568_v0 = vmul.f32 20.0, %v2854_v57  ;;  %v1104_v22 = vsel %vm1087_vm12, %v4290_v6, 0.0 }
 0x178   : > { %5656 = vst [vmem:[#allocation69_spill] sm:$0xff] %v4406_v60  ;;  %v4417_v4 = vadd.f32 %v1139_v25, %v1102_v20  ;;  %v729_v11 = vmul.f32 20.0, %v2910_v56  ;;  %v528_v12 = vpop.f32.mrf.mxu0  ;;  %5659 = vst [vmem:[#allocation72_spill] sm:$0xff] %v4421_v62  ;;  %vm1089_vm14 = vcmp.eq.s32.totalorder %v4421_v62, %v4278_v1 }
 0x179   : > { %v689_v63 = vpop.f32.mrf.mxu1  ;;  %v1126_v8 = vadd.f32 %v4292_v9, %v568_v0  ;;  %v567_v59 = vmul.f32 20.0, %v528_v12  ;;  %v4437_v0 = vadd.s32 120, %v4280_v3 }
 0x17a   : > { %5658 = vst [vmem:[#allocation71_spill] sm:$0xff] %v4417_v4  ;;  %v1142_v17 = vadd.f32 %v4292_v9, %v729_v11  ;;  %v728_v58 = vmul.f32 20.0, %v689_v63 }
 0x17b   : > { %v4428_v57 = vadd.f32 %v1126_v8, %v1105_v10  ;;  %v1125_v20 = vadd.f32 %v4292_v9, %v567_v59  ;;  %5661 = vst [vmem:[#allocation74_spill] sm:$0xff] %v4437_v0  ;;  %vm1092_vm15 = vcmp.eq.s32.totalorder %v4437_v0, %v4278_v1 }
 0x17c   : > { %v4430_v56 = vadd.f32 %v1142_v17, %v1105_v10  ;;  %v1141_v25 = vadd.f32 %v4292_v9, %v728_v58  ;;  %v2857_v53 = vpop.f32.mrf.mxu0  ;;  %v1107_v17 = vsel %vm1090_vm13, %v4290_v6, 0.0  ;;  %v4445_v58 = vadd.s32 112, %v4280_v3 }
 0x17d   : > { %v2913_v52 = vpop.f32.mrf.mxu1  ;;  %v4439_v11 = vadd.f32 %v1125_v20, %v1104_v22  ;;  %v570_v8 = vmul.f32 20.0, %v2857_v53  ;;  %v1106_v20 = vsel %vm1089_vm14, %v4290_v6, 0.0 }
 0x17e   : > { %5660 = vst [vmem:[#allocation73_spill] sm:$0xff] %v4430_v56  ;;  %v4441_v12 = vadd.f32 %v1141_v25, %v1104_v22  ;;  %v731_v63 = vmul.f32 20.0, %v2913_v52  ;;  %v538_v10 = vpop.f32.mrf.mxu0  ;;  %5663 = vst [vmem:[#allocation76_spill] sm:$0xff] %v4445_v58  ;;  %vm1091_vm0 = vcmp.eq.s32.totalorder %v4445_v58, %v4278_v1 }
 0x17f   : > { %v699_v59 = vpop.f32.mrf.mxu1  ;;  %v1128_v26 = vadd.f32 %v4292_v9, %v570_v8  ;;  %v569_v55 = vmul.f32 20.0, %v538_v10  ;;  %v1108_v51 = vsel %vm1091_vm0, %v4290_v6, 0.0 }
 0x180   : > { %5662 = vst [vmem:[#allocation75_spill] sm:$0xff] %v4441_v12  ;;  %v1144_v62 = vadd.f32 %v4292_v9, %v731_v63  ;;  %v730_v54 = vmul.f32 20.0, %v699_v59 }
 0x181   : > { %v4452_v53 = vadd.f32 %v1128_v26, %v1107_v17  ;;  %v1127_v22 = vadd.f32 %v4292_v9, %v569_v55  ;;  %v1109_v26 = vsel %vm1092_vm15, %v4290_v6, 0.0 }
 0x182   : > { %v4454_v52 = vadd.f32 %v1144_v62, %v1107_v17  ;;  %v1143_v25 = vadd.f32 %v4292_v9, %v730_v54  ;;  %v2860_v3 = vpop.f32.mrf.mxu0 }
 0x183   : > { %v2916_v49 = vpop.f32.mrf.mxu1  ;;  %v4460_v8 = vadd.f32 %v1127_v22, %v1106_v20  ;;  %v572_v10 = vmul.f32 20.0, %v2860_v3 }
 0x184   : > { %5664 = vst [vmem:[#allocation77_spill] sm:$0xff] %v4454_v52  ;;  %v4462_v63 = vadd.f32 %v1143_v25, %v1106_v20  ;;  %v733_v59 = vmul.f32 20.0, %v2916_v49  ;;  %v548_v0 = vpop.f32.mrf.mxu0 }
 0x185   : > { %v709_v62 = vpop.f32.mrf.mxu1  ;;  %v1130_v17 = vadd.f32 %v4292_v9, %v572_v10  ;;  %v571_v54 = vmul.f32 20.0, %v548_v0 }
 0x186   : > { %5665 = vst [vmem:[#allocation78_spill] sm:$0xff] %v4462_v63  ;;  %v1146_v55 = vadd.f32 %v4292_v9, %v733_v59  ;;  %v732_v48 = vmul.f32 20.0, %v709_v62 }
 0x187   : > { %v4468_v50 = vadd.f32 %v1130_v17, %v1109_v26  ;;  %v1129_v20 = vadd.f32 %v4292_v9, %v571_v54 }
 0x188   : > { %v4470_v1 = vadd.f32 %v1146_v55, %v1109_v26  ;;  %v1145_v49 = vadd.f32 %v4292_v9, %v732_v48  ;;  %v2951_v3 = vpop.f32.mrf.mxu0 }
 0x189   : > { %v3007_v22 = vpop.f32.mrf.mxu1  ;;  %v4474_v25 = vadd.f32 %v1129_v20, %v1108_v51  ;;  %v880_v10 = vmul.f32 20.0, %v2951_v3 }
 0x18a   : > { %5666 = vst [vmem:[#allocation79_spill] sm:$0xff] %v4470_v1  ;;  %v4476_v58 = vadd.f32 %v1145_v49, %v1108_v51  ;;  %v1041_v59 = vmul.f32 20.0, %v3007_v22  ;;  %v800_v0 = vpop.f32.mrf.mxu0 }
 0x18b   : > { %v961_v62 = vpop.f32.mrf.mxu1  ;;  %v4479_v6 = vadd.f32 %v4292_v9, %v880_v10  ;;  %v879_v17 = vmul.f32 20.0, %v800_v0 }
 0x18c   : > { %5667 = vst [vmem:[#allocation80_spill] sm:$0xff] %v4476_v58  ;;  %v4482_v26 = vadd.f32 %v4292_v9, %v1041_v59  ;;  %v1040_v55 = vmul.f32 20.0, %v961_v62  ;;  %v2954_v54 = vpop.f32.mrf.mxu0 }
 0x18d   : > { %v3010_v48 = vpop.f32.mrf.mxu1  ;;  %v4485_v45 = vadd.f32 %v4292_v9, %v879_v17  ;;  %v882_v20 = vmul.f32 20.0, %v2954_v54 }
 0x18e   : > { %v4488_v51 = vadd.f32 %v4292_v9, %v1040_v55  ;;  %v1043_v49 = vmul.f32 20.0, %v3010_v48  ;;  %v810_v3 = vpop.f32.mrf.mxu0 }
 0x18f   : > { %v971_v22 = vpop.f32.mrf.mxu1  ;;  %v4491_v10 = vadd.f32 %v4292_v9, %v882_v20  ;;  %v881_v0 = vmul.f32 20.0, %v810_v3 }
 0x190   : > { %v4494_v59 = vadd.f32 %v4292_v9, %v1043_v49  ;;  %v1042_v62 = vmul.f32 20.0, %v971_v22  ;;  %v2957_v44 = vpop.f32.mrf.mxu0 }
 0x191   : > { %v3013_v47 = vpop.f32.mrf.mxu1  ;;  %v4497_v17 = vadd.f32 %v4292_v9, %v881_v0  ;;  %v884_v54 = vmul.f32 20.0, %v2957_v44 }
 0x192   : > { %v4500_v55 = vadd.f32 %v4292_v9, %v1042_v62  ;;  %v1045_v48 = vmul.f32 20.0, %v3013_v47  ;;  %v820_v46 = vpop.f32.mrf.mxu0 }
 0x193   : > { %v981_v41 = vpop.f32.mrf.mxu1  ;;  %v4503_v20 = vadd.f32 %v4292_v9, %v884_v54  ;;  %v883_v3 = vmul.f32 20.0, %v820_v46 }
 0x194   : > { %v4506_v49 = vadd.f32 %v4292_v9, %v1045_v48  ;;  %v1044_v22 = vmul.f32 20.0, %v981_v41  ;;  %v2960_v40 = vpop.f32.mrf.mxu0 }
 0x195   : > { %v3016_v43 = vpop.f32.mrf.mxu1  ;;  %v4509_v0 = vadd.f32 %v4292_v9, %v883_v3  ;;  %v886_v44 = vmul.f32 20.0, %v2960_v40 }
 0x196   : > { %v4512_v62 = vadd.f32 %v4292_v9, %v1044_v22  ;;  %v1047_v47 = vmul.f32 20.0, %v3016_v43  ;;  %v830_v42 = vpop.f32.mrf.mxu0 }
 0x197   : > { %v991_v35 = vpop.f32.mrf.mxu1  ;;  %v4515_v54 = vadd.f32 %v4292_v9, %v886_v44  ;;  %v885_v46 = vmul.f32 20.0, %v830_v42 }
 0x198   : > { %v4518_v48 = vadd.f32 %v4292_v9, %v1047_v47  ;;  %v1046_v41 = vmul.f32 20.0, %v991_v35  ;;  %v2963_v34 = vpop.f32.mrf.mxu0 }
 0x199   : > { %v3019_v39 = vpop.f32.mrf.mxu1  ;;  %v4521_v3 = vadd.f32 %v4292_v9, %v885_v46  ;;  %v888_v40 = vmul.f32 20.0, %v2963_v34 }
 0x19a   : > { %v4524_v22 = vadd.f32 %v4292_v9, %v1046_v41  ;;  %v1049_v43 = vmul.f32 20.0, %v3019_v39  ;;  %v840_v38 = vpop.f32.mrf.mxu0 }
 0x19b   : > { %v1001_v33 = vpop.f32.mrf.mxu1  ;;  %v4527_v44 = vadd.f32 %v4292_v9, %v888_v40  ;;  %v887_v42 = vmul.f32 20.0, %v840_v38 }
 0x19c   : > { %5668 = vst [vmem:[#allocation81_spill] sm:$0xff] %v4524_v22  ;;  %v4530_v47 = vadd.f32 %v4292_v9, %v1049_v43  ;;  %v1048_v35 = vmul.f32 20.0, %v1001_v33  ;;  %v2966_v32 = vpop.f32.mrf.mxu0 }
 0x19d   : > { %v3022_v37 = vpop.f32.mrf.mxu1  ;;  %v4533_v46 = vadd.f32 %v4292_v9, %v887_v42  ;;  %v890_v34 = vmul.f32 20.0, %v2966_v32 }
 0x19e   : > { %5669 = vst [vmem:[#allocation82_spill] sm:$0xff] %v4530_v47  ;;  %v4536_v41 = vadd.f32 %v4292_v9, %v1048_v35  ;;  %v1051_v39 = vmul.f32 20.0, %v3022_v37  ;;  %v850_v36 = vpop.f32.mrf.mxu0 }
 0x19f   : > { %v1011_v1 = vpop.f32.mrf.mxu1  ;;  %v4539_v40 = vadd.f32 %v4292_v9, %v890_v34  ;;  %v889_v38 = vmul.f32 20.0, %v850_v36 }
 0x1a0   : > { %5670 = vst [vmem:[#allocation83_spill] sm:$0xff] %v4536_v41  ;;  %v4542_v43 = vadd.f32 %v4292_v9, %v1051_v39  ;;  %v1050_v33 = vmul.f32 20.0, %v1011_v1  ;;  %v2969_v52 = vpop.f32.mrf.mxu0 }
 0x1a1   : > { %v3025_v58 = vpop.f32.mrf.mxu1  ;;  %v4545_v42 = vadd.f32 %v4292_v9, %v889_v38  ;;  %v892_v32 = vmul.f32 20.0, %v2969_v52 }
 0x1a2   : > { %5671 = vst [vmem:[#allocation84_spill] sm:$0xff] %v4542_v43  ;;  %v4548_v35 = vadd.f32 %v4292_v9, %v1050_v33  ;;  %v1053_v37 = vmul.f32 20.0, %v3025_v58  ;;  %v860_v56 = vpop.f32.mrf.mxu0 }
 0x1a3   : > { %v1021_v63 = vpop.f32.mrf.mxu1  ;;  %v4551_v34 = vadd.f32 %v4292_v9, %v892_v32  ;;  %v891_v36 = vmul.f32 20.0, %v860_v56 }
 0x1a4   : > { %5672 = vst [vmem:[#allocation85_spill] sm:$0xff] %v4548_v35  ;;  %v4554_v39 = vadd.f32 %v4292_v9, %v1053_v37  ;;  %v1052_v1 = vmul.f32 20.0, %v1021_v63  ;;  %v2972_v43 = vpop.f32.mrf.mxu0 }
 0x1a5   : > { %v3028_v47 = vpop.f32.mrf.mxu1  ;;  %v4557_v38 = vadd.f32 %v4292_v9, %v891_v36  ;;  %v894_v52 = vmul.f32 20.0, %v2972_v43 }
 0x1a6   : > { %5673 = vst [vmem:[#allocation86_spill] sm:$0xff] %v4554_v39  ;;  %v4560_v33 = vadd.f32 %v4292_v9, %v1052_v1  ;;  %v1055_v58 = vmul.f32 20.0, %v3028_v47  ;;  %v870_v60 = vpop.f32.mrf.mxu0 }
 0x1a7   : > { %v1031_v35 = vpop.f32.mrf.mxu1  ;;  %v4563_v32 = vadd.f32 %v4292_v9, %v894_v52  ;;  %v893_v56 = vmul.f32 20.0, %v870_v60 }
 0x1a8   : > { %5674 = vst [vmem:[#allocation87_spill] sm:$0xff] %v4560_v33  ;;  %v4566_v37 = vadd.f32 %v4292_v9, %v1055_v58  ;;  %v1054_v63 = vmul.f32 20.0, %v1031_v35  ;;  %1214 = sbr.rel (%p2670_p2) target bundleno = 462 (0x1ce), region = 56 }
 0x1a9   : > { %v4569_v39 = vadd.f32 %v4292_v9, %v893_v56 }
 0x1aa   : > { %5675 = vst [vmem:[#allocation88_spill] sm:$0xff] %v4566_v37  ;;  %v4572_v36 = vadd.f32 %v4292_v9, %v1054_v63 }
 0x1ac   : > { %5676 = vst [vmem:[#allocation89_spill] sm:$0xff] %v4572_v36 }
 0x1ad   : > { %vm1215_vm1 = vcmask 7168   ;;  %v3628_v47 = vmov -1e+30   ;;  %v3629_v9 = vmov 0.0  }
 0x1ae   : > { %1216 = vst.msk [vmem:[#allocation2] sm:$0xff] %vm1215_vm1, %v3628_v47  ;;  %1217 = vst.msk [vmem:[#allocation2 + $0x8] sm:$0xff] %vm1215_vm1, %v3628_v47 }
 0x1af   : > { %1218 = vst.msk [vmem:[#allocation2 + $0x10] sm:$0xff] %vm1215_vm1, %v3628_v47  ;;  %1219 = vst.msk [vmem:[#allocation2 + $0x18] sm:$0xff] %vm1215_vm1, %v3628_v47 }
 0x1b0   : > { %1220 = vst.msk [vmem:[#allocation2 + $0x20] sm:$0xff] %vm1215_vm1, %v3628_v47  ;;  %1221 = vst.msk [vmem:[#allocation2 + $0x28] sm:$0xff] %vm1215_vm1, %v3628_v47 }
 0x1b1   : > { %1222 = vst.msk [vmem:[#allocation2 + $0x30] sm:$0xff] %vm1215_vm1, %v3628_v47  ;;  %1223 = vst.msk [vmem:[#allocation2 + $0x38] sm:$0xff] %vm1215_vm1, %v3628_v47 }
 0x1b2   : > { %1224 = vst.msk [vmem:[#allocation2 + $0x40] sm:$0xff] %vm1215_vm1, %v3628_v47  ;;  %1225 = vst.msk [vmem:[#allocation2 + $0x48] sm:$0xff] %vm1215_vm1, %v3628_v47 }
 0x1b3   : > { %1226 = vst.msk [vmem:[#allocation2 + $0x50] sm:$0xff] %vm1215_vm1, %v3628_v47  ;;  %1227 = vst.msk [vmem:[#allocation2 + $0x58] sm:$0xff] %vm1215_vm1, %v3628_v47 }
 0x1b4   : > { %1228 = vst.msk [vmem:[#allocation2 + $0x60] sm:$0xff] %vm1215_vm1, %v3628_v47  ;;  %1229 = vst.msk [vmem:[#allocation2 + $0x68] sm:$0xff] %vm1215_vm1, %v3628_v47 }
 0x1b5   : > { %1230 = vst.msk [vmem:[#allocation2 + $0x70] sm:$0xff] %vm1215_vm1, %v3628_v47  ;;  %1231 = vst.msk [vmem:[#allocation2 + $0x78] sm:$0xff] %vm1215_vm1, %v3628_v47 }
 0x1b6   : > { %1232 = vst.msk [vmem:[#allocation4] sm:$0xff] %vm1215_vm1, %v3628_v47  ;;  %1233 = vst.msk [vmem:[#allocation4 + $0x8] sm:$0xff] %vm1215_vm1, %v3628_v47 }
 0x1b7   : > { %1234 = vst.msk [vmem:[#allocation4 + $0x10] sm:$0xff] %vm1215_vm1, %v3628_v47  ;;  %1235 = vst.msk [vmem:[#allocation4 + $0x18] sm:$0xff] %vm1215_vm1, %v3628_v47 }
 0x1b8   : > { %1236 = vst.msk [vmem:[#allocation4 + $0x20] sm:$0xff] %vm1215_vm1, %v3628_v47  ;;  %1237 = vst.msk [vmem:[#allocation4 + $0x28] sm:$0xff] %vm1215_vm1, %v3628_v47 }
 0x1b9   : > { %1238 = vst.msk [vmem:[#allocation4 + $0x30] sm:$0xff] %vm1215_vm1, %v3628_v47  ;;  %1239 = vst.msk [vmem:[#allocation4 + $0x38] sm:$0xff] %vm1215_vm1, %v3628_v47 }
 0x1ba   : > { %1240 = vst.msk [vmem:[#allocation4 + $0x40] sm:$0xff] %vm1215_vm1, %v3628_v47  ;;  %1241 = vst.msk [vmem:[#allocation4 + $0x48] sm:$0xff] %vm1215_vm1, %v3628_v47 }
 0x1bb   : > { %1242 = vst.msk [vmem:[#allocation4 + $0x50] sm:$0xff] %vm1215_vm1, %v3628_v47  ;;  %1243 = vst.msk [vmem:[#allocation4 + $0x58] sm:$0xff] %vm1215_vm1, %v3628_v47 }
 0x1bc   : > { %1244 = vst.msk [vmem:[#allocation4 + $0x60] sm:$0xff] %vm1215_vm1, %v3628_v47  ;;  %1245 = vst.msk [vmem:[#allocation4 + $0x68] sm:$0xff] %vm1215_vm1, %v3628_v47 }
 0x1bd   : > { %1246 = vst.msk [vmem:[#allocation4 + $0x70] sm:$0xff] %vm1215_vm1, %v3628_v47  ;;  %1247 = vst.msk [vmem:[#allocation4 + $0x78] sm:$0xff] %vm1215_vm1, %v3628_v47 }
 0x1be   : > { %1248 = vst.msk [vmem:[#allocation3] sm:$0xff] %vm1215_vm1, %v3629_v9  ;;  %1249 = vst.msk [vmem:[#allocation3 + $0x8] sm:$0xff] %vm1215_vm1, %v3629_v9 }
 0x1bf   : > { %1250 = vst.msk [vmem:[#allocation3 + $0x10] sm:$0xff] %vm1215_vm1, %v3629_v9  ;;  %1251 = vst.msk [vmem:[#allocation3 + $0x18] sm:$0xff] %vm1215_vm1, %v3629_v9 }
 0x1c0   : > { %1252 = vst.msk [vmem:[#allocation3 + $0x20] sm:$0xff] %vm1215_vm1, %v3629_v9  ;;  %1253 = vst.msk [vmem:[#allocation3 + $0x28] sm:$0xff] %vm1215_vm1, %v3629_v9 }
 0x1c1   : > { %1254 = vst.msk [vmem:[#allocation3 + $0x30] sm:$0xff] %vm1215_vm1, %v3629_v9  ;;  %1255 = vst.msk [vmem:[#allocation3 + $0x38] sm:$0xff] %vm1215_vm1, %v3629_v9 }
 0x1c2   : > { %1256 = vst.msk [vmem:[#allocation3 + $0x40] sm:$0xff] %vm1215_vm1, %v3629_v9  ;;  %1257 = vst.msk [vmem:[#allocation3 + $0x48] sm:$0xff] %vm1215_vm1, %v3629_v9 }
 0x1c3   : > { %1258 = vst.msk [vmem:[#allocation3 + $0x50] sm:$0xff] %vm1215_vm1, %v3629_v9  ;;  %1259 = vst.msk [vmem:[#allocation3 + $0x58] sm:$0xff] %vm1215_vm1, %v3629_v9 }
 0x1c4   : > { %1260 = vst.msk [vmem:[#allocation3 + $0x60] sm:$0xff] %vm1215_vm1, %v3629_v9  ;;  %1261 = vst.msk [vmem:[#allocation3 + $0x68] sm:$0xff] %vm1215_vm1, %v3629_v9 }
 0x1c5   : > { %1262 = vst.msk [vmem:[#allocation3 + $0x70] sm:$0xff] %vm1215_vm1, %v3629_v9  ;;  %1263 = vst.msk [vmem:[#allocation3 + $0x78] sm:$0xff] %vm1215_vm1, %v3629_v9 }
 0x1c6   : > { %1264 = vst.msk [vmem:[#allocation5] sm:$0xff] %vm1215_vm1, %v3629_v9  ;;  %1265 = vst.msk [vmem:[#allocation5 + $0x8] sm:$0xff] %vm1215_vm1, %v3629_v9 }
 0x1c7   : > { %1266 = vst.msk [vmem:[#allocation5 + $0x10] sm:$0xff] %vm1215_vm1, %v3629_v9  ;;  %1267 = vst.msk [vmem:[#allocation5 + $0x18] sm:$0xff] %vm1215_vm1, %v3629_v9 }
 0x1c8   : > { %1268 = vst.msk [vmem:[#allocation5 + $0x20] sm:$0xff] %vm1215_vm1, %v3629_v9  ;;  %1269 = vst.msk [vmem:[#allocation5 + $0x28] sm:$0xff] %vm1215_vm1, %v3629_v9 }
 0x1c9   : > { %1270 = vst.msk [vmem:[#allocation5 + $0x30] sm:$0xff] %vm1215_vm1, %v3629_v9  ;;  %1271 = vst.msk [vmem:[#allocation5 + $0x38] sm:$0xff] %vm1215_vm1, %v3629_v9 }
 0x1ca   : > { %1272 = vst.msk [vmem:[#allocation5 + $0x40] sm:$0xff] %vm1215_vm1, %v3629_v9  ;;  %1273 = vst.msk [vmem:[#allocation5 + $0x48] sm:$0xff] %vm1215_vm1, %v3629_v9 }
 0x1cb   : > { %1274 = vst.msk [vmem:[#allocation5 + $0x50] sm:$0xff] %vm1215_vm1, %v3629_v9  ;;  %1275 = vst.msk [vmem:[#allocation5 + $0x58] sm:$0xff] %vm1215_vm1, %v3629_v9 }
 0x1cc   : > { %1276 = vst.msk [vmem:[#allocation5 + $0x60] sm:$0xff] %vm1215_vm1, %v3629_v9  ;;  %1277 = vst.msk [vmem:[#allocation5 + $0x68] sm:$0xff] %vm1215_vm1, %v3629_v9 }
 0x1cd   : > { %1278 = vst.msk [vmem:[#allocation5 + $0x70] sm:$0xff] %vm1215_vm1, %v3629_v9  ;;  %1279 = vst.msk [vmem:[#allocation5 + $0x78] sm:$0xff] %vm1215_vm1, %v3629_v9 }
 0x1ce PF: > { %v1282_v60 = vmax.f32 %v4497_v17, %v4343_v27  ;;  %v1280_v43 = vmax.f32 %v4485_v45, %v4319_v30  ;;  %v1283_v35 = vmax.f32 %v4491_v10, %v4332_v18  ;;  %v1281_v1 = vmax.f32 %v4479_v6, %v4308_v23  ;;  %s5855_s1 = sld [smem:[#allocation17_spill]] }
 0x1cf   : > { %v1285_v52 = vmax.f32 %v4503_v20, %v4356_v16  ;;  %v1284_v58 = vmax.f32 %v4509_v0, %v4367_v2  ;;  %v1287_v56 = vmax.f32 %v4515_v54, %v4380_v29  ;;  %v1286_v63 = vmax.f32 %v4521_v3, %v4391_v13 }
 0x1d0   : > { %1300 = vmax.xlane.f32.xlu1 %v1282_v60  ;;  %1296 = vmax.xlane.f32.xlu0 %v1280_v43  ;;  %v1289_v47 = vmax.f32 %v4527_v44, %v4404_v61  ;;  %v1288_v9 = vmax.f32 %v4533_v46, %v4415_v15  ;;  %v3630_v60 = vmov 0   ;;  %v1291_v43 = vmax.f32 %v4539_v40, %v4428_v57 }
 0x1d1   : > { %3146 = vset.pattern.permute.xlu0 %v3630_v60  ;;  %3147 = vset.pattern.permute.xlu1 %v3630_v60  ;;  %v1717_v60 = vmax.f32 %v4512_v62, %v4369_v7  ;;  %v5685_v7 = vld [vmem:[#allocation86_spill] sm:$0xff]  ;;  %vm1680_vm2 = vcmask 7168  }
 0x1d4   : > { %1302 = vmax.xlane.f32.xlu1 %v1283_v35  ;;  %1298 = vmax.xlane.f32.xlu0 %v1281_v1  ;;  %v1290_v35 = vmax.f32 %v4545_v42, %v4439_v11  ;;  %v1293_v1 = vmax.f32 %v4551_v34, %v4452_v53  ;;  %p2671_p5 = scmp.ne.s32.totalorder %s5855_s1, 1 }
 0x1d5   : > { %s2672_s21 = sshll.u32 (!%p2671_p5), %s3606_s22, 7 }
 0x1d8   : > { %1306 = vmax.xlane.f32.xlu1 %v1285_v52  ;;  %1304 = vmax.xlane.f32.xlu0 %v1284_v58  ;;  %v1292_v52 = vmax.f32 %v4557_v38, %v4460_v8  ;;  %v1295_v58 = vmax.f32 %v4563_v32, %v4468_v50 }
 0x1dc   : > { %1310 = vmax.xlane.f32.xlu1 %v1287_v56  ;;  %1308 = vmax.xlane.f32.xlu0 %v1286_v63  ;;  %v1294_v56 = vmax.f32 %v4569_v39, %v4474_v25  ;;  %v1714_v63 = vmax.f32 %v4482_v26, %v4310_v24 }
 0x1e0   : > { %1314 = vmax.xlane.f32.xlu1 %v1289_v47  ;;  %1312 = vmax.xlane.f32.xlu0 %v1288_v9  ;;  %v1713_v47 = vmax.f32 %v4488_v51, %v4321_v31  ;;  %v1715_v9 = vmax.f32 %v4500_v55, %v4345_v28 }
 0x1e4   : > { %1318 = vmax.xlane.f32.xlu1 %v1291_v43  ;;  %1316 = vmax.xlane.f32.xlu0 %v1290_v35  ;;  %v1716_v43 = vmax.f32 %v4494_v59, %v4334_v19  ;;  %v1719_v35 = vmax.f32 %v4524_v22, %v4393_v14  ;;  %v5682_v22 = vld [vmem:[#allocation84_spill] sm:$0xff] }
 0x1e8   : > { %1322 = vmax.xlane.f32.xlu1 %v1293_v1  ;;  %1320 = vmax.xlane.f32.xlu0 %v1292_v52  ;;  %v1718_v1 = vmax.f32 %v4506_v49, %v4358_v21  ;;  %v1721_v52 = vmax.f32 %v4536_v41, %v4417_v4 }
 0x1ec   : > { %1326 = vmax.xlane.f32.xlu1 %v1295_v58  ;;  %1324 = vmax.xlane.f32.xlu0 %v1294_v56  ;;  %v1720_v58 = vmax.f32 %v4518_v48, %v4382_v5  ;;  %v5677_v56 = vld [vmem:[#allocation85_spill] sm:$0xff] }
 0x1f0   : > { %1731 = vmax.xlane.f32.xlu1 %v1714_v63  ;;  %1729 = vmax.xlane.f32.xlu0 %v1713_v47  ;;  %v1723_v63 = vmax.f32 %v5677_v56, %v4441_v12  ;;  %v5678_v47 = vld [vmem:[#allocation69_spill] sm:$0xff] }
 0x1f1   : > { %v4703_v56 = vld [vmem:[#allocation2 + $0x10] sm:$0xff] }
 0x1f4   : > { %1733 = vmax.xlane.f32.xlu0 %v1715_v9  ;;  %1737 = vmax.xlane.f32.xlu1 %v1717_v60  ;;  %v5679_v9 = vld [vmem:[#allocation82_spill] sm:$0xff] }
 0x1f5   : > { %v1722_v60 = vmax.f32 %v5679_v9, %v5678_v47  ;;  %5687 = vst [vmem:[#allocation82_spill] sm:$0xff] %v4703_v56  ;;  %v4929_v47 = vld [vmem:[#allocation4 + $0x50] sm:$0xff] }
 0x1f6   : > { %5731 = vst [vmem:[#allocation133_spill] sm:$0xff] %v4929_v47 }
 0x1f8   : > { %1735 = vmax.xlane.f32.xlu0 %v1716_v43  ;;  %1741 = vmax.xlane.f32.xlu1 %v1719_v35  ;;  %v5680_v43 = vld [vmem:[#allocation78_spill] sm:$0xff]  ;;  %v5681_v35 = vld [vmem:[#allocation73_spill] sm:$0xff] }
 0x1f9   : > { %v1725_v14 = vmax.f32 %v4560_v33, %v5680_v43  ;;  %v1724_v4 = vmax.f32 %v5682_v22, %v5681_v35  ;;  %v4811_v35 = vld [vmem:[#allocation2 + $0x60] sm:$0xff] }
 0x1fa   : > { %5712 = vst [vmem:[#allocation114_spill] sm:$0xff] %v4811_v35  ;;  %v4850_v22 = vld [vmem:[#allocation4] sm:$0xff] }
 0x1fb   : > { %5719 = vst [vmem:[#allocation121_spill] sm:$0xff] %v4850_v22 }
 0x1fc   : > { %1739 = vmax.xlane.f32.xlu0 %v1718_v1  ;;  %1745 = vmax.xlane.f32.xlu1 %v1721_v52  ;;  %v5683_v1 = vld [vmem:[#allocation80_spill] sm:$0xff]  ;;  %v5684_v52 = vld [vmem:[#allocation77_spill] sm:$0xff] }
 0x1fd   : > { %v1727_v41 = vmax.f32 %v4572_v36, %v5683_v1  ;;  %v1726_v12 = vmax.f32 %v5685_v7, %v5684_v52  ;;  %v4713_v1 = vld [vmem:[#allocation2 + $0x18] sm:$0xff] }
 0x1fe   : > { %5691 = vst [vmem:[#allocation93_spill] sm:$0xff] %v4713_v1 }
 0x200   : > { %1743 = vmax.xlane.f32.xlu0 %v1720_v58  ;;  %1749 = vmax.xlane.f32.xlu1 %v1723_v63  ;;  %v5686_v58 = vld [vmem:[#allocation79_spill] sm:$0xff] }
 0x201   : > { %v1728_v63 = vmax.f32 %v4566_v37, %v5686_v58 }
 0x204   : > { %1747 = vmax.xlane.f32.xlu0 %v1722_v60  ;;  %1753 = vmax.xlane.f32.xlu1 %v1725_v14  ;;  %v4705_v60 = vld [vmem:[#allocation2] sm:$0xff] }
 0x205   : > { %5688 = vst [vmem:[#allocation90_spill] sm:$0xff] %v4705_v60 }
 0x208   : > { %1751 = vmax.xlane.f32.xlu0 %v1724_v4  ;;  %1757 = vmax.xlane.f32.xlu1 %v1727_v41  ;;  %v4732_v41 = vld [vmem:[#allocation2 + $0x28] sm:$0xff] }
 0x209   : > { %5695 = vst [vmem:[#allocation97_spill] sm:$0xff] %v4732_v41 }
 0x20c   : > { %1755 = vmax.xlane.f32.xlu0 %v1726_v12  ;;  %v4715_v12 = vld [vmem:[#allocation2 + $0x8] sm:$0xff] }
 0x20d   : > { %5692 = vst [vmem:[#allocation94_spill] sm:$0xff] %v4715_v12 }
 0x210   : > { %1759 = vmax.xlane.f32.xlu0 %v1728_v63  ;;  %v4751_v63 = vld [vmem:[#allocation2 + $0x38] sm:$0xff] }
 0x211   : > { %5699 = vst [vmem:[#allocation101_spill] sm:$0xff] %v4751_v63 }
 0x259   : > { %v1301_v43 = vpop.xlane.xlu1 %1300  ;;  %v1297_v14 = vpop.xlane.xlu0 %1296 }
 0x25a   : > { %v4708_v33 = vmax.f32 %v4703_v56, %v1301_v43  ;;  %v4711_v4 = vmax.f32 %v4705_v60, %v1297_v14  ;;  %v4734_v56 = vld [vmem:[#allocation2 + $0x20] sm:$0xff] }
 0x25b   : > { %5696 = vst [vmem:[#allocation98_spill] sm:$0xff] %v4734_v56 }
 0x25c   : > { %5689 = vst [vmem:[#allocation91_spill] sm:$0xff] %v4708_v33  ;;  %5690 = vst [vmem:[#allocation92_spill] sm:$0xff] %v4711_v4  ;;  %1362 = vperm.xlu0 %3146, %v4711_v4  }
 0x25d   : > { %1699 = vst.msk [vmem:[#allocation2 + $0x10] sm:$0xff] %vm1680_vm2, %v4708_v33  ;;  %1697 = vst.msk [vmem:[#allocation2] sm:$0xff] %vm1680_vm2, %v4711_v4  ;;  %v1303_v43 = vpop.xlane.xlu1 %1302  ;;  %v1299_v14 = vpop.xlane.xlu0 %1298  ;;  %v4770_v4 = vld [vmem:[#allocation2 + $0x48] sm:$0xff] }
 0x25e   : > { %v4727_v36 = vmax.f32 %v4713_v1, %v1303_v43  ;;  %v4730_v58 = vmax.f32 %v4715_v12, %v1299_v14  ;;  %v4753_v1 = vld [vmem:[#allocation2 + $0x30] sm:$0xff]  ;;  %5703 = vst [vmem:[#allocation105_spill] sm:$0xff] %v4770_v4 }
 0x25f   : > { %5700 = vst [vmem:[#allocation102_spill] sm:$0xff] %v4753_v1 }
 0x260   : > { %5693 = vst [vmem:[#allocation95_spill] sm:$0xff] %v4727_v36  ;;  %5694 = vst [vmem:[#allocation96_spill] sm:$0xff] %v4730_v58  ;;  %1367 = vperm.xlu1 %3147, %v4730_v58  }
 0x261   : > { %1700 = vst.msk [vmem:[#allocation2 + $0x18] sm:$0xff] %vm1680_vm2, %v4727_v36  ;;  %1698 = vst.msk [vmem:[#allocation2 + $0x8] sm:$0xff] %vm1680_vm2, %v4730_v58  ;;  %v1307_v43 = vpop.xlane.xlu1 %1306  ;;  %v1305_v14 = vpop.xlane.xlu0 %1304  ;;  %v4789_v58 = vld [vmem:[#allocation2 + $0x58] sm:$0xff] }
 0x262   : > { %v4746_v60 = vmax.f32 %v4732_v41, %v1307_v43  ;;  %v4749_v37 = vmax.f32 %v4734_v56, %v1305_v14  ;;  %v4772_v41 = vld [vmem:[#allocation2 + $0x40] sm:$0xff]  ;;  %5707 = vst [vmem:[#allocation109_spill] sm:$0xff] %v4789_v58 }
 0x263   : > { %5704 = vst [vmem:[#allocation106_spill] sm:$0xff] %v4772_v41 }
 0x264   : > { %5697 = vst [vmem:[#allocation99_spill] sm:$0xff] %v4746_v60  ;;  %5698 = vst [vmem:[#allocation100_spill] sm:$0xff] %v4749_v37  ;;  %1372 = vperm.xlu1 %3147, %v4708_v33  }
 0x265   : > { %1702 = vst.msk [vmem:[#allocation2 + $0x28] sm:$0xff] %vm1680_vm2, %v4746_v60  ;;  %1701 = vst.msk [vmem:[#allocation2 + $0x20] sm:$0xff] %vm1680_vm2, %v4749_v37  ;;  %v1311_v43 = vpop.xlane.xlu1 %1310  ;;  %v1309_v14 = vpop.xlane.xlu0 %1308 }
 0x266   : > { %v4765_v12 = vmax.f32 %v4751_v63, %v1311_v43  ;;  %v4768_v52 = vmax.f32 %v4753_v1, %v1309_v14  ;;  %v4791_v63 = vld [vmem:[#allocation2 + $0x50] sm:$0xff]  ;;  %v4828_v1 = vld [vmem:[#allocation2 + $0x78] sm:$0xff] }
 0x267   : > { %5708 = vst [vmem:[#allocation110_spill] sm:$0xff] %v4791_v63  ;;  %5715 = vst [vmem:[#allocation117_spill] sm:$0xff] %v4828_v1 }
 0x268   : > { %5701 = vst [vmem:[#allocation103_spill] sm:$0xff] %v4765_v12  ;;  %5702 = vst [vmem:[#allocation104_spill] sm:$0xff] %v4768_v52  ;;  %1377 = vperm.xlu1 %3147, %v4727_v36  }
 0x269   : > { %1704 = vst.msk [vmem:[#allocation2 + $0x38] sm:$0xff] %vm1680_vm2, %v4765_v12  ;;  %1703 = vst.msk [vmem:[#allocation2 + $0x30] sm:$0xff] %vm1680_vm2, %v4768_v52  ;;  %v1315_v43 = vpop.xlane.xlu1 %1314  ;;  %v1313_v14 = vpop.xlane.xlu0 %1312 }
 0x26a   : > { %v4784_v33 = vmax.f32 %v4770_v4, %v1315_v43  ;;  %v4787_v7 = vmax.f32 %v4772_v41, %v1313_v14  ;;  %v4809_v4 = vld [vmem:[#allocation2 + $0x68] sm:$0xff] }
 0x26b   : > { %5711 = vst [vmem:[#allocation113_spill] sm:$0xff] %v4809_v4 }
 0x26c   : > { %5705 = vst [vmem:[#allocation107_spill] sm:$0xff] %v4784_v33  ;;  %5706 = vst [vmem:[#allocation108_spill] sm:$0xff] %v4787_v7  ;;  %1382 = vperm.xlu1 %3147, %v4749_v37   ;;  %1407 = vperm.xlu0 %3146, %v4784_v33  }
 0x26d   : > { %1706 = vst.msk [vmem:[#allocation2 + $0x48] sm:$0xff] %vm1680_vm2, %v4784_v33  ;;  %1705 = vst.msk [vmem:[#allocation2 + $0x40] sm:$0xff] %vm1680_vm2, %v4787_v7  ;;  %v1319_v43 = vpop.xlane.xlu1 %1318  ;;  %v1317_v14 = vpop.xlane.xlu0 %1316 }
 0x26e   : > { %v4804_v36 = vmax.f32 %v4789_v58, %v1319_v43  ;;  %v4807_v56 = vmax.f32 %v4791_v63, %v1317_v14  ;;  %v4830_v58 = vld [vmem:[#allocation2 + $0x70] sm:$0xff] }
 0x26f   : > { %5716 = vst [vmem:[#allocation118_spill] sm:$0xff] %v4830_v58 }
 0x270   : > { %5709 = vst [vmem:[#allocation111_spill] sm:$0xff] %v4804_v36  ;;  %5710 = vst [vmem:[#allocation112_spill] sm:$0xff] %v4807_v56  ;;  %1387 = vperm.xlu1 %3147, %v4746_v60  }
 0x271   : > { %1708 = vst.msk [vmem:[#allocation2 + $0x58] sm:$0xff] %vm1680_vm2, %v4804_v36  ;;  %1707 = vst.msk [vmem:[#allocation2 + $0x50] sm:$0xff] %vm1680_vm2, %v4807_v56  ;;  %v1323_v43 = vpop.xlane.xlu1 %1322  ;;  %v1321_v14 = vpop.xlane.xlu0 %1320 }
 0x272   : > { %v4823_v33 = vmax.f32 %v4809_v4, %v1323_v43  ;;  %v4826_v37 = vmax.f32 %v4811_v35, %v1321_v14  ;;  %v4848_v4 = vld [vmem:[#allocation4 + $0x8] sm:$0xff] }
 0x273   : > { %5718 = vst [vmem:[#allocation120_spill] sm:$0xff] %v4848_v4 }
 0x274   : > { %5713 = vst [vmem:[#allocation115_spill] sm:$0xff] %v4823_v33  ;;  %5714 = vst [vmem:[#allocation116_spill] sm:$0xff] %v4826_v37  ;;  %1392 = vperm.xlu1 %3147, %v4768_v52   ;;  %1422 = vperm.xlu0 %3146, %v4826_v37   ;;  %v4870_v52 = vld [vmem:[#allocation4 + $0x20] sm:$0xff] }
 0x275   : > { %1710 = vst.msk [vmem:[#allocation2 + $0x68] sm:$0xff] %vm1680_vm2, %v4823_v33  ;;  %1709 = vst.msk [vmem:[#allocation2 + $0x60] sm:$0xff] %vm1680_vm2, %v4826_v37  ;;  %v1327_v43 = vpop.xlane.xlu1 %1326  ;;  %v1325_v14 = vpop.xlane.xlu0 %1324 }
 0x276   : > { %v4843_v60 = vmax.f32 %v4828_v1, %v1327_v43  ;;  %v4846_v41 = vmax.f32 %v4830_v58, %v1325_v14  ;;  %v4868_v1 = vld [vmem:[#allocation4 + $0x10] sm:$0xff]  ;;  %5723 = vst [vmem:[#allocation125_spill] sm:$0xff] %v4870_v52  ;;  %v4907_v58 = vld [vmem:[#allocation4 + $0x28] sm:$0xff] }
 0x277   : > { %5722 = vst [vmem:[#allocation124_spill] sm:$0xff] %v4868_v1  ;;  %5727 = vst [vmem:[#allocation129_spill] sm:$0xff] %v4907_v58 }
 0x278   : > { %5717 = vst [vmem:[#allocation119_spill] sm:$0xff] %v4843_v60  ;;  %1712 = vst.msk [vmem:[#allocation2 + $0x78] sm:$0xff] %vm1680_vm2, %v4843_v60  ;;  %1397 = vperm.xlu1 %3147, %v4765_v12   ;;  %1437 = vperm.xlu0 %3146, %v4843_v60   ;;  %v4890_v12 = vld [vmem:[#allocation4 + $0x30] sm:$0xff] }
 0x279   : > { %1711 = vst.msk [vmem:[#allocation2 + $0x70] sm:$0xff] %vm1680_vm2, %v4846_v41  ;;  %v1732_v43 = vpop.xlane.xlu1 %1731  ;;  %v1730_v14 = vpop.xlane.xlu0 %1729  ;;  %5725 = vst [vmem:[#allocation127_spill] sm:$0xff] %v4890_v12 }
 0x27a   : > { %v4863_v35 = vmax.f32 %v4848_v4, %v1732_v43  ;;  %v4866_v63 = vmax.f32 %v4850_v22, %v1730_v14  ;;  %v4888_v4 = vld [vmem:[#allocation4 + $0x18] sm:$0xff] }
 0x27b   : > { %5724 = vst [vmem:[#allocation126_spill] sm:$0xff] %v4888_v4 }
 0x27c   : > { %5720 = vst [vmem:[#allocation122_spill] sm:$0xff] %v4863_v35  ;;  %5721 = vst [vmem:[#allocation123_spill] sm:$0xff] %v4866_v63  ;;  %1402 = vperm.xlu1 %3147, %v4787_v7   ;;  %1800 = vperm.xlu0 %3146, %v4863_v35  }
 0x27d   : > { %2130 = vst.msk [vmem:[#allocation4 + $0x8] sm:$0xff] %vm1680_vm2, %v4863_v35  ;;  %2129 = vst.msk [vmem:[#allocation4] sm:$0xff] %vm1680_vm2, %v4866_v63  ;;  %v1734_v43 = vpop.xlane.xlu0 %1733  ;;  %v1738_v14 = vpop.xlane.xlu1 %1737 }
 0x27e   : > { %v4883_v60 = vmax.f32 %v4868_v1, %v1734_v43  ;;  %v4886_v37 = vmax.f32 %v4870_v52, %v1738_v14  ;;  %v4909_v1 = vld [vmem:[#allocation4 + $0x40] sm:$0xff] }
 0x27f   : > { %5728 = vst [vmem:[#allocation130_spill] sm:$0xff] %v4909_v1 }
 0x280   : > { %2131 = vst.msk [vmem:[#allocation4 + $0x10] sm:$0xff] %vm1680_vm2, %v4883_v60  ;;  %1412 = vperm.xlu1 %3147, %v4807_v56   ;;  %2133 = vst.msk [vmem:[#allocation4 + $0x20] sm:$0xff] %vm1680_vm2, %v4886_v37 }
 0x281   : > { %v1736_v43 = vpop.xlane.xlu0 %1735  ;;  %v1742_v14 = vpop.xlane.xlu1 %1741 }
 0x282   : > { %v4902_v35 = vmax.f32 %v4888_v4, %v1736_v43  ;;  %v4905_v7 = vmax.f32 %v4890_v12, %v1742_v14  ;;  %v4927_v4 = vld [vmem:[#allocation4 + $0x38] sm:$0xff] }
 0x283   : > { %5730 = vst [vmem:[#allocation132_spill] sm:$0xff] %v4927_v4 }
 0x284   : > { %5726 = vst [vmem:[#allocation128_spill] sm:$0xff] %v4902_v35  ;;  %2132 = vst.msk [vmem:[#allocation4 + $0x18] sm:$0xff] %vm1680_vm2, %v4902_v35  ;;  %1417 = vperm.xlu1 %3147, %v4804_v36   ;;  %1810 = vperm.xlu0 %3146, %v4902_v35   ;;  %v4949_v36 = vld [vmem:[#allocation4 + $0x60] sm:$0xff] }
 0x285   : > { %2135 = vst.msk [vmem:[#allocation4 + $0x30] sm:$0xff] %vm1680_vm2, %v4905_v7  ;;  %v1740_v14 = vpop.xlane.xlu0 %1739  ;;  %v1746_v22 = vpop.xlane.xlu1 %1745  ;;  %5735 = vst [vmem:[#allocation137_spill] sm:$0xff] %v4949_v36 }
 0x286   : > { %v4922_v52 = vmax.f32 %v4907_v58, %v1740_v14  ;;  %v4925_v56 = vmax.f32 %v4909_v1, %v1746_v22  ;;  %v4947_v58 = vld [vmem:[#allocation4 + $0x48] sm:$0xff] }
 0x287   : > { %5734 = vst [vmem:[#allocation136_spill] sm:$0xff] %v4947_v58 }
 0x288   : > { %5729 = vst [vmem:[#allocation131_spill] sm:$0xff] %v4922_v52  ;;  %2134 = vst.msk [vmem:[#allocation4 + $0x28] sm:$0xff] %vm1680_vm2, %v4922_v52  ;;  %1427 = vperm.xlu1 %3147, %v4823_v33   ;;  %1820 = vperm.xlu0 %3146, %v4922_v52   ;;  %v4969_v33 = vld [vmem:[#allocation4 + $0x70] sm:$0xff] }
 0x289   : > { %2137 = vst.msk [vmem:[#allocation4 + $0x40] sm:$0xff] %vm1680_vm2, %v4925_v56  ;;  %v1744_v22 = vpop.xlane.xlu0 %1743  ;;  %v1750_v43 = vpop.xlane.xlu1 %1749  ;;  %5739 = vst [vmem:[#allocation141_spill] sm:$0xff] %v4969_v33 }
 0x28a   : > { %v4942_v12 = vmax.f32 %v4927_v4, %v1744_v22  ;;  %v4945_v35 = vmax.f32 %v4929_v47, %v1750_v43  ;;  %v4967_v4 = vld [vmem:[#allocation4 + $0x58] sm:$0xff] }
 0x28b   : > { %5738 = vst [vmem:[#allocation140_spill] sm:$0xff] %v4967_v4 }
 0x28c   : > { %5732 = vst [vmem:[#allocation134_spill] sm:$0xff] %v4942_v12  ;;  %5733 = vst [vmem:[#allocation135_spill] sm:$0xff] %v4945_v35  ;;  %1432 = vperm.xlu1 %3147, %v4846_v41   ;;  %1830 = vperm.xlu0 %3146, %v4942_v12  }
 0x28d   : > { %2136 = vst.msk [vmem:[#allocation4 + $0x38] sm:$0xff] %vm1680_vm2, %v4942_v12  ;;  %2139 = vst.msk [vmem:[#allocation4 + $0x50] sm:$0xff] %vm1680_vm2, %v4945_v35  ;;  %v1748_v43 = vpop.xlane.xlu0 %1747  ;;  %v1754_v14 = vpop.xlane.xlu1 %1753 }
 0x28e   : > { %v4962_v1 = vmax.f32 %v4947_v58, %v1748_v43  ;;  %v4965_v52 = vmax.f32 %v4949_v36, %v1754_v14  ;;  %v4987_v58 = vld [vmem:[#allocation4 + $0x68] sm:$0xff]  ;;  %v5002_v36 = vld [vmem:[#allocation4 + $0x78] sm:$0xff] }
 0x28f   : > { %5742 = vst [vmem:[#allocation144_spill] sm:$0xff] %v4987_v58  ;;  %5744 = vst [vmem:[#allocation146_spill] sm:$0xff] %v5002_v36 }
 0x290   : > { %5736 = vst [vmem:[#allocation138_spill] sm:$0xff] %v4962_v1  ;;  %5737 = vst [vmem:[#allocation139_spill] sm:$0xff] %v4965_v52  ;;  %1795 = vperm.xlu1 %3147, %v4866_v63   ;;  %1840 = vperm.xlu0 %3146, %v4962_v1  }
 0x291   : > { %2138 = vst.msk [vmem:[#allocation4 + $0x48] sm:$0xff] %vm1680_vm2, %v4962_v1  ;;  %2141 = vst.msk [vmem:[#allocation4 + $0x60] sm:$0xff] %vm1680_vm2, %v4965_v52  ;;  %v1752_v14 = vpop.xlane.xlu0 %1751  ;;  %v1758_v22 = vpop.xlane.xlu1 %1757 }
 0x292   : > { %v4982_v47 = vmax.f32 %v4967_v4, %v1752_v14  ;;  %v4985_v12 = vmax.f32 %v4969_v33, %v1758_v22 }
 0x294   : > { %5740 = vst [vmem:[#allocation142_spill] sm:$0xff] %v4982_v47  ;;  %5741 = vst [vmem:[#allocation143_spill] sm:$0xff] %v4985_v12  ;;  %1805 = vperm.xlu1 %3147, %v4883_v60   ;;  %1850 = vperm.xlu0 %3146, %v4982_v47  }
 0x295   : > { %2140 = vst.msk [vmem:[#allocation4 + $0x58] sm:$0xff] %vm1680_vm2, %v4982_v47  ;;  %2143 = vst.msk [vmem:[#allocation4 + $0x70] sm:$0xff] %vm1680_vm2, %v4985_v12  ;;  %v1756_v22 = vpop.xlane.xlu0 %1755 }
 0x296   : > { %v5000_v14 = vmax.f32 %v4987_v58, %v1756_v22 }
 0x298   : > { %5743 = vst [vmem:[#allocation145_spill] sm:$0xff] %v5000_v14  ;;  %2142 = vst.msk [vmem:[#allocation4 + $0x68] sm:$0xff] %vm1680_vm2, %v5000_v14  ;;  %1815 = vperm.xlu1 %3147, %v4886_v37   ;;  %1860 = vperm.xlu0 %3146, %v5000_v14  }
 0x299   : > { %v1760_v43 = vpop.xlane.xlu0 %1759 }
 0x29a   : > { %v5011_v33 = vmax.f32 %v5002_v36, %v1760_v43 }
 0x29c   : > { %5745 = vst [vmem:[#allocation147_spill] sm:$0xff] %v5011_v33  ;;  %2144 = vst.msk [vmem:[#allocation4 + $0x78] sm:$0xff] %vm1680_vm2, %v5011_v33  ;;  %1825 = vperm.xlu1 %3147, %v4905_v7   ;;  %1870 = vperm.xlu0 %3146, %v5011_v33  }
 0x2a0   : > { %1835 = vperm.xlu1 %3147, %v4925_v56  }
 0x2a4   : > { %1845 = vperm.xlu1 %3147, %v4945_v35  }
 0x2a8   : > { %1855 = vperm.xlu1 %3147, %v4965_v52  }
 0x2ac   : > { %1865 = vperm.xlu1 %3147, %v4985_v12  }
 0x2d7   : > { %v1363_v43 = vpop.permute.xlu0 %1362 }
 0x2d8   : > { %v1440_v63 = vsub.f32 %v4485_v45, %v1363_v43  ;;  %v1488_v22 = vsub.f32 %v4319_v30, %v1363_v43 }
 0x2da   : > { %v1456_v36 = vmul.f32 1.442695, %v1440_v63  ;;  %v1504_v14 = vmul.f32 1.442695, %v1488_v22 }
 0x2db   : > { %v1368_v58 = vpop.permute.xlu1 %1367 }
 0x2dc   : > { %3148 = vpow2.f32 %v1456_v36  ;;  %v1441_v47 = vsub.f32 %v4479_v6, %v1368_v58  ;;  %v1489_v33 = vsub.f32 %v4308_v23, %v1368_v58 }
 0x2dd   : > { %3150 = vpow2.f32 %v1504_v14 }
 0x2de   : > { %v1458_v4 = vmul.f32 1.442695, %v1441_v47  ;;  %v1506_v35 = vmul.f32 1.442695, %v1489_v33 }
 0x2df   : > { %v1373_v1 = vpop.permute.xlu1 %1372 }
 0x2e0   : > { %3152 = vpow2.f32 %v1458_v4  ;;  %v1442_v12 = vsub.f32 %v4497_v17, %v1373_v1  ;;  %v1490_v52 = vsub.f32 %v4343_v27, %v1373_v1 }
 0x2e1   : > { %3154 = vpow2.f32 %v1506_v35 }
 0x2e2   : > { %v1460_v45 = vmul.f32 1.442695, %v1442_v12  ;;  %v1508_v30 = vmul.f32 1.442695, %v1490_v52 }
 0x2e3   : > { %v1378_v63 = vpop.permute.xlu1 %1377 }
 0x2e4   : > { %3156 = vpow2.f32 %v1460_v45  ;;  %v1443_v36 = vsub.f32 %v4491_v10, %v1378_v63  ;;  %v1491_v6 = vsub.f32 %v4332_v18, %v1378_v63 }
 0x2e5   : > { %3158 = vpow2.f32 %v1508_v30 }
 0x2e6   : > { %v1462_v23 = vmul.f32 1.442695, %v1443_v36  ;;  %v1510_v58 = vmul.f32 1.442695, %v1491_v6 }
 0x2e7   : > { %v1383_v47 = vpop.permute.xlu1 %1382  ;;  %v1408_v27 = vpop.permute.xlu0 %1407 }
 0x2e8   : > { %3160 = vpow2.f32 %v1462_v23  ;;  %v1444_v33 = vsub.f32 %v4509_v0, %v1383_v47  ;;  %v1492_v17 = vsub.f32 %v4367_v2, %v1383_v47  ;;  %v1449_v2 = vsub.f32 %v4527_v44, %v1408_v27 }
 0x2e9   : > { %v3149_v4 = vpop.eup %3148  ;;  %3162 = vpow2.f32 %v1510_v58  ;;  %v1497_v30 = vsub.f32 %v4404_v61, %v1408_v27 }
 0x2ea   : > { %v3151_v35 = vpop.eup %3150  ;;  %v1464_v1 = vmul.f32 1.442695, %v1444_v33  ;;  %v1512_v52 = vmul.f32 1.442695, %v1492_v17  ;;  %v1474_v47 = vmul.f32 1.442695, %v1449_v2 }
 0x2eb   : > { %v1388_v12 = vpop.permute.xlu1 %1387  ;;  %v1536_v14 = vadd.f32 %v3151_v35, %v3149_v4  ;;  %v1522_v4 = vmul.f32 1.442695, %v1497_v30 }
 0x2ec   : > { %3164 = vpow2.f32 %v1464_v1  ;;  %v1445_v18 = vsub.f32 %v4503_v20, %v1388_v12  ;;  %v1493_v10 = vsub.f32 %v4356_v16, %v1388_v12 }
 0x2ed   : > { %v3153_v22 = vpop.eup %3152  ;;  %3166 = vpow2.f32 %v1512_v52  ;;  %1632 = vadd.xlane.f32.xlu1 %v1536_v14 }
 0x2ee   : > { %v3155_v43 = vpop.eup %3154  ;;  %v1466_v0 = vmul.f32 1.442695, %v1445_v18  ;;  %v1514_v45 = vmul.f32 1.442695, %v1493_v10 }
 0x2ef   : > { %v1393_v63 = vpop.permute.xlu1 %1392  ;;  %v1423_v36 = vpop.permute.xlu0 %1422  ;;  %v1537_v6 = vadd.f32 %v3155_v43, %v3153_v22 }
 0x2f0   : > { %3168 = vpow2.f32 %v1466_v0  ;;  %v1446_v23 = vsub.f32 %v4521_v3, %v1393_v63  ;;  %v1494_v20 = vsub.f32 %v4391_v13, %v1393_v63  ;;  %v1452_v52 = vsub.f32 %v4557_v38, %v1423_v36 }
 0x2f1   : > { %v3157_v58 = vpop.eup %3156  ;;  %3170 = vpow2.f32 %v1514_v45  ;;  %1634 = vadd.xlane.f32.xlu0 %v1537_v6  ;;  %v1500_v18 = vsub.f32 %v4460_v8, %v1423_v36 }
 0x2f2   : > { %v3159_v16 = vpop.eup %3158  ;;  %v1468_v33 = vmul.f32 1.442695, %v1446_v23  ;;  %v1516_v17 = vmul.f32 1.442695, %v1494_v20  ;;  %v1480_v45 = vmul.f32 1.442695, %v1452_v52 }
 0x2f3   : > { %v1398_v35 = vpop.permute.xlu1 %1397  ;;  %v1538_v44 = vadd.f32 %v3159_v16, %v3157_v58  ;;  %v1438_v3 = vpop.permute.xlu0 %1437  ;;  %v1528_v38 = vmul.f32 1.442695, %v1500_v18 }
 0x2f4   : > { %3172 = vpow2.f32 %v1468_v33  ;;  %v1447_v61 = vsub.f32 %v4515_v54, %v1398_v35  ;;  %v1495_v27 = vsub.f32 %v4380_v29, %v1398_v35  ;;  %v1455_v63 = vsub.f32 %v4563_v32, %v1438_v3 }
 0x2f5   : > { %v3161_v1 = vpop.eup %3160  ;;  %3174 = vpow2.f32 %v1516_v17  ;;  %1636 = vadd.xlane.f32.xlu0 %v1538_v44  ;;  %v1503_v58 = vsub.f32 %v4468_v50, %v1438_v3 }
 0x2f6   : > { %v3163_v13 = vpop.eup %3162  ;;  %3176 = vpow2.f32 %v1474_v47  ;;  %v1470_v12 = vmul.f32 1.442695, %v1447_v61  ;;  %v1518_v14 = vmul.f32 1.442695, %v1495_v27  ;;  %v1486_v33 = vmul.f32 1.442695, %v1455_v63 }
 0x2f7   : > { %3178 = vpow2.f32 %v1522_v4  ;;  %v1403_v10 = vpop.permute.xlu1 %1402  ;;  %v1539_v22 = vadd.f32 %v3163_v13, %v3161_v1  ;;  %v1801_v6 = vpop.permute.xlu0 %1800  ;;  %v1534_v27 = vmul.f32 1.442695, %v1503_v58 }
 0x2f8   : > { %3180 = vpow2.f32 %v1470_v12  ;;  %v1448_v54 = vsub.f32 %v4533_v46, %v1403_v10  ;;  %v1496_v29 = vsub.f32 %v4415_v15, %v1403_v10  ;;  %v1874_v32 = vsub.f32 %v4482_v26, %v1801_v6 }
 0x2f9   : > { %v3165_v43 = vpop.eup %3164  ;;  %3182 = vpow2.f32 %v1518_v14  ;;  %1638 = vadd.xlane.f32.xlu1 %v1539_v22  ;;  %v1922_v26 = vsub.f32 %v4310_v24, %v1801_v6 }
 0x2fa   : > { %v3167_v0 = vpop.eup %3166  ;;  %v1472_v2 = vmul.f32 1.442695, %v1448_v54  ;;  %v1520_v30 = vmul.f32 1.442695, %v1496_v29  ;;  %v1891_v13 = vmul.f32 1.442695, %v1874_v32 }
 0x2fb   : > { %v1413_v23 = vpop.permute.xlu1 %1412  ;;  %v1540_v8 = vadd.f32 %v3167_v0, %v3165_v43  ;;  %v1939_v24 = vmul.f32 1.442695, %v1922_v26 }
 0x2fc   : > { %3184 = vpow2.f32 %v1472_v2  ;;  %v1450_v36 = vsub.f32 %v4545_v42, %v1413_v23  ;;  %v1498_v46 = vsub.f32 %v4439_v11, %v1413_v23 }
 0x2fd   : > { %v3169_v20 = vpop.eup %3168  ;;  %3186 = vpow2.f32 %v1520_v30  ;;  %1640 = vadd.xlane.f32.xlu0 %v1540_v8 }
 0x2fe   : > { %v3171_v15 = vpop.eup %3170  ;;  %3188 = vpow2.f32 %v1480_v45  ;;  %v1476_v16 = vmul.f32 1.442695, %v1450_v36  ;;  %v1524_v47 = vmul.f32 1.442695, %v1498_v46 }
 0x2ff   : > { %3190 = vpow2.f32 %v1528_v38  ;;  %v1418_v17 = vpop.permute.xlu1 %1417  ;;  %v1811_v4 = vpop.permute.xlu0 %1810  ;;  %v1541_v35 = vadd.f32 %v3171_v15, %v3169_v20 }
 0x300   : > { %3192 = vpow2.f32 %v1476_v16  ;;  %v1451_v42 = vsub.f32 %v4539_v40, %v1418_v17  ;;  %v1499_v11 = vsub.f32 %v4428_v57, %v1418_v17  ;;  %v1876_v54 = vsub.f32 %v4494_v59, %v1811_v4 }
 0x301   : > { %v3173_v44 = vpop.eup %3172  ;;  %3194 = vpow2.f32 %v1524_v47  ;;  %1642 = vadd.xlane.f32.xlu1 %v1541_v35  ;;  %v1924_v0 = vsub.f32 %v4334_v19, %v1811_v4 }
 0x302   : > { %v3175_v61 = vpop.eup %3174  ;;  %v1478_v50 = vmul.f32 1.442695, %v1451_v42  ;;  %v1526_v1 = vmul.f32 1.442695, %v1499_v11  ;;  %3196 = vpow2.f32 %v1486_v33  ;;  %v1895_v6 = vmul.f32 1.442695, %v1876_v54 }
 0x303   : > { %v3177_v3 = vpop.eup %3176  ;;  %v1428_v52 = vpop.permute.xlu1 %1427  ;;  %v1542_v14 = vadd.f32 %v3175_v61, %v3173_v44  ;;  %v1943_v46 = vmul.f32 1.442695, %v1924_v0  ;;  %v5747_v54 = vld [vmem:[#allocation69_spill] sm:$0xff]  ;;  %v5748_v0 = vld [vmem:[#allocation84_spill] sm:$0xff] }
 0x304   : > { %v1821_v12 = vpop.permute.xlu0 %1820  ;;  %v3179_v18 = vpop.eup %3178  ;;  %3198 = vpow2.f32 %v1478_v50  ;;  %v1453_v40 = vsub.f32 %v4551_v34, %v1428_v52  ;;  %v1501_v57 = vsub.f32 %v4452_v53, %v1428_v52 }
 0x305   : > { %v3181_v10 = vpop.eup %3180  ;;  %3200 = vpow2.f32 %v1526_v1  ;;  %1644 = vadd.xlane.f32.xlu0 %v1542_v14  ;;  %v1545_v63 = vadd.f32 %v3179_v18, %v3177_v3  ;;  %v1878_v23 = vsub.f32 %v4506_v49, %v1821_v12  ;;  %v1926_v20 = vsub.f32 %v4358_v21, %v1821_v12 }
 0x306   : > { %v3183_v22 = vpop.eup %3182  ;;  %3202 = vpow2.f32 %v1534_v27  ;;  %v1482_v29 = vmul.f32 1.442695, %v1453_v40  ;;  %v1530_v43 = vmul.f32 1.442695, %v1501_v57  ;;  %v5746_v40 = vld [vmem:[#allocation64_spill] sm:$0xff] }
 0x307   : > { %3204 = vpow2.f32 %v1891_v13  ;;  %v1433_v45 = vpop.permute.xlu1 %1432  ;;  %v1543_v30 = vadd.f32 %v3183_v22, %v3181_v10  ;;  %v1899_v32 = vmul.f32 1.442695, %v1878_v23  ;;  %v1947_v21 = vmul.f32 1.442695, %v1926_v20 }
 0x308   : > { %v5057_v2 = vpop.permute.xlu0 %1830  ;;  %3206 = vpow2.f32 %v1482_v29  ;;  %v1454_v53 = vsub.f32 %v4569_v39, %v1433_v45  ;;  %v1502_v34 = vsub.f32 %v4474_v25, %v1433_v45 }
 0x309   : > { %v3185_v38 = vpop.eup %3184  ;;  %3208 = vpow2.f32 %v1530_v43  ;;  %1646 = vadd.xlane.f32.xlu1 %v1543_v30  ;;  %v1880_v35 = vsub.f32 %v4518_v48, %v5057_v2  ;;  %v1928_v1 = vsub.f32 %v4382_v5, %v5057_v2 }
 0x30a   : > { %v3187_v59 = vpop.eup %3186  ;;  %v1484_v8 = vmul.f32 1.442695, %v1454_v53  ;;  %v1532_v36 = vmul.f32 1.442695, %v1502_v34  ;;  %3210 = vpow2.f32 %v1939_v24 }
 0x30b   : > { %v3189_v19 = vpop.eup %3188  ;;  %v1796_v15 = vpop.permute.xlu1 %1795  ;;  %v1544_v58 = vadd.f32 %v3187_v59, %v3185_v38  ;;  %v1903_v26 = vmul.f32 1.442695, %v1880_v35  ;;  %v1951_v22 = vmul.f32 1.442695, %v1928_v1  ;;  %v5750_v38 = vld [vmem:[#allocation67_spill] sm:$0xff] }
 0x30c   : > { %v3191_v39 = vpop.eup %3190  ;;  %3212 = vpow2.f32 %v1484_v8  ;;  %v1873_v25 = vsub.f32 %v4488_v51, %v1796_v15  ;;  %v1921_v16 = vsub.f32 %v4321_v31, %v1796_v15  ;;  %v1841_v33 = vpop.permute.xlu0 %1840 }
 0x30d   : > { %v3193_v47 = vpop.eup %3192  ;;  %3214 = vpow2.f32 %v1532_v36  ;;  %1648 = vadd.xlane.f32.xlu0 %v1544_v58  ;;  %1650 = vadd.xlane.f32.xlu1 %v1545_v63  ;;  %v1548_v27 = vadd.f32 %v3191_v39, %v3189_v19  ;;  %v1882_v52 = vsub.f32 %v5679_v9, %v1841_v33  ;;  %v1930_v29 = vsub.f32 %v5747_v54, %v1841_v33  ;;  %v5751_v58 = vld [vmem:[#allocation73_spill] sm:$0xff]  ;;  %v5752_v33 = vld [vmem:[#allocation83_spill] sm:$0xff] }
 0x30e   : > { %v3195_v49 = vpop.eup %3194  ;;  %3216 = vpow2.f32 %v1895_v6  ;;  %v1889_v17 = vmul.f32 1.442695, %v1873_v25  ;;  %v1937_v4 = vmul.f32 1.442695, %v1921_v16 }
 0x30f   : > { %3218 = vpow2.f32 %v1943_v46  ;;  %v1806_v42 = vpop.permute.xlu1 %1805  ;;  %v1546_v11 = vadd.f32 %v3195_v49, %v3193_v47  ;;  %v3197_v51 = vpop.eup %3196  ;;  %v1907_v9 = vmul.f32 1.442695, %v1882_v52  ;;  %v1955_v36 = vmul.f32 1.442695, %v1930_v29  ;;  %v5759_v29 = vld [vmem:[#allocation79_spill] sm:$0xff] }
 0x310   : > { %3220 = vpow2.f32 %v1889_v17  ;;  %v1875_v31 = vsub.f32 %v4500_v55, %v1806_v42  ;;  %v1923_v44 = vsub.f32 %v4345_v28, %v1806_v42  ;;  %v1851_v12 = vpop.permute.xlu0 %1850  ;;  %v5754_v42 = vld [vmem:[#allocation86_spill] sm:$0xff] }
 0x311   : > { %v3199_v61 = vpop.eup %3198  ;;  %3222 = vpow2.f32 %v1937_v4  ;;  %1652 = vadd.xlane.f32.xlu0 %v1546_v11  ;;  %v1884_v45 = vsub.f32 %v5748_v0, %v1851_v12  ;;  %v1932_v39 = vsub.f32 %v5751_v58, %v1851_v12  ;;  %v5757_v12 = vld [vmem:[#allocation75_spill] sm:$0xff]  ;;  %v5763_v58 = vld [vmem:[#allocation80_spill] sm:$0xff] }
 0x312   : > { %v3201_v50 = vpop.eup %3200  ;;  %3224 = vpow2.f32 %v1899_v32  ;;  %v1893_v3 = vmul.f32 1.442695, %v1875_v31  ;;  %v1941_v13 = vmul.f32 1.442695, %v1923_v44  ;;  %v5753_v32 = vld [vmem:[#allocation71_spill] sm:$0xff] }
 0x313   : > { %v3203_v48 = vpop.eup %3202  ;;  %3226 = vpow2.f32 %v1947_v21  ;;  %v1816_v55 = vpop.permute.xlu1 %1815  ;;  %v1547_v14 = vadd.f32 %v3201_v50, %v3199_v61  ;;  %v1911_v15 = vmul.f32 1.442695, %v1884_v45  ;;  %v1959_v61 = vmul.f32 1.442695, %v1932_v39  ;;  %v5760_v45 = vld [vmem:[#allocation87_spill] sm:$0xff] }
 0x314   : > { %v3205_v28 = vpop.eup %3204  ;;  %3228 = vpow2.f32 %v1893_v3  ;;  %v1877_v18 = vsub.f32 %v4512_v62, %v1816_v55  ;;  %v1925_v57 = vsub.f32 %v5746_v40, %v1816_v55  ;;  %v5749_v62 = vld [vmem:[#allocation81_spill] sm:$0xff]  ;;  %v1861_v6 = vpop.permute.xlu0 %1860  ;;  %v1551_v23 = vadd.f32 %v3203_v48, %v3197_v51 }
 0x315   : > { %v3207_v10 = vpop.eup %3206  ;;  %3230 = vpow2.f32 %v1941_v13  ;;  %1654 = vadd.xlane.f32.xlu1 %v1547_v14  ;;  %1656 = vadd.xlane.f32.xlu0 %v1548_v27  ;;  %v1886_v11 = vsub.f32 %v5754_v42, %v1861_v6  ;;  %v5755_v27 = vld [vmem:[#allocation77_spill] sm:$0xff] }
 0x316   : > { %v3209_v5 = vpop.eup %3208  ;;  %v1897_v43 = vmul.f32 1.442695, %v1877_v18  ;;  %v1945_v24 = vmul.f32 1.442695, %v1925_v57  ;;  %3232 = vpow2.f32 %v1903_v26  ;;  %v1934_v50 = vsub.f32 %v5755_v27, %v1861_v6  ;;  %v5756_v26 = vld [vmem:[#allocation85_spill] sm:$0xff]  ;;  %v5758_v57 = vld [vmem:[#allocation88_spill] sm:$0xff] }
 0x317   : > { %v1826_v2 = vpop.permute.xlu1 %1825  ;;  %v1549_v30 = vadd.f32 %v3209_v5, %v3207_v10  ;;  %v3211_v53 = vpop.eup %3210  ;;  %v1915_v40 = vmul.f32 1.442695, %v1886_v11 }
 0x318   : > { %3234 = vpow2.f32 %v1897_v43  ;;  %v1879_v34 = vsub.f32 %v5749_v62, %v1826_v2  ;;  %v1927_v63 = vsub.f32 %v5750_v38, %v1826_v2  ;;  %v1970_v21 = vadd.f32 %v3211_v53, %v3205_v28  ;;  %v1871_v1 = vpop.permute.xlu0 %1870 }
 0x319   : > { %v3213_v59 = vpop.eup %3212  ;;  %3236 = vpow2.f32 %v1945_v24  ;;  %1658 = vadd.xlane.f32.xlu1 %v1549_v30  ;;  %v1888_v10 = vsub.f32 %v5758_v57, %v1871_v1  ;;  %v1963_v54 = vmul.f32 1.442695, %v1934_v50  ;;  %v1936_v43 = vsub.f32 %v5759_v29, %v1871_v1  ;;  %v5761_v30 = vld [vmem:[#allocation78_spill] sm:$0xff]  ;;  %v5765_v57 = vld [vmem:[#allocation92_spill] sm:$0xff] }
 0x31a   : > { %v3215_v8 = vpop.eup %3214  ;;  %3238 = vpow2.f32 %v1951_v22  ;;  %v1901_v19 = vmul.f32 1.442695, %v1879_v34  ;;  %v1949_v46 = vmul.f32 1.442695, %v1927_v63 }
 0x31b   : > { %v3217_v20 = vpop.eup %3216  ;;  %3240 = vpow2.f32 %v1907_v9  ;;  %v1836_v25 = vpop.permute.xlu1 %1835  ;;  %v1550_v16 = vadd.f32 %v3215_v8, %v3213_v59  ;;  %v1919_v38 = vmul.f32 1.442695, %v1888_v10 }
 0x31c   : > { %v3219_v47 = vpop.eup %3218  ;;  %3242 = vpow2.f32 %v1901_v19  ;;  %v1881_v49 = vsub.f32 %v5752_v33, %v1836_v25  ;;  %v1929_v17 = vsub.f32 %v5753_v32, %v1836_v25 }
 0x31d   : > { %v3221_v4 = vpop.eup %3220  ;;  %3244 = vpow2.f32 %v1949_v46  ;;  %1660 = vadd.xlane.f32.xlu0 %v1550_v16  ;;  %1662 = vadd.xlane.f32.xlu1 %v1551_v23  ;;  %v1972_v28 = vadd.f32 %v3219_v47, %v3217_v20  ;;  %v1967_v23 = vmul.f32 1.442695, %v1936_v43  ;;  %v5762_v20 = vld [vmem:[#allocation89_spill] sm:$0xff] }
 0x31e   : > { %v3223_v35 = vpop.eup %3222  ;;  %3246 = vpow2.f32 %v1955_v36  ;;  %v1905_v51 = vmul.f32 1.442695, %v1881_v49  ;;  %v1953_v31 = vmul.f32 1.442695, %v1929_v17 }
 0x31f   : > { %v3225_v44 = vpop.eup %3224  ;;  %3248 = vpow2.f32 %v1911_v15  ;;  %v1846_v3 = vpop.permute.xlu1 %1845  ;;  %v1969_v13 = vadd.f32 %v3223_v35, %v3221_v4 }
 0x320   : > { %v3227_v48 = vpop.eup %3226  ;;  %3250 = vpow2.f32 %v1905_v51  ;;  %v1883_v52 = vsub.f32 %v5756_v26, %v1846_v3  ;;  %v1931_v55 = vsub.f32 %v5757_v12, %v1846_v3 }
 0x321   : > { %v3229_v14 = vpop.eup %3228  ;;  %3252 = vpow2.f32 %v1953_v31  ;;  %2065 = vadd.xlane.f32.xlu0 %v1969_v13  ;;  %2067 = vadd.xlane.f32.xlu1 %v1970_v21  ;;  %v1974_v19 = vadd.f32 %v3227_v48, %v3225_v44 }
 0x322   : > { %v3231_v18 = vpop.eup %3230  ;;  %v1909_v5 = vmul.f32 1.442695, %v1883_v52  ;;  %v1957_v22 = vmul.f32 1.442695, %v1931_v55  ;;  %3254 = vpow2.f32 %v1959_v61 }
 0x323   : > { %v1856_v24 = vpop.permute.xlu1 %1855  ;;  %v1971_v9 = vadd.f32 %v3231_v18, %v3229_v14  ;;  %v3233_v0 = vpop.eup %3232 }
 0x324   : > { %3256 = vpow2.f32 %v1909_v5  ;;  %v1885_v2 = vsub.f32 %v5760_v45, %v1856_v24  ;;  %v1933_v53 = vsub.f32 %v5761_v30, %v1856_v24  ;;  %v5770_v24 = vld [vmem:[#allocation82_spill] sm:$0xff]  ;;  %v5774_v30 = vld [vmem:[#allocation95_spill] sm:$0xff] }
 0x325   : > { %v3235_v62 = vpop.eup %3234  ;;  %3258 = vpow2.f32 %v1957_v22  ;;  %2069 = vadd.xlane.f32.xlu0 %v1971_v9  ;;  %2071 = vadd.xlane.f32.xlu1 %v1972_v28  ;;  %v5767_v22 = vld [vmem:[#allocation94_spill] sm:$0xff]  ;;  %v5771_v9 = vld [vmem:[#allocation91_spill] sm:$0xff] }
 0x326   : > { %v3237_v34 = vpop.eup %3236  ;;  %3260 = vpow2.f32 %v1915_v40  ;;  %v1913_v63 = vmul.f32 1.442695, %v1885_v2  ;;  %v1961_v59 = vmul.f32 1.442695, %v1933_v53  ;;  %v5764_v40 = vld [vmem:[#allocation90_spill] sm:$0xff]  ;;  %v5773_v2 = vld [vmem:[#allocation93_spill] sm:$0xff] }
 0x327   : > { %v3239_v6 = vpop.eup %3238  ;;  %3262 = vpow2.f32 %v1963_v54  ;;  %v1866_v8 = vpop.permute.xlu1 %1865  ;;  %v1973_v36 = vadd.f32 %v3237_v34, %v3235_v62  ;;  %v5766_v10 = vsub.f32 %v5764_v40, %v5765_v57  ;;  %v5768_v54 = vld [vmem:[#allocation96_spill] sm:$0xff]  ;;  %v5775_v53 = vsub.f32 %v5773_v2, %v5774_v30  ;;  %v5776_v34 = vld [vmem:[#allocation98_spill] sm:$0xff]  ;;  %v1556_v57 = vld [vmem:[#allocation3 + $0x20] sm:$0xff] }
 0x328   : > { %v3241_v46 = vpop.eup %3240  ;;  %3264 = vpow2.f32 %v1913_v63  ;;  %v1887_v15 = vsub.f32 %v5762_v20, %v1866_v8  ;;  %v1935_v39 = vsub.f32 %v5763_v58, %v1866_v8  ;;  %v1976_v17 = vadd.f32 %v3239_v6, %v3233_v0  ;;  %v5779_v8 = vld [vmem:[#allocation97_spill] sm:$0xff]  ;;  %v5798_v30 = vld [vmem:[#allocation111_spill] sm:$0xff] }
 0x329   : > { %v3243_v25 = vpop.eup %3242  ;;  %3266 = vpow2.f32 %v1961_v59  ;;  %2073 = vadd.xlane.f32.xlu0 %v1973_v36  ;;  %2075 = vadd.xlane.f32.xlu1 %v1974_v19  ;;  %v1584_v5 = vmul.f32 1.442695, %v5766_v10  ;;  %v5769_v29 = vsub.f32 %v5767_v22, %v5768_v54  ;;  %v5772_v0 = vsub.f32 %v5770_v24, %v5771_v9  ;;  %v5780_v36 = vld [vmem:[#allocation99_spill] sm:$0xff]  ;;  %v5795_v22 = vld [vmem:[#allocation112_spill] sm:$0xff]  ;;  %v5797_v2 = vld [vmem:[#allocation109_spill] sm:$0xff] }
 0x32a   : > { %v3245_v16 = vpop.eup %3244  ;;  %3268 = vpow2.f32 %v1919_v38  ;;  %v1917_v47 = vmul.f32 1.442695, %v1887_v15  ;;  %v1965_v33 = vmul.f32 1.442695, %v1935_v39  ;;  %v1590_v62 = vmul.f32 1.442695, %v5775_v53 }
 0x32b   : > { %v3247_v49 = vpop.eup %3246  ;;  %3270 = vpow2.f32 %v1967_v23  ;;  %v1975_v32 = vadd.f32 %v3245_v16, %v3243_v25  ;;  %v1586_v43 = vmul.f32 1.442695, %v5769_v29  ;;  %v1588_v45 = vmul.f32 1.442695, %v5772_v0  ;;  %v5777_v38 = vld [vmem:[#allocation100_spill] sm:$0xff]  ;;  %v1552_v23 = vld [vmem:[#allocation3] sm:$0xff] }
 0x32c   : > { %v3249_v4 = vpop.eup %3248  ;;  %3272 = vpow2.f32 %v1917_v47  ;;  %v1978_v11 = vadd.f32 %v3247_v49, %v3241_v46  ;;  %v5778_v63 = vsub.f32 %v5776_v34, %v5777_v38  ;;  %v5781_v19 = vsub.f32 %v5779_v8, %v5780_v36  ;;  %v1553_v39 = vld [vmem:[#allocation3 + $0x8] sm:$0xff]  ;;  %v5782_v16 = vld [vmem:[#allocation102_spill] sm:$0xff]  ;;  %v1558_v36 = vld [vmem:[#allocation3 + $0x30] sm:$0xff] }
 0x32d   : > { %v3251_v21 = vpop.eup %3250  ;;  %3274 = vpow2.f32 %v1965_v33  ;;  %2077 = vadd.xlane.f32.xlu0 %v1975_v32  ;;  %2079 = vadd.xlane.f32.xlu1 %v1976_v17  ;;  %v5783_v47 = vld [vmem:[#allocation104_spill] sm:$0xff]  ;;  %v5799_v53 = vsub.f32 %v5797_v2, %v5798_v30  ;;  %v5800_v34 = vld [vmem:[#allocation114_spill] sm:$0xff] }
 0x32e   : > { %v3253_v35 = vpop.eup %3252  ;;  %3276 = vpow2.f32 %v1584_v5  ;;  %v1592_v59 = vmul.f32 1.442695, %v5778_v63  ;;  %v1594_v46 = vmul.f32 1.442695, %v5781_v19  ;;  %v5784_v33 = vsub.f32 %v5782_v16, %v5783_v47  ;;  %v5794_v5 = vld [vmem:[#allocation110_spill] sm:$0xff]  ;;  %v1557_v0 = vld [vmem:[#allocation3 + $0x28] sm:$0xff] }
 0x32f   : > { %v1977_v42 = vadd.f32 %v3253_v35, %v3251_v21  ;;  %v3255_v51 = vpop.eup %3254  ;;  %3278 = vpow2.f32 %v1586_v43  ;;  %v1554_v21 = vld [vmem:[#allocation3 + $0x10] sm:$0xff]  ;;  %v5796_v54 = vsub.f32 %v5794_v5, %v5795_v22  ;;  %v5801_v38 = vld [vmem:[#allocation116_spill] sm:$0xff]  ;;  %v1559_v47 = vld [vmem:[#allocation3 + $0x38] sm:$0xff] }
 0x330   : > { %v1980_v50 = vadd.f32 %v3255_v51, %v3249_v4  ;;  %3280 = vpow2.f32 %v1588_v45  ;;  %v1596_v49 = vmul.f32 1.442695, %v5784_v33  ;;  %v5802_v63 = vsub.f32 %v5800_v34, %v5801_v38  ;;  %v5817_v22 = vld [vmem:[#allocation124_spill] sm:$0xff]  ;;  %v1564_v34 = vld [vmem:[#allocation3 + $0x60] sm:$0xff] }
 0x331   : > { %v3257_v31 = vpop.eup %3256  ;;  %2081 = vadd.xlane.f32.xlu0 %v1977_v42  ;;  %2083 = vadd.xlane.f32.xlu1 %v1978_v11  ;;  %3282 = vpow2.f32 %v1590_v62  ;;  %v5785_v42 = vld [vmem:[#allocation101_spill] sm:$0xff]  ;;  %v5786_v11 = vld [vmem:[#allocation103_spill] sm:$0xff]  ;;  %v1604_v29 = vmul.f32 1.442695, %v5796_v54  ;;  %v1606_v62 = vmul.f32 1.442695, %v5799_v53  ;;  %v5818_v54 = vsub.f32 %v5817_v22, %v4883_v60 }
 0x332   : > { %v3259_v44 = vpop.eup %3258  ;;  %3284 = vpow2.f32 %v1592_v59  ;;  %v5787_v51 = vsub.f32 %v5785_v42, %v5786_v11  ;;  %v1608_v59 = vmul.f32 1.442695, %v5802_v63  ;;  %v5822_v63 = vld [vmem:[#allocation125_spill] sm:$0xff] }
 0x333   : > { %v3261_v61 = vpop.eup %3260  ;;  %v1979_v27 = vadd.f32 %v3259_v44, %v3257_v31  ;;  %3286 = vpow2.f32 %v1594_v46  ;;  %v5803_v46 = vld [vmem:[#allocation113_spill] sm:$0xff]  ;;  %v5823_v60 = vsub.f32 %v5822_v63, %v4886_v37 }
 0x334   : > { %v3263_v1 = vpop.eup %3262  ;;  %v1598_v31 = vmul.f32 1.442695, %v5787_v51  ;;  %3288 = vpow2.f32 %v1596_v49  ;;  %v5806_v49 = vld [vmem:[#allocation117_spill] sm:$0xff] }
 0x335   : > { %v3265_v3 = vpop.eup %3264  ;;  %2085 = vadd.xlane.f32.xlu0 %v1979_v27  ;;  %2087 = vadd.xlane.f32.xlu1 %v1980_v50  ;;  %v1982_v52 = vadd.f32 %v3263_v1, %v3261_v61  ;;  %v1555_v50 = vld [vmem:[#allocation3 + $0x18] sm:$0xff]  ;;  %v5843_v63 = vld [vmem:[#allocation137_spill] sm:$0xff] }
 0x336   : > { %v3267_v13 = vpop.eup %3266  ;;  %3290 = vpow2.f32 %v1598_v31 }
 0x337   : > { %v3269_v48 = vpop.eup %3268  ;;  %v1981_v26 = vadd.f32 %v3267_v13, %v3265_v3  ;;  %v5788_v3 = vld [vmem:[#allocation105_spill] sm:$0xff]  ;;  %v5789_v13 = vld [vmem:[#allocation107_spill] sm:$0xff] }
 0x338   : > { %v3271_v12 = vpop.eup %3270 }
 0x339   : > { %v3273_v55 = vpop.eup %3272  ;;  %2089 = vadd.xlane.f32.xlu0 %v1981_v26  ;;  %2091 = vadd.xlane.f32.xlu1 %v1982_v52  ;;  %v1984_v18 = vadd.f32 %v3271_v12, %v3269_v48  ;;  %v5790_v48 = vsub.f32 %v5788_v3, %v5789_v13  ;;  %v5791_v52 = vld [vmem:[#allocation106_spill] sm:$0xff]  ;;  %v5792_v12 = vld [vmem:[#allocation108_spill] sm:$0xff] }
 0x33a   : > { %v3275_v14 = vpop.eup %3274  ;;  %v5812_v3 = vld [vmem:[#allocation122_spill] sm:$0xff] }
 0x33b   : > { %v1983_v28 = vadd.f32 %v3275_v14, %v3273_v55  ;;  %v3277_v6 = vpop.eup %3276  ;;  %v1602_v26 = vmul.f32 1.442695, %v5790_v48  ;;  %v5793_v55 = vsub.f32 %v5791_v52, %v5792_v12  ;;  %v5815_v52 = vld [vmem:[#allocation123_spill] sm:$0xff] }
 0x33c   : > { %v1616_v20 = vmul.f32 %v3277_v6, %v1552_v23  ;;  %v3279_v15 = vpop.eup %3278 }
 0x33d   : > { %2093 = vadd.xlane.f32.xlu0 %v1983_v28  ;;  %2095 = vadd.xlane.f32.xlu1 %v1984_v18  ;;  %v1617_v32 = vmul.f32 %v3279_v15, %v1553_v39  ;;  %v3281_v17 = vpop.eup %3280  ;;  %v1600_v14 = vmul.f32 1.442695, %v5793_v55  ;;  %3292 = vpow2.f32 %v1602_v26  ;;  %v5814_v26 = vld [vmem:[#allocation121_spill] sm:$0xff] }
 0x33e   : > { %v1618_v44 = vmul.f32 %v3281_v17, %v1554_v21  ;;  %v3283_v61 = vpop.eup %3282  ;;  %v5816_v12 = vsub.f32 %v5814_v26, %v5815_v52 }
 0x33f   : > { %v1619_v28 = vmul.f32 %v3283_v61, %v1555_v50  ;;  %v3285_v18 = vpop.eup %3284  ;;  %3294 = vpow2.f32 %v1600_v14  ;;  %v1561_v61 = vld [vmem:[#allocation3 + $0x48] sm:$0xff] }
 0x340   : > { %v1620_v43 = vmul.f32 %v3285_v18, %v1556_v57  ;;  %v3287_v24 = vpop.eup %3286  ;;  %3296 = vpow2.f32 %v1604_v29  ;;  %v2017_v55 = vmul.f32 1.442695, %v5816_v12  ;;  %v1562_v57 = vld [vmem:[#allocation3 + $0x50] sm:$0xff]  ;;  %v2021_v29 = vmul.f32 1.442695, %v5818_v54  ;;  %v5840_v54 = vld [vmem:[#allocation140_spill] sm:$0xff] }
 0x341   : > { %v1621_v6 = vmul.f32 %v3287_v24, %v1557_v0  ;;  %v3289_v23 = vpop.eup %3288  ;;  %3298 = vpow2.f32 %v1606_v62  ;;  %v5819_v24 = vld [vmem:[#allocation126_spill] sm:$0xff] }
 0x342   : > { %3300 = vpow2.f32 %v1608_v59  ;;  %v1622_v39 = vmul.f32 %v3289_v23, %v1558_v36  ;;  %v1563_v62 = vld [vmem:[#allocation3 + $0x58] sm:$0xff]  ;;  %v2025_v59 = vmul.f32 1.442695, %v5823_v60  ;;  %v5825_v23 = vld [vmem:[#allocation131_spill] sm:$0xff] }
 0x343   : > { %v5844_v60 = vld [vmem:[#allocation139_spill] sm:$0xff] }
 0x376   : > { %v1633_v58 = vpop.xlane.xlu1 %1632 }
 0x377   : > { %v1664_v25 = vadd.f32 %v1633_v58, %v1616_v20  ;;  %v5804_v20 = vld [vmem:[#allocation115_spill] sm:$0xff] }
 0x378   : > { %v5805_v15 = vsub.f32 %v5803_v46, %v5804_v20 }
 0x379   : > { %1681 = vst.msk [vmem:[#allocation3] sm:$0xff] %vm1680_vm2, %v1664_v25  ;;  %v3291_v25 = vpop.eup %3290 }
 0x37a   : > { %v1635_v4 = vpop.xlane.xlu0 %1634  ;;  %v1610_v58 = vmul.f32 1.442695, %v5805_v15  ;;  %v3293_v21 = vpop.eup %3292  ;;  %v1623_v51 = vmul.f32 %v3291_v25, %v1559_v47  ;;  %v5827_v47 = vld [vmem:[#allocation127_spill] sm:$0xff] }
 0x37b   : > { %v1665_v35 = vadd.f32 %v1635_v4, %v1617_v32  ;;  %v5807_v32 = vld [vmem:[#allocation119_spill] sm:$0xff]  ;;  %v3295_v31 = vpop.eup %3294  ;;  %v5828_v37 = vsub.f32 %v5827_v47, %v4905_v7 }
 0x37c   : > { %v5808_v17 = vsub.f32 %v5806_v49, %v5807_v32  ;;  %3302 = vpow2.f32 %v1610_v58  ;;  %v5829_v32 = vld [vmem:[#allocation132_spill] sm:$0xff]  ;;  %v1989_v47 = vld [vmem:[#allocation5 + $0x20] sm:$0xff] }
 0x37d   : > { %1682 = vst.msk [vmem:[#allocation3 + $0x8] sm:$0xff] %vm1680_vm2, %v1665_v35  ;;  %v5809_v35 = vld [vmem:[#allocation118_spill] sm:$0xff] }
 0x37e   : > { %v1637_v27 = vpop.xlane.xlu0 %1636  ;;  %v1614_v4 = vmul.f32 1.442695, %v5808_v17  ;;  %v5810_v42 = vsub.f32 %v5809_v35, %v4846_v41  ;;  %v1625_v41 = vmul.f32 %v3293_v21, %v1561_v61  ;;  %v5830_v17 = vld [vmem:[#allocation134_spill] sm:$0xff] }
 0x37f   : > { %v1666_v1 = vadd.f32 %v1637_v27, %v1618_v44  ;;  %v1560_v27 = vld [vmem:[#allocation3 + $0x40] sm:$0xff]  ;;  %v5832_v61 = vld [vmem:[#allocation130_spill] sm:$0xff] }
 0x380   : > { %v1612_v11 = vmul.f32 1.442695, %v5810_v42  ;;  %3304 = vpow2.f32 %v1614_v4  ;;  %v1624_v14 = vmul.f32 %v3295_v31, %v1560_v27  ;;  %v5831_v4 = vsub.f32 %v5829_v32, %v5830_v17  ;;  %v1566_v31 = vld [vmem:[#allocation3 + $0x70] sm:$0xff]  ;;  %v5850_v32 = vld [vmem:[#allocation143_spill] sm:$0xff] }
 0x381   : > { %1683 = vst.msk [vmem:[#allocation3 + $0x10] sm:$0xff] %vm1680_vm2, %v1666_v1  ;;  %v5811_v1 = vld [vmem:[#allocation120_spill] sm:$0xff]  ;;  %v5833_v7 = vsub.f32 %v5832_v61, %v4925_v56  ;;  %v5837_v56 = vld [vmem:[#allocation133_spill] sm:$0xff] }
 0x382   : > { %v1639_v40 = vpop.xlane.xlu1 %1638  ;;  %v5813_v13 = vsub.f32 %v5811_v1, %v5812_v3  ;;  %3306 = vpow2.f32 %v1612_v11  ;;  %v2031_v21 = vmul.f32 1.442695, %v5831_v4  ;;  %v5834_v1 = vld [vmem:[#allocation136_spill] sm:$0xff]  ;;  %v5835_v3 = vld [vmem:[#allocation138_spill] sm:$0xff] }
 0x383   : > { %v1667_v10 = vadd.f32 %v1639_v40, %v1619_v28  ;;  %v3297_v28 = vpop.eup %3296  ;;  %v2033_v27 = vmul.f32 1.442695, %v5833_v7 }
 0x384   : > { %v2019_v48 = vmul.f32 1.442695, %v5813_v13  ;;  %v1626_v2 = vmul.f32 %v3297_v28, %v1562_v57  ;;  %v5836_v13 = vsub.f32 %v5834_v1, %v5835_v3  ;;  %v1985_v28 = vld [vmem:[#allocation5] sm:$0xff]  ;;  %v1991_v1 = vld [vmem:[#allocation5 + $0x30] sm:$0xff] }
 0x385   : > { %1684 = vst.msk [vmem:[#allocation3 + $0x18] sm:$0xff] %vm1680_vm2, %v1667_v10  ;;  %v5838_v57 = vld [vmem:[#allocation135_spill] sm:$0xff] }
 0x386   : > { %v1641_v9 = vpop.xlane.xlu0 %1640  ;;  %3308 = vpow2.f32 %v2019_v48  ;;  %v2035_v48 = vmul.f32 1.442695, %v5836_v13 }
 0x387   : > { %v1668_v45 = vadd.f32 %v1641_v9, %v1620_v43  ;;  %v3299_v43 = vpop.eup %3298  ;;  %3310 = vpow2.f32 %v2017_v55  ;;  %v5820_v9 = vld [vmem:[#allocation128_spill] sm:$0xff] }
 0x388   : > { %v5821_v0 = vsub.f32 %v5819_v24, %v5820_v9  ;;  %v3301_v30 = vpop.eup %3300  ;;  %3312 = vpow2.f32 %v2021_v29  ;;  %v5841_v29 = vld [vmem:[#allocation142_spill] sm:$0xff] }
 0x389   : > { %1685 = vst.msk [vmem:[#allocation3 + $0x20] sm:$0xff] %vm1680_vm2, %v1668_v45  ;;  %v1628_v46 = vmul.f32 %v3301_v30, %v1564_v34  ;;  %v3303_v20 = vpop.eup %3302 }
 0x38a   : > { %v1643_v8 = vpop.xlane.xlu1 %1642  ;;  %v2023_v45 = vmul.f32 1.442695, %v5821_v0 }
 0x38b   : > { %v1669_v19 = vadd.f32 %v1643_v8, %v1621_v6  ;;  %v5824_v6 = vld [vmem:[#allocation129_spill] sm:$0xff] }
 0x38c   : > { %3314 = vpow2.f32 %v2023_v45  ;;  %v5826_v8 = vsub.f32 %v5824_v6, %v5825_v23 }
 0x38d   : > { %1686 = vst.msk [vmem:[#allocation3 + $0x28] sm:$0xff] %vm1680_vm2, %v1669_v19  ;;  %v1627_v19 = vmul.f32 %v3299_v43, %v1563_v62  ;;  %3316 = vpow2.f32 %v2025_v59  ;;  %v3305_v49 = vpop.eup %3304  ;;  %v5842_v43 = vsub.f32 %v5840_v54, %v5841_v29  ;;  %v1987_v62 = vld [vmem:[#allocation5 + $0x10] sm:$0xff]  ;;  %v5845_v59 = vsub.f32 %v5843_v63, %v5844_v60  ;;  %v1996_v29 = vld [vmem:[#allocation5 + $0x58] sm:$0xff] }
 0x38e   : > { %v1645_v16 = vpop.xlane.xlu0 %1644  ;;  %v2027_v36 = vmul.f32 1.442695, %v5826_v8  ;;  %v5846_v8 = vld [vmem:[#allocation144_spill] sm:$0xff] }
 0x38f   : > { %v1670_v33 = vadd.f32 %v1645_v16, %v1622_v39  ;;  %v1565_v39 = vld [vmem:[#allocation3 + $0x68] sm:$0xff]  ;;  %v3307_v42 = vpop.eup %3306  ;;  %v2039_v24 = vmul.f32 1.442695, %v5842_v43  ;;  %v2041_v6 = vmul.f32 1.442695, %v5845_v59  ;;  %v1995_v43 = vld [vmem:[#allocation5 + $0x50] sm:$0xff] }
 0x390   : > { %3318 = vpow2.f32 %v2027_v36  ;;  %v1629_v35 = vmul.f32 %v3303_v20, %v1565_v39  ;;  %v1630_v52 = vmul.f32 %v3307_v42, %v1566_v31  ;;  %v5847_v36 = vld [vmem:[#allocation145_spill] sm:$0xff]  ;;  %v5853_v42 = vld [vmem:[#allocation147_spill] sm:$0xff] }
 0x391   : > { %1687 = vst.msk [vmem:[#allocation3 + $0x30] sm:$0xff] %vm1680_vm2, %v1670_v33  ;;  %v2029_v33 = vmul.f32 1.442695, %v5828_v37 }
 0x392   : > { %v1647_v44 = vpop.xlane.xlu1 %1646 }
 0x393   : > { %v1671_v50 = vadd.f32 %v1647_v44, %v1623_v51  ;;  %v1567_v51 = vld [vmem:[#allocation3 + $0x78] sm:$0xff]  ;;  %3320 = vpow2.f32 %v2029_v33 }
 0x394   : > { %3322 = vpow2.f32 %v2031_v21  ;;  %v1631_v26 = vmul.f32 %v3305_v49, %v1567_v51  ;;  %v5849_v49 = vld [vmem:[#allocation141_spill] sm:$0xff] }
 0x395   : > { %1688 = vst.msk [vmem:[#allocation3 + $0x38] sm:$0xff] %vm1680_vm2, %v1671_v50  ;;  %v3309_v50 = vpop.eup %3308  ;;  %3324 = vpow2.f32 %v2033_v27  ;;  %v5851_v17 = vsub.f32 %v5849_v49, %v5850_v32 }
 0x396   : > { %v1651_v18 = vpop.xlane.xlu1 %1650  ;;  %v1649_v40 = vpop.xlane.xlu0 %1648  ;;  %3326 = vpow2.f32 %v2035_v48 }
 0x397   : > { %v1673_v10 = vadd.f32 %v1651_v18, %v1625_v41  ;;  %v1672_v5 = vadd.f32 %v1649_v40, %v1624_v14  ;;  %v3311_v12 = vpop.eup %3310  ;;  %v1986_v14 = vld [vmem:[#allocation5 + $0x8] sm:$0xff]  ;;  %v2045_v4 = vmul.f32 1.442695, %v5851_v17 }
 0x398   : > { %v3313_v22 = vpop.eup %3312  ;;  %v2050_v9 = vmul.f32 %v3309_v50, %v1986_v14  ;;  %v2049_v0 = vmul.f32 %v3311_v12, %v1985_v28  ;;  %v1992_v50 = vld [vmem:[#allocation5 + $0x38] sm:$0xff]  ;;  %v1994_v14 = vld [vmem:[#allocation5 + $0x48] sm:$0xff]  ;;  %v1993_v28 = vld [vmem:[#allocation5 + $0x40] sm:$0xff] }
 0x399   : > { %1690 = vst.msk [vmem:[#allocation3 + $0x48] sm:$0xff] %vm1680_vm2, %v1673_v10  ;;  %1689 = vst.msk [vmem:[#allocation3 + $0x40] sm:$0xff] %vm1680_vm2, %v1672_v5  ;;  %v5839_v10 = vsub.f32 %v5837_v56, %v5838_v57  ;;  %v3315_v45 = vpop.eup %3314 }
 0x39a   : > { %v1653_v53 = vpop.xlane.xlu0 %1652  ;;  %v3317_v23 = vpop.eup %3316 }
 0x39b   : > { %v1674_v38 = vadd.f32 %v1653_v53, %v1626_v2  ;;  %v2037_v5 = vmul.f32 1.442695, %v5839_v10  ;;  %v1988_v53 = vld [vmem:[#allocation5 + $0x18] sm:$0xff] }
 0x39c   : > { %v2052_v20 = vmul.f32 %v3315_v45, %v1988_v53 }
 0x39d   : > { %1691 = vst.msk [vmem:[#allocation3 + $0x50] sm:$0xff] %vm1680_vm2, %v1674_v38  ;;  %3328 = vpow2.f32 %v2037_v5 }
 0x39e   : > { %v1655_v15 = vpop.xlane.xlu1 %1654  ;;  %v1657_v58 = vpop.xlane.xlu0 %1656  ;;  %3330 = vpow2.f32 %v2039_v24 }
 0x39f   : > { %v1675_v25 = vadd.f32 %v1655_v15, %v1627_v19  ;;  %v1676_v16 = vadd.f32 %v1657_v58, %v1628_v46  ;;  %v5848_v19 = vsub.f32 %v5846_v8, %v5847_v36  ;;  %v2051_v15 = vmul.f32 %v3313_v22, %v1987_v62  ;;  %v3319_v58 = vpop.eup %3318 }
 0x3a0   : > { %3332 = vpow2.f32 %v2041_v6  ;;  %v3321_v21 = vpop.eup %3320 }
 0x3a1   : > { %1692 = vst.msk [vmem:[#allocation3 + $0x58] sm:$0xff] %vm1680_vm2, %v1675_v25  ;;  %1693 = vst.msk [vmem:[#allocation3 + $0x60] sm:$0xff] %vm1680_vm2, %v1676_v16  ;;  %v2043_v46 = vmul.f32 1.442695, %v5848_v19  ;;  %v1990_v16 = vld [vmem:[#allocation5 + $0x28] sm:$0xff]  ;;  %v3323_v61 = vpop.eup %3322 }
 0x3a2   : > { %v1659_v11 = vpop.xlane.xlu1 %1658  ;;  %v2054_v31 = vmul.f32 %v3319_v58, %v1990_v16  ;;  %v3325_v48 = vpop.eup %3324 }
 0x3a3   : > { %v1677_v44 = vadd.f32 %v1659_v11, %v1629_v35  ;;  %3334 = vpow2.f32 %v2043_v46  ;;  %v5852_v35 = vld [vmem:[#allocation146_spill] sm:$0xff]  ;;  %v3327_v12 = vpop.eup %3326  ;;  %v2057_v10 = vmul.f32 %v3325_v48, %v1993_v28 }
 0x3a4   : > { %v5854_v11 = vsub.f32 %v5852_v35, %v5853_v42  ;;  %3336 = vpow2.f32 %v2045_v4  ;;  %v2058_v57 = vmul.f32 %v3327_v12, %v1994_v14  ;;  %v2000_v46 = vld [vmem:[#allocation5 + $0x78] sm:$0xff] }
 0x3a5   : > { %1694 = vst.msk [vmem:[#allocation3 + $0x68] sm:$0xff] %vm1680_vm2, %v1677_v44  ;;  %v2053_v44 = vmul.f32 %v3317_v23, %v1989_v47 }
 0x3a6   : > { %v1663_v55 = vpop.xlane.xlu1 %1662  ;;  %v1661_v41 = vpop.xlane.xlu0 %1660  ;;  %v2047_v51 = vmul.f32 1.442695, %v5854_v11 }
 0x3a7   : > { %v1679_v18 = vadd.f32 %v1663_v55, %v1631_v26  ;;  %v1678_v40 = vadd.f32 %v1661_v41, %v1630_v52  ;;  %v2056_v26 = vmul.f32 %v3323_v61, %v1992_v50  ;;  %v2055_v52 = vmul.f32 %v3321_v21, %v1991_v1 }
 0x3a8   : > { %3338 = vpow2.f32 %v2047_v51 }
 0x3a9   : > { %1696 = vst.msk [vmem:[#allocation3 + $0x78] sm:$0xff] %vm1680_vm2, %v1679_v18  ;;  %1695 = vst.msk [vmem:[#allocation3 + $0x70] sm:$0xff] %vm1680_vm2, %v1678_v40 }
 0x3aa   : > { %v2068_v2 = vpop.xlane.xlu1 %2067  ;;  %v2066_v30 = vpop.xlane.xlu0 %2065 }
 0x3ab   : > { %v2098_v34 = vadd.f32 %v2068_v2, %v2050_v9  ;;  %v2097_v38 = vadd.f32 %v2066_v30, %v2049_v0  ;;  %v3329_v56 = vpop.eup %3328 }
 0x3ac   : > { %v3331_v5 = vpop.eup %3330  ;;  %v2059_v2 = vmul.f32 %v3329_v56, %v1995_v43 }
 0x3ad   : > { %2114 = vst.msk [vmem:[#allocation5 + $0x8] sm:$0xff] %vm1680_vm2, %v2098_v34  ;;  %2113 = vst.msk [vmem:[#allocation5] sm:$0xff] %vm1680_vm2, %v2097_v38  ;;  %v3333_v0 = vpop.eup %3332  ;;  %v2060_v45 = vmul.f32 %v3331_v5, %v1996_v29  ;;  %v1998_v34 = vld [vmem:[#allocation5 + $0x68] sm:$0xff]  ;;  %v1997_v38 = vld [vmem:[#allocation5 + $0x60] sm:$0xff] }
 0x3ae   : > { %v2072_v39 = vpop.xlane.xlu1 %2071  ;;  %v2070_v25 = vpop.xlane.xlu0 %2069  ;;  %v2061_v23 = vmul.f32 %v3333_v0, %v1997_v38 }
 0x3af   : > { %v2100_v37 = vadd.f32 %v2072_v39, %v2052_v20  ;;  %v2099_v33 = vadd.f32 %v2070_v25, %v2051_v15  ;;  %v1999_v20 = vld [vmem:[#allocation5 + $0x70] sm:$0xff] }
 0x3b0   : > { %v3335_v30 = vpop.eup %3334 }
 0x3b1   : > { %2116 = vst.msk [vmem:[#allocation5 + $0x18] sm:$0xff] %vm1680_vm2, %v2100_v37  ;;  %2115 = vst.msk [vmem:[#allocation5 + $0x10] sm:$0xff] %vm1680_vm2, %v2099_v33  ;;  %v3337_v59 = vpop.eup %3336  ;;  %v2062_v6 = vmul.f32 %v3335_v30, %v1998_v34 }
 0x3b2   : > { %v2076_v7 = vpop.xlane.xlu1 %2075  ;;  %v2074_v27 = vpop.xlane.xlu0 %2073  ;;  %v2063_v25 = vmul.f32 %v3337_v59, %v1999_v20 }
 0x3b3   : > { %v2102_v3 = vadd.f32 %v2076_v7, %v2054_v31  ;;  %v2101_v13 = vadd.f32 %v2074_v27, %v2053_v44 }
 0x3b5   : > { %2118 = vst.msk [vmem:[#allocation5 + $0x28] sm:$0xff] %vm1680_vm2, %v2102_v3  ;;  %2117 = vst.msk [vmem:[#allocation5 + $0x20] sm:$0xff] %vm1680_vm2, %v2101_v13  ;;  %v3339_v8 = vpop.eup %3338 }
 0x3b6   : > { %v2080_v55 = vpop.xlane.xlu1 %2079  ;;  %v2078_v41 = vpop.xlane.xlu0 %2077  ;;  %v2064_v39 = vmul.f32 %v3339_v8, %v2000_v46 }
 0x3b7   : > { %v2104_v18 = vadd.f32 %v2080_v55, %v2056_v26  ;;  %v2103_v40 = vadd.f32 %v2078_v41, %v2055_v52 }
 0x3b9   : > { %2120 = vst.msk [vmem:[#allocation5 + $0x38] sm:$0xff] %vm1680_vm2, %v2104_v18  ;;  %2119 = vst.msk [vmem:[#allocation5 + $0x30] sm:$0xff] %vm1680_vm2, %v2103_v40 }
 0x3ba   : > { %v2084_v22 = vpop.xlane.xlu1 %2083  ;;  %v2082_v54 = vpop.xlane.xlu0 %2081 }
 0x3bb   : > { %v2106_v24 = vadd.f32 %v2084_v22, %v2058_v57  ;;  %v2105_v9 = vadd.f32 %v2082_v54, %v2057_v10 }
 0x3bd   : > { %2122 = vst.msk [vmem:[#allocation5 + $0x48] sm:$0xff] %vm1680_vm2, %v2106_v24  ;;  %2121 = vst.msk [vmem:[#allocation5 + $0x40] sm:$0xff] %vm1680_vm2, %v2105_v9 }
 0x3be   : > { %v2088_v53 = vpop.xlane.xlu1 %2087  ;;  %v2086_v62 = vpop.xlane.xlu0 %2085 }
 0x3bf   : > { %v2108_v63 = vadd.f32 %v2088_v53, %v2060_v45  ;;  %v2107_v60 = vadd.f32 %v2086_v62, %v2059_v2 }
 0x3c1   : > { %2124 = vst.msk [vmem:[#allocation5 + $0x58] sm:$0xff] %vm1680_vm2, %v2108_v63  ;;  %2123 = vst.msk [vmem:[#allocation5 + $0x50] sm:$0xff] %vm1680_vm2, %v2107_v60 }
 0x3c2   : > { %v2092_v36 = vpop.xlane.xlu1 %2091  ;;  %v2090_v19 = vpop.xlane.xlu0 %2089 }
 0x3c3   : > { %v2110_v15 = vadd.f32 %v2092_v36, %v2062_v6  ;;  %v2109_v58 = vadd.f32 %v2090_v19, %v2061_v23 }
 0x3c5   : > { %2126 = vst.msk [vmem:[#allocation5 + $0x68] sm:$0xff] %vm1680_vm2, %v2110_v15  ;;  %2125 = vst.msk [vmem:[#allocation5 + $0x60] sm:$0xff] %vm1680_vm2, %v2109_v58  ;;  %2148 = sbr.rel (%p2671_p5) target bundleno = 1146 (0x47a), region = 60 }
 0x3c6   : > { %v2096_v16 = vpop.xlane.xlu1 %2095  ;;  %v2094_v47 = vpop.xlane.xlu0 %2093 }
 0x3c7   : > { %v2112_v37 = vadd.f32 %v2096_v16, %v2064_v39  ;;  %v2111_v33 = vadd.f32 %v2094_v47, %v2063_v25 }
 0x3c9   : > { %2128 = vst.msk [vmem:[#allocation5 + $0x78] sm:$0xff] %vm1680_vm2, %v2112_v37  ;;  %2127 = vst.msk [vmem:[#allocation5 + $0x70] sm:$0xff] %vm1680_vm2, %v2111_v33 }
 0x3ca   : > { %v5856_v49 = vld [vmem:[#allocation27_spill] sm:$0xff]  ;;  %v5857_v32 = vld [vmem:[#allocation28_spill] sm:$0xff]  ;;  %v5860_v42 = vld [vmem:[#allocation29_spill] sm:$0xff] }
 0x3cb   : > { %v2311_v17 = vmul.f32 %v5857_v32, %v5856_v49  ;;  %v5858_v4 = vld [vmem:[#allocation23_spill] sm:$0xff]  ;;  %v5859_v21 = vld [vmem:[#allocation24_spill] sm:$0xff]  ;;  %v5861_v11 = vld [vmem:[#allocation30_spill] sm:$0xff] }
 0x3cc   : > { %v2309_v35 = vmul.f32 %v5859_v21, %v5858_v4  ;;  %v2312_v51 = vmul.f32 %v5861_v11, %v5860_v42  ;;  %v5862_v31 = vld [vmem:[#allocation25_spill] sm:$0xff]  ;;  %v5863_v44 = vld [vmem:[#allocation26_spill] sm:$0xff]  ;;  %v5866_v1 = vld [vmem:[#allocation31_spill] sm:$0xff] }
 0x3cd   : > { %2329 = vadd.xlane.f32.xlu1 %v2311_v17  ;;  %v2310_v61 = vmul.f32 %v5863_v44, %v5862_v31  ;;  %v5864_v7 = vld [vmem:[#allocation33_spill] sm:$0xff]  ;;  %v5865_v27 = vld [vmem:[#allocation34_spill] sm:$0xff]  ;;  %v5867_v3 = vld [vmem:[#allocation32_spill] sm:$0xff] }
 0x3ce   : > { %2325 = vadd.xlane.f32.xlu0 %v2309_v35  ;;  %v2314_v50 = vmul.f32 %v5865_v27, %v5864_v7  ;;  %v2313_v13 = vmul.f32 %v5867_v3, %v5866_v1  ;;  %v5868_v48 = vld [vmem:[#allocation37_spill] sm:$0xff]  ;;  %v5869_v26 = vld [vmem:[#allocation38_spill] sm:$0xff]  ;;  %v5870_v12 = vld [vmem:[#allocation35_spill] sm:$0xff]  ;;  %v5253_v27 = vstv %s2672_s21 }
 0x3cf   : > { %v2316_v52 = vmul.f32 %v5869_v26, %v5868_v48  ;;  %v5871_v55 = vld [vmem:[#allocation36_spill] sm:$0xff]  ;;  %v5872_v14 = vld [vmem:[#allocation41_spill] sm:$0xff]  ;;  %v5873_v28 = vld [vmem:[#allocation42_spill] sm:$0xff] }
 0x3d0   : > { %v2315_v41 = vmul.f32 %v5871_v55, %v5870_v12  ;;  %v2318_v18 = vmul.f32 %v5873_v28, %v5872_v14  ;;  %v5874_v40 = vld [vmem:[#allocation39_spill] sm:$0xff]  ;;  %v5875_v56 = vld [vmem:[#allocation40_spill] sm:$0xff]  ;;  %v5876_v10 = vld [vmem:[#allocation45_spill] sm:$0xff] }
 0x3d1   : > { %2331 = vadd.xlane.f32.xlu1 %v2312_v51  ;;  %v2317_v57 = vmul.f32 %v5875_v56, %v5874_v40  ;;  %v5877_v5 = vld [vmem:[#allocation46_spill] sm:$0xff]  ;;  %v5878_v54 = vld [vmem:[#allocation43_spill] sm:$0xff]  ;;  %v5879_v29 = vld [vmem:[#allocation44_spill] sm:$0xff] }
 0x3d2   : > { %2327 = vadd.xlane.f32.xlu0 %v2310_v61  ;;  %v2320_v22 = vmul.f32 %v5877_v5, %v5876_v10  ;;  %v2319_v43 = vmul.f32 %v5879_v29, %v5878_v54  ;;  %v5880_v24 = vld [vmem:[#allocation49_spill] sm:$0xff]  ;;  %v5881_v9 = vld [vmem:[#allocation50_spill] sm:$0xff]  ;;  %v5882_v45 = vld [vmem:[#allocation47_spill] sm:$0xff] }
 0x3d3   : > { %v2322_v0 = vmul.f32 %v5881_v9, %v5880_v24  ;;  %v5883_v2 = vld [vmem:[#allocation48_spill] sm:$0xff]  ;;  %v5884_v53 = vld [vmem:[#allocation53_spill] sm:$0xff]  ;;  %v5885_v62 = vld [vmem:[#allocation54_spill] sm:$0xff] }
 0x3d4   : > { %v2321_v30 = vmul.f32 %v5883_v2, %v5882_v45  ;;  %v2324_v34 = vmul.f32 %v5885_v62, %v5884_v53  ;;  %v5886_v38 = vld [vmem:[#allocation51_spill] sm:$0xff]  ;;  %v5887_v63 = vld [vmem:[#allocation52_spill] sm:$0xff]  ;;  %v2167_v59 = vld [vmem:[#allocation3 + $0x10] sm:$0xff] }
 0x3d5   : > { %2335 = vadd.xlane.f32.xlu1 %v2314_v50  ;;  %v2323_v60 = vmul.f32 %v5887_v63, %v5886_v38  ;;  %v2247_v6 = vld [vmem:[#allocation5 + $0x10] sm:$0xff]  ;;  %3340 = vlog2.f32 %v2167_v59  ;;  %v2165_v23 = vld [vmem:[#allocation3] sm:$0xff]  ;;  %v2168_v36 = vld [vmem:[#allocation3 + $0x18] sm:$0xff] }
 0x3d6   : > { %2333 = vadd.xlane.f32.xlu0 %v2313_v13  ;;  %3342 = vlog2.f32 %v2247_v6  ;;  %v2245_v8 = vld [vmem:[#allocation5] sm:$0xff]  ;;  %v2248_v19 = vld [vmem:[#allocation5 + $0x18] sm:$0xff]  ;;  %v2166_v46 = vld [vmem:[#allocation3 + $0x8] sm:$0xff] }
 0x3d7   : > { %3344 = vlog2.f32 %v2165_v23  ;;  %v2246_v20 = vld [vmem:[#allocation5 + $0x8] sm:$0xff]  ;;  %v2169_v39 = vld [vmem:[#allocation3 + $0x20] sm:$0xff]  ;;  %v2172_v16 = vld [vmem:[#allocation3 + $0x38] sm:$0xff] }
 0x3d8   : > { %3346 = vlog2.f32 %v2245_v8  ;;  %v2170_v15 = vld [vmem:[#allocation3 + $0x28] sm:$0xff]  ;;  %v2249_v25 = vld [vmem:[#allocation5 + $0x20] sm:$0xff]  ;;  %v2252_v47 = vld [vmem:[#allocation5 + $0x38] sm:$0xff] }
 0x3d9   : > { %2339 = vadd.xlane.f32.xlu1 %v2316_v52  ;;  %3348 = vlog2.f32 %v2168_v36  ;;  %v2250_v58 = vld [vmem:[#allocation5 + $0x28] sm:$0xff]  ;;  %v2171_v33 = vld [vmem:[#allocation3 + $0x30] sm:$0xff]  ;;  %v2173_v50 = vld [vmem:[#allocation3 + $0x40] sm:$0xff] }
 0x3da   : > { %2337 = vadd.xlane.f32.xlu0 %v2315_v41  ;;  %3350 = vlog2.f32 %v2248_v19  ;;  %v2251_v32 = vld [vmem:[#allocation5 + $0x30] sm:$0xff]  ;;  %v2174_v4 = vld [vmem:[#allocation3 + $0x48] sm:$0xff]  ;;  %v2253_v26 = vld [vmem:[#allocation5 + $0x40] sm:$0xff] }
 0x3db   : > { %3352 = vlog2.f32 %v2166_v46  ;;  %v2151_v51 = vld [vmem:[#allocation2 + $0x10] sm:$0xff]  ;;  %v2254_v61 = vld [vmem:[#allocation5 + $0x48] sm:$0xff]  ;;  %v2149_v12 = vld [vmem:[#allocation2] sm:$0xff] }
 0x3dc   : > { %3354 = vlog2.f32 %v2246_v20  ;;  %v2231_v31 = vld [vmem:[#allocation4 + $0x10] sm:$0xff]  ;;  %v5888_v28 = vld [vmem:[#allocation58_spill] sm:$0xff]  ;;  %v2229_v40 = vld [vmem:[#allocation4] sm:$0xff] }
 0x3dd   : > { %2343 = vadd.xlane.f32.xlu1 %v2318_v18  ;;  %3356 = vlog2.f32 %v2170_v15  ;;  %v5257_v18 = vadd.s32 %v5253_v27, %v5888_v28  ;;  %v2152_v56 = vld [vmem:[#allocation2 + $0x18] sm:$0xff]  ;;  %v5890_v29 = vld [vmem:[#allocation57_spill] sm:$0xff]  ;;  %v5891_v9 = vld [vmem:[#allocation56_spill] sm:$0xff] }
 0x3de   : > { %2341 = vadd.xlane.f32.xlu0 %v2317_v57  ;;  %3358 = vlog2.f32 %v2250_v58  ;;  %v2176_v10 = vld [vmem:[#allocation3 + $0x58] sm:$0xff]  ;;  %v2175_v63 = vld [vmem:[#allocation3 + $0x50] sm:$0xff]  ;;  %v2150_v23 = vld [vmem:[#allocation2 + $0x8] sm:$0xff] }
 0x3df   : > { %3360 = vlog2.f32 %v2169_v39  ;;  %v2232_v24 = vld [vmem:[#allocation4 + $0x18] sm:$0xff]  ;;  %v2230_v8 = vld [vmem:[#allocation4 + $0x8] sm:$0xff]  ;;  %v2255_v46 = vld [vmem:[#allocation5 + $0x50] sm:$0xff]  ;;  %vm2457_vm3 = vcmp.lt.s32.totalorder %v5257_v18, 200 }
 0x3e0   : > { %3362 = vlog2.f32 %v2249_v25  ;;  %v2256_v45 = vld [vmem:[#allocation5 + $0x58] sm:$0xff]  ;;  %v5893_v36 = vld [vmem:[#allocation60_spill] sm:$0xff] }
 0x3e1   : > { %2347 = vadd.xlane.f32.xlu1 %v2320_v22  ;;  %3364 = vlog2.f32 %v2172_v16  ;;  %v5889_v22 = vld [vmem:[#allocation55_spill] sm:$0xff]  ;;  %v5277_v19 = vadd.s32 %v5253_v27, %v5893_v36  ;;  %v2154_v25 = vld [vmem:[#allocation2 + $0x28] sm:$0xff]  ;;  %v2179_v36 = vld [vmem:[#allocation3 + $0x70] sm:$0xff] }
 0x3e2   : > { %2345 = vadd.xlane.f32.xlu0 %v2319_v43  ;;  %v3341_v37 = vpop.eup %3340  ;;  %3366 = vlog2.f32 %v2252_v47  ;;  %v5261_v54 = vadd.s32 %v5253_v27, %v5889_v22  ;;  %v5265_v43 = vadd.s32 %v5253_v27, %v5890_v29  ;;  %v2234_v16 = vld [vmem:[#allocation4 + $0x28] sm:$0xff]  ;;  %v2153_v47 = vld [vmem:[#allocation2 + $0x20] sm:$0xff] }
 0x3e3   : > { %v3343_v49 = vpop.eup %3342  ;;  %3368 = vlog2.f32 %v2171_v33  ;;  %v2186_v35 = vmul.f32 0.6931472, %v3341_v37  ;;  %vm2459_vm8 = vcmp.lt.s32.totalorder %v5277_v19, 200 }
 0x3e4   : > { %v3345_v17 = vpop.eup %3344  ;;  %v2266_v42 = vmul.f32 0.6931472, %v3343_v49  ;;  %3370 = vlog2.f32 %v2251_v32  ;;  %vm2455_vm4 = vcmp.lt.s32.totalorder %v5261_v54, 200  ;;  %vm2458_vm5 = vcmp.lt.s32.totalorder %v5265_v43, 200 }
 0x3e5   : > { %2351 = vadd.xlane.f32.xlu1 %v2322_v0  ;;  %v3347_v21 = vpop.eup %3346  ;;  %3372 = vlog2.f32 %v2174_v4  ;;  %v2215_v3 = vadd.f32 %v2186_v35, %v2151_v51  ;;  %v2182_v48 = vmul.f32 0.6931472, %v3345_v17  ;;  %v5269_v0 = vadd.s32 %v5253_v27, %v5891_v9  ;;  %v2235_v9 = vld [vmem:[#allocation4 + $0x30] sm:$0xff] }
 0x3e6   : > { %2349 = vadd.xlane.f32.xlu0 %v2321_v30  ;;  %v3349_v11 = vpop.eup %3348  ;;  %v2295_v13 = vadd.f32 %v2266_v42, %v2231_v31  ;;  %v2262_v55 = vmul.f32 0.6931472, %v3347_v21  ;;  %3374 = vlog2.f32 %v2254_v61  ;;  %v2233_v21 = vld [vmem:[#allocation4 + $0x20] sm:$0xff]  ;;  %v2178_v42 = vld [vmem:[#allocation3 + $0x68] sm:$0xff] }
 0x3e7   : > { %v3351_v44 = vpop.eup %3350  ;;  %v2188_v41 = vmul.f32 0.6931472, %v3349_v11  ;;  %3376 = vlog2.f32 %v2173_v50  ;;  %v2375_v30 = vmul.f32 0.5, %v2215_v3  ;;  %v2213_v62 = vadd.f32 %v2182_v48, %v2149_v12  ;;  %v2258_v11 = vld [vmem:[#allocation5 + $0x68] sm:$0xff]  ;;  %v2177_v12 = vld [vmem:[#allocation3 + $0x60] sm:$0xff] }
 0x3e8   : > { %v3353_v7 = vpop.eup %3352  ;;  %v2268_v57 = vmul.f32 0.6931472, %v3351_v44  ;;  %3378 = vlog2.f32 %v2253_v26  ;;  %v2391_v53 = vmul.f32 0.5, %v2295_v13  ;;  %v2293_v59 = vadd.f32 %v2262_v55, %v2229_v40  ;;  %v5894_v13 = vld [vmem:[#allocation61_spill] sm:$0xff]  ;;  %v2156_v26 = vld [vmem:[#allocation2 + $0x38] sm:$0xff]  ;;  %v2257_v40 = vld [vmem:[#allocation5 + $0x60] sm:$0xff] }
 0x3e9   : > { %2355 = vadd.xlane.f32.xlu1 %v2324_v34  ;;  %v3355_v1 = vpop.eup %3354  ;;  %v5892_v34 = vld [vmem:[#allocation59_spill] sm:$0xff]  ;;  %v2216_v6 = vadd.f32 %v2188_v41, %v2152_v56  ;;  %3380 = vlog2.f32 %v2176_v10  ;;  %v2184_v58 = vmul.f32 0.6931472, %v3353_v7  ;;  %v2373_v4 = vmul.f32 0.5, %v2213_v62 }
 0x3ea   : > { %2353 = vadd.xlane.f32.xlu0 %v2323_v60  ;;  %v3357_v52 = vpop.eup %3356  ;;  %v5273_v38 = vadd.s32 %v5253_v27, %v5892_v34  ;;  %v2296_v15 = vadd.f32 %v2268_v57, %v2232_v24  ;;  %v2264_v39 = vmul.f32 0.6931472, %v3355_v1  ;;  %3382 = vlog2.f32 %v2256_v45  ;;  %v2155_v24 = vld [vmem:[#allocation2 + $0x30] sm:$0xff]  ;;  %v2180_v45 = vld [vmem:[#allocation3 + $0x78] sm:$0xff] }
 0x3eb   : > { %v3359_v14 = vpop.eup %3358  ;;  %v2192_v37 = vmul.f32 0.6931472, %v3357_v52  ;;  %3384 = vlog2.f32 %v2175_v63  ;;  %v5279_v17 = vadd.f32 %v2391_v53, %v2375_v30  ;;  %v2389_v31 = vmul.f32 0.5, %v2293_v59  ;;  %v2236_v52 = vld [vmem:[#allocation4 + $0x38] sm:$0xff] }
 0x3ec   : > { %v3361_v5 = vpop.eup %3360  ;;  %v2272_v33 = vmul.f32 0.6931472, %v3359_v14  ;;  %3386 = vlog2.f32 %v2255_v46  ;;  %v2376_v44 = vmul.f32 0.5, %v2216_v6  ;;  %v2392_v50 = vmul.f32 0.5, %v2296_v15  ;;  %v2260_v34 = vld [vmem:[#allocation5 + $0x78] sm:$0xff] }
 0x3ed   : > { %v3363_v2 = vpop.eup %3362  ;;  %v2190_v49 = vmul.f32 0.6931472, %v3361_v5  ;;  %v2214_v1 = vadd.f32 %v2184_v58, %v2150_v23  ;;  %v2294_v3 = vadd.f32 %v2264_v39, %v2230_v8  ;;  %v5283_v48 = vadd.s32 %v5253_v27, %v5894_v13  ;;  %v2158_v8 = vld [vmem:[#allocation2 + $0x48] sm:$0xff]  ;;  %v2259_v39 = vld [vmem:[#allocation5 + $0x70] sm:$0xff]  ;;  %v5896_v13 = vld [vmem:[#allocation63_spill] sm:$0xff] }
 0x3ee   : > { %v3365_v60 = vpop.eup %3364  ;;  %v2270_v35 = vmul.f32 0.6931472, %v3363_v2  ;;  %v2218_v41 = vadd.f32 %v2192_v37, %v2154_v25  ;;  %v2298_v14 = vadd.f32 %v2272_v33, %v2234_v16  ;;  %3388 = vlog2.f32 %v2178_v42 }
 0x3ef   : > { %v3367_v20 = vpop.eup %3366  ;;  %v2196_v61 = vmul.f32 0.6931472, %v3365_v60  ;;  %v2217_v28 = vadd.f32 %v2190_v49, %v2153_v47  ;;  %3390 = vlog2.f32 %v2258_v11  ;;  %v5285_v5 = vadd.f32 %v2389_v31, %v2373_v4  ;;  %v5895_v47 = vld [vmem:[#allocation62_spill] sm:$0xff]  ;;  %v2238_v11 = vld [vmem:[#allocation4 + $0x48] sm:$0xff] }
 0x3f0   : > { %v3369_v32 = vpop.eup %3368  ;;  %v2276_v7 = vmul.f32 0.6931472, %v3367_v20  ;;  %v2297_v56 = vadd.f32 %v2270_v35, %v2233_v21  ;;  %3392 = vlog2.f32 %v2177_v12  ;;  %v5289_v30 = vadd.f32 %v2392_v50, %v2376_v44 }
 0x3f1   : > { %v3371_v51 = vpop.eup %3370  ;;  %v2194_v57 = vmul.f32 0.6931472, %v3369_v32  ;;  %v2220_v22 = vadd.f32 %v2196_v61, %v2156_v26  ;;  %v2374_v53 = vmul.f32 0.5, %v2214_v1  ;;  %3394 = vlog2.f32 %v2257_v40 }
 0x3f2   : > { %v3373_v55 = vpop.eup %3372  ;;  %v2274_v10 = vmul.f32 0.6931472, %v3371_v51  ;;  %v2300_v29 = vadd.f32 %v2276_v7, %v2236_v52  ;;  %v2390_v60 = vmul.f32 0.5, %v2294_v3  ;;  %v2378_v59 = vmul.f32 0.5, %v2218_v41  ;;  %v2157_v51 = vld [vmem:[#allocation2 + $0x40] sm:$0xff] }
 0x3f3   : > { %v3375_v2 = vpop.eup %3374  ;;  %v2200_v62 = vmul.f32 0.6931472, %v3373_v55  ;;  %v2394_v6 = vmul.f32 0.5, %v2298_v14  ;;  %v2377_v23 = vmul.f32 0.5, %v2217_v28  ;;  %v2393_v20 = vmul.f32 0.5, %v2297_v56  ;;  %v2237_v52 = vld [vmem:[#allocation4 + $0x40] sm:$0xff] }
 0x3f4   : > { %v3377_v63 = vpop.eup %3376  ;;  %v2219_v15 = vadd.f32 %v2194_v57, %v2155_v24  ;;  %v2299_v58 = vadd.f32 %v2274_v10, %v2235_v9  ;;  %3396 = vlog2.f32 %v2180_v45  ;;  %v2380_v25 = vmul.f32 0.5, %v2220_v22  ;;  %v5897_v28 = vld [vmem:[#allocation65_spill] sm:$0xff]  ;;  %v2160_v45 = vld [vmem:[#allocation2 + $0x58] sm:$0xff] }
 0x3f5   : > { %v3379_v46 = vpop.eup %3378  ;;  %v2396_v16 = vmul.f32 0.5, %v2300_v29  ;;  %v5293_v37 = vadd.s32 %v5253_v27, %v5895_v47  ;;  %3398 = vlog2.f32 %v2260_v34  ;;  %vm2456_vm6 = vcmp.lt.s32.totalorder %v5269_v0, 200  ;;  %v5899_v47 = vld [vmem:[#allocation68_spill] sm:$0xff] }
 0x3f6   : > { %v3381_v33 = vpop.eup %3380  ;;  %v2222_v49 = vadd.f32 %v2200_v62, %v2158_v8  ;;  %v2280_v32 = vmul.f32 0.6931472, %v3375_v2  ;;  %v2198_v4 = vmul.f32 0.6931472, %v3377_v63  ;;  %3400 = vlog2.f32 %v2179_v36 }
 0x3f7   : > { %v3383_v21 = vpop.eup %3382  ;;  %v5297_v35 = vadd.f32 %v2390_v60, %v2374_v53  ;;  %v5299_v42 = vadd.f32 %v2394_v6, %v2378_v59  ;;  %v2278_v31 = vmul.f32 0.6931472, %v3379_v46  ;;  %3402 = vlog2.f32 %v2259_v39  ;;  %v5898_v60 = vld [vmem:[#allocation66_spill] sm:$0xff] }
 0x3f8   : > { %v3385_v44 = vpop.eup %3384  ;;  %v5301_v50 = vadd.f32 %v2393_v20, %v2377_v23  ;;  %v2379_v1 = vmul.f32 0.5, %v2219_v15  ;;  %v2395_v3 = vmul.f32 0.5, %v2299_v58  ;;  %v5305_v26 = vadd.s32 %v5253_v27, %v5896_v13  ;;  %v2240_v6 = vld [vmem:[#allocation4 + $0x58] sm:$0xff]  ;;  %v2159_v15 = vld [vmem:[#allocation2 + $0x50] sm:$0xff] }
 0x3f9   : > { %v3387_v12 = vpop.eup %3386  ;;  %v5307_v14 = vadd.f32 %v2396_v16, %v2380_v25  ;;  %v5311_v40 = vadd.s32 %v5253_v27, %v5897_v28  ;;  %vm2460_vm7 = vcmp.lt.s32.totalorder %v5273_v38, 200  ;;  %v2302_v56 = vadd.f32 %v2280_v32, %v2238_v11  ;;  %v2239_v58 = vld [vmem:[#allocation4 + $0x50] sm:$0xff]  ;;  %v2244_v38 = vld [vmem:[#allocation4 + $0x78] sm:$0xff] }
 0x3fa   : > { %v2382_v57 = vmul.f32 0.5, %v2222_v49  ;;  %v2221_v10 = vadd.f32 %v2198_v4, %v2157_v51  ;;  %v2204_v22 = vmul.f32 0.6931472, %v3381_v33  ;;  %v2301_v9 = vadd.f32 %v2278_v31, %v2237_v52 }
 0x3fb   : > { %v2284_v2 = vmul.f32 0.6931472, %v3383_v21  ;;  %v3389_v53 = vpop.eup %3388  ;;  %v5317_v63 = vadd.f32 %v2395_v3, %v2379_v1  ;;  %v5321_v59 = vadd.s32 %v5253_v27, %v5898_v60  ;;  %v2202_v23 = vmul.f32 0.6931472, %v3385_v44 }
 0x3fc   : > { %v2282_v8 = vmul.f32 0.6931472, %v3387_v12  ;;  %vm2462_vm9 = vcmp.lt.s32.totalorder %v5283_v48, 200  ;;  %vm2461_vm10 = vcmp.lt.s32.totalorder %v5293_v37, 200  ;;  %v2398_v25 = vmul.f32 0.5, %v2302_v56  ;;  %v2242_v12 = vld [vmem:[#allocation4 + $0x68] sm:$0xff] }
 0x3fd   : > { %v2381_v16 = vmul.f32 0.5, %v2221_v10  ;;  %v2224_v18 = vadd.f32 %v2204_v22, %v2160_v45  ;;  %v5335_v54 = vadd.s32 %v5253_v27, %v5899_v47  ;;  %v2397_v4 = vmul.f32 0.5, %v2301_v9  ;;  %v2161_v9 = vld [vmem:[#allocation2 + $0x60] sm:$0xff] }
 0x3fe   : > { %v2304_v21 = vadd.f32 %v2284_v2, %v2240_v6  ;;  %v2223_v31 = vadd.f32 %v2202_v23, %v2159_v15  ;;  %v2303_v44 = vadd.f32 %v2282_v8, %v2239_v58  ;;  %vm2464_vm11 = vcmp.lt.s32.totalorder %v5305_v26, 200  ;;  %v2241_v45 = vld [vmem:[#allocation4 + $0x60] sm:$0xff]  ;;  %v2164_v58 = vld [vmem:[#allocation2 + $0x78] sm:$0xff] }
 0x3ff   : > { %vm2463_vm12 = vcmp.lt.s32.totalorder %v5311_v40, 200  ;;  %v2384_v43 = vmul.f32 0.5, %v2224_v18  ;;  %vm2466_vm13 = vcmp.lt.s32.totalorder %v5321_v59, 200  ;;  %vm2465_vm14 = vcmp.lt.s32.totalorder %v5335_v54, 200 }
 0x456   : > { %v2330_v61 = vpop.xlane.xlu1 %2329 }
 0x457   : > { %v2326_v7 = vpop.xlane.xlu0 %2325  ;;  %v2359_v55 = vmul.f32 20.0, %v2330_v61  ;;  %v2208_v61 = vmul.f32 0.6931472, %v3389_v53 }
 0x458   : > { %v2357_v41 = vmul.f32 20.0, %v2326_v7 }
 0x459   : > { %v2423_v29 = vsub.f32 %v5279_v17, %v2359_v55  ;;  %v3391_v17 = vpop.eup %3390 }
 0x45a   : > { %v2421_v24 = vsub.f32 %v5285_v5, %v2357_v41  ;;  %v2332_v62 = vpop.xlane.xlu1 %2331  ;;  %v3393_v39 = vpop.eup %3392  ;;  %v2288_v7 = vmul.f32 0.6931472, %v3391_v17  ;;  %v5348_v41 = vadd.f32 %v2398_v25, %v2382_v57 }
 0x45b   : > { %v2328_v34 = vpop.xlane.xlu0 %2327  ;;  %v2473_v5 = vsel %vm2457_vm3, %v2423_v29, 0.0  ;;  %v2360_v46 = vmul.f32 20.0, %v2332_v62  ;;  %v3395_v33 = vpop.eup %3394  ;;  %v2206_v28 = vmul.f32 0.6931472, %v3393_v39  ;;  %v2413_v29 = vadd.f32 %v2397_v4, %v2381_v16  ;;  %v2243_v4 = vld [vmem:[#allocation4 + $0x70] sm:$0xff] }
 0x45c   : > { %v2471_v36 = vsel %vm2455_vm4, %v2421_v24, 0.0  ;;  %v2358_v20 = vmul.f32 20.0, %v2328_v34  ;;  %2489 = vst.msk [vmem:[%s3891_s10 + $0x10] sm:$0xff] %vm1680_vm2, %v2473_v5  ;;  %v3397_v1 = vpop.eup %3396  ;;  %v2286_v56 = vmul.f32 0.6931472, %v3395_v33  ;;  %v2400_v24 = vmul.f32 0.5, %v2304_v21 }
 0x45d   : > { %2487 = vst.msk [vmem:[%s3891_s10] sm:$0xff] %vm1680_vm2, %v2471_v36  ;;  %v2424_v49 = vsub.f32 %v5289_v30, %v2360_v46  ;;  %v3399_v55 = vpop.eup %3398  ;;  %v2383_v62 = vmul.f32 0.5, %v2223_v31  ;;  %v2399_v34 = vmul.f32 0.5, %v2303_v44  ;;  %v2306_v6 = vadd.f32 %v2288_v7, %v2242_v12 }
 0x45e   : > { %v2422_v32 = vsub.f32 %v5297_v35, %v2358_v20  ;;  %v2336_v11 = vpop.xlane.xlu1 %2335  ;;  %v2162_v35 = vld [vmem:[#allocation2 + $0x68] sm:$0xff]  ;;  %v3401_v0 = vpop.eup %3400  ;;  %v2225_v17 = vadd.f32 %v2206_v28, %v2161_v9  ;;  %v2305_v5 = vadd.f32 %v2286_v56, %v2241_v45  ;;  %v2212_v36 = vmul.f32 0.6931472, %v3397_v1 }
 0x45f   : > { %v2334_v51 = vpop.xlane.xlu0 %2333  ;;  %v2474_v3 = vsel %vm2458_vm5, %v2424_v49, 0.0  ;;  %v2362_v30 = vmul.f32 20.0, %v2336_v11  ;;  %v3403_v2 = vpop.eup %3402  ;;  %v2226_v60 = vadd.f32 %v2208_v61, %v2162_v35  ;;  %v2292_v46 = vmul.f32 0.6931472, %v3399_v55  ;;  %v5901_v35 = vld [vmem:[#allocation72_spill] sm:$0xff] }
 0x460   : > { %v2472_v13 = vsel %vm2456_vm6, %v2422_v32, 0.0  ;;  %v2361_v52 = vmul.f32 20.0, %v2334_v51  ;;  %2490 = vst.msk [vmem:[%s3891_s10 + $0x18] sm:$0xff] %vm1680_vm2, %v2474_v3  ;;  %v2210_v19 = vmul.f32 0.6931472, %v3401_v0  ;;  %v2416_v18 = vadd.f32 %v2400_v24, %v2384_v43  ;;  %v2163_v32 = vld [vmem:[#allocation2 + $0x70] sm:$0xff] }
 0x461   : > { %2488 = vst.msk [vmem:[%s3891_s10 + $0x8] sm:$0xff] %vm1680_vm2, %v2472_v13  ;;  %v2426_v10 = vsub.f32 %v5299_v42, %v2362_v30  ;;  %v2290_v39 = vmul.f32 0.6931472, %v3403_v2  ;;  %v2415_v47 = vadd.f32 %v2399_v34, %v2383_v62  ;;  %v2386_v33 = vmul.f32 0.5, %v2226_v60  ;;  %v5900_v30 = vld [vmem:[#allocation70_spill] sm:$0xff] }
 0x462   : > { %v2425_v22 = vsub.f32 %v5301_v50, %v2361_v52  ;;  %v2340_v53 = vpop.xlane.xlu1 %2339  ;;  %v2402_v49 = vmul.f32 0.5, %v2306_v6  ;;  %v2385_v51 = vmul.f32 0.5, %v2225_v17  ;;  %v2401_v31 = vmul.f32 0.5, %v2305_v5  ;;  %v5902_v34 = vld [vmem:[#allocation74_spill] sm:$0xff]  ;;  %v5903_v6 = vld [vmem:[#allocation76_spill] sm:$0xff] }
 0x463   : > { %v2338_v57 = vpop.xlane.xlu0 %2337  ;;  %v2476_v23 = vsel %vm2460_vm7, %v2426_v10, 0.0  ;;  %v2364_v50 = vmul.f32 20.0, %v2340_v53  ;;  %v2228_v44 = vadd.f32 %v2212_v36, %v2164_v58  ;;  %v2308_v61 = vadd.f32 %v2292_v46, %v2244_v38 }
 0x464   : > { %v2475_v42 = vsel %vm2459_vm8, %v2425_v22, 0.0  ;;  %v2363_v8 = vmul.f32 20.0, %v2338_v57  ;;  %2492 = vst.msk [vmem:[%s3891_s10 + $0x28] sm:$0xff] %vm1680_vm2, %v2476_v23  ;;  %v2227_v48 = vadd.f32 %v2210_v19, %v2163_v32  ;;  %v2307_v3 = vadd.f32 %v2290_v39, %v2243_v4 }
 0x465   : > { %2491 = vst.msk [vmem:[%s3891_s10 + $0x20] sm:$0xff] %vm1680_vm2, %v2475_v42  ;;  %v2428_v20 = vsub.f32 %v5307_v14, %v2364_v50  ;;  %v2452_v52 = vadd.s32 %v5253_v27, %v5900_v30  ;;  %v2451_v12 = vadd.s32 %v5253_v27, %v5901_v35  ;;  %v2418_v56 = vadd.f32 %v2402_v49, %v2386_v33 }
 0x466   : > { %v2427_v15 = vsub.f32 %v5317_v63, %v2363_v8  ;;  %v2344_v25 = vpop.xlane.xlu1 %2343  ;;  %v2417_v0 = vadd.f32 %v2401_v31, %v2385_v51  ;;  %v2388_v10 = vmul.f32 0.5, %v2228_v44  ;;  %v2404_v22 = vmul.f32 0.5, %v2308_v61 }
 0x467   : > { %v2342_v16 = vpop.xlane.xlu0 %2341  ;;  %v2478_v21 = vsel %vm2462_vm9, %v2428_v20, 0.0  ;;  %v2366_v63 = vmul.f32 20.0, %v2344_v25  ;;  %v2387_v9 = vmul.f32 0.5, %v2227_v48  ;;  %v2403_v26 = vmul.f32 0.5, %v2307_v3 }
 0x468   : > { %v2477_v14 = vsel %vm2461_vm10, %v2427_v15, 0.0  ;;  %v2365_v11 = vmul.f32 20.0, %v2342_v16  ;;  %2494 = vst.msk [vmem:[%s3891_s10 + $0x38] sm:$0xff] %vm1680_vm2, %v2478_v21  ;;  %vm2468_vm15 = vcmp.lt.s32.totalorder %v2452_v52, 200  ;;  %vm2467_vm0 = vcmp.lt.s32.totalorder %v2451_v12, 200 }
 0x469   : > { %2493 = vst.msk [vmem:[%s3891_s10 + $0x30] sm:$0xff] %vm1680_vm2, %v2477_v14  ;;  %v2430_v7 = vsub.f32 %v5348_v41, %v2366_v63  ;;  %v2454_v60 = vadd.s32 %v5253_v27, %v5902_v34  ;;  %v2453_v59 = vadd.s32 %v5253_v27, %v5903_v6  ;;  %v2420_v54 = vadd.f32 %v2404_v22, %v2388_v10 }
 0x46a   : > { %v2429_v1 = vsub.f32 %v2413_v29, %v2365_v11  ;;  %v2348_v37 = vpop.xlane.xlu1 %2347  ;;  %v2419_v50 = vadd.f32 %v2403_v26, %v2387_v9 }
 0x46b   : > { %v2346_v13 = vpop.xlane.xlu0 %2345  ;;  %v2480_v55 = vsel %vm2464_vm11, %v2430_v7, 0.0  ;;  %v2368_v43 = vmul.f32 20.0, %v2348_v37  ;;  %vm2470_vm1 = vcmp.lt.s32.totalorder %v2454_v60, 200  ;;  %vm2469_vm3 = vcmp.lt.s32.totalorder %v2453_v59, 200 }
 0x46c   : > { %v2479_v41 = vsel %vm2463_vm12, %v2429_v1, 0.0  ;;  %v2367_v28 = vmul.f32 20.0, %v2346_v13  ;;  %2496 = vst.msk [vmem:[%s3891_s10 + $0x48] sm:$0xff] %vm1680_vm2, %v2480_v55 }
 0x46d   : > { %2495 = vst.msk [vmem:[%s3891_s10 + $0x40] sm:$0xff] %vm1680_vm2, %v2479_v41  ;;  %v2432_v29 = vsub.f32 %v2416_v18, %v2368_v43 }
 0x46e   : > { %v2431_v24 = vsub.f32 %v2415_v47, %v2367_v28  ;;  %v2352_v45 = vpop.xlane.xlu1 %2351 }
 0x46f   : > { %v2350_v2 = vpop.xlane.xlu0 %2349  ;;  %v2482_v40 = vsel %vm2466_vm13, %v2432_v29, 0.0  ;;  %v2370_v57 = vmul.f32 20.0, %v2352_v45 }
 0x470   : > { %v2481_v53 = vsel %vm2465_vm14, %v2431_v24, 0.0  ;;  %v2369_v62 = vmul.f32 20.0, %v2350_v2  ;;  %2498 = vst.msk [vmem:[%s3891_s10 + $0x58] sm:$0xff] %vm1680_vm2, %v2482_v40 }
 0x471   : > { %2497 = vst.msk [vmem:[%s3891_s10 + $0x50] sm:$0xff] %vm1680_vm2, %v2481_v53  ;;  %v2434_v23 = vsub.f32 %v2418_v56, %v2370_v57 }
 0x472   : > { %v2433_v42 = vsub.f32 %v2417_v0, %v2369_v62  ;;  %v2356_v8 = vpop.xlane.xlu1 %2355 }
 0x473   : > { %v2354_v17 = vpop.xlane.xlu0 %2353  ;;  %v2484_v5 = vsel %vm2468_vm15, %v2434_v23, 0.0  ;;  %v2372_v46 = vmul.f32 20.0, %v2356_v8 }
 0x474   : > { %v2483_v36 = vsel %vm2467_vm0, %v2433_v42, 0.0  ;;  %v2371_v20 = vmul.f32 20.0, %v2354_v17  ;;  %2500 = vst.msk [vmem:[%s3891_s10 + $0x68] sm:$0xff] %vm1680_vm2, %v2484_v5 }
 0x475   : > { %2499 = vst.msk [vmem:[%s3891_s10 + $0x60] sm:$0xff] %vm1680_vm2, %v2483_v36  ;;  %v2436_v15 = vsub.f32 %v2420_v54, %v2372_v46 }
 0x476   : > { %v2435_v27 = vsub.f32 %v2419_v50, %v2371_v20 }
 0x477   : > { %v2486_v58 = vsel %vm2470_vm1, %v2436_v15, 0.0 }
 0x478   : > { %v2485_v38 = vsel %vm2469_vm3, %v2435_v27, 0.0  ;;  %2502 = vst.msk [vmem:[%s3891_s10 + $0x78] sm:$0xff] %vm1680_vm2, %v2486_v58 }
 0x479   : > { %2501 = vst.msk [vmem:[%s3891_s10 + $0x70] sm:$0xff] %vm1680_vm2, %v2485_v38 }
 0x47a PF: > { %s23_s25 = sadd.s32 1, %s3618_s25   ;;  %s5904_s22 = sld [smem:[#allocation21_spill]] }
 0x47b   : > { %p20_p4 = scmp.ge.s32.totalorder %s23_s25, 6   ;;  %s5905_s5 = sld [smem:[#allocation22_spill]] }
 0x47c   : > { %s5906_s0 = sld [smem:[#allocation18_spill]]  ;;  %s5909_s15 = smov %s3582_s16 }
 0x47d   : > { %s5907_s4 = sld [smem:[#allocation19_spill]]  ;;  %s5910_s16 = smov %s3586_s17 }
 0x47e   : > { %s5908_s24 = sld [smem:[#allocation20_spill]]  ;;  %s5912_s18 = smov %s3594_s19 }
 0x47f   : > { %s5913_s19 = smov %s3598_s20  ;;  %s5915_s21 = smov %s3610_s23 }
 0x480   : > { %s5911_s17 = smov %s5904_s22  ;;  %22 = sbr.rel (!%p20_p4) target bundleno = 16 (0x10), region = 121 }
 0x481   : > { %s5914_s20 = smov %s5905_s5 }
 0x482   : > { %s5916_s22 = smov %s5906_s0 }
 0x483   : > { %s5917_s23 = smov %s5907_s4 }
 0x485   :  { %2525 = vsyncpa [#allocation7], 1 }
 0x486   :  { %2527 = vsyncpa [#allocation7 + $0x1], 1 }
 0x487   :  { %2528 = vsyncpa [#allocation9], 1 }
 0x488   :  { %2530 = vsyncpa [#allocation9 + $0x1], 1 }
 0x489   :  { %2531 = vsyncpa [#allocation12], 1 }
 0x48a   :  { %2533 = vsyncpa [#allocation12 + $0x1], 1 }

</bundles_post_ra>
